<compile_context>
chip_gen: v6e
topology: v6e:2x2x1
jax: 0.10.0
libtpu: 0.0.40
codegen_flags: <defaults>
</compile_context>

<pallas_src>
import math
from functools import partial

import jax
import jax.numpy as jnp
from jax import lax
from jax.experimental import pallas as pl
from jax.experimental.pallas import tpu as pltpu

LN_EPS = 1e-5                      # PyTorch LayerNorm / TransformerEncoderLayer default
MXU_DTYPE = jnp.bfloat16           # matmul operand dtype (fp32 accumulation); jnp.float32 => bit-exact
ACT_DTYPE = jnp.float32            # residual-stream dtype
TM_TARGET = 256                    # row-tile target (multiple of 8), sized for the v7x VMEM budget
VMEM_LIMIT_BYTES = 32 * 1024 * 1024


def _compiler_params():
    # All grids here are rank-1 and fully data-parallel across blocks.
    return pltpu.CompilerParams(
        dimension_semantics=("parallel",),
        vmem_limit_bytes=VMEM_LIMIT_BYTES,
    )


def _row_tile(m):
    # Full array if small (block dim == full dim is always legal), else a 256-row tile
    # (multiple of 8; pl.cdiv grid handles a partial trailing block for large M).
    return m if m <= TM_TARGET else TM_TARGET


# ---------------------------------------------------------------------------
# In-kernel math helpers (all fp32, VPU/EUP ops only)
# ---------------------------------------------------------------------------
_SQRT_HALF = 1.0 / math.sqrt(2.0)


def _erf_f32(x):
    # Abramowitz & Stegun 7.1.26 rational approximation, |error| <= 1.5e-7 (float32 precision).
    a1, a2, a3, a4, a5 = 0.254829592, -0.284496736, 1.421413741, -1.453152027, 1.061405429
    p = 0.3275911
    ax = jnp.abs(x)
    t = 1.0 / (1.0 + p * ax)
    poly = ((((a5 * t + a4) * t + a3) * t + a2) * t + a1) * t
    y = 1.0 - poly * jnp.exp(-(ax * ax))
    return jnp.where(x < 0.0, -y, y)


def _gelu_exact(x):
    # Matches PyTorch F.gelu(approximate='none') to float32 precision.
    return 0.5 * x * (1.0 + _erf_f32(x * _SQRT_HALF))


def _layernorm_f32(x, g, b):
    mu = jnp.mean(x, axis=-1, keepdims=True)
    xc = x - mu
    var = jnp.mean(xc * xc, axis=-1, keepdims=True)      # biased var (PyTorch LayerNorm)
    return (xc * lax.rsqrt(var + LN_EPS)) * g + b


# ---------------------------------------------------------------------------
# Pallas kernel bodies
# ---------------------------------------------------------------------------
def _linear_kernel(x_ref, w_ref, b_ref, o_ref):
    y = jnp.dot(x_ref[...].astype(w_ref.dtype), w_ref[...],
                preferred_element_type=jnp.float32)
    o_ref[...] = (y + b_ref[...]).astype(o_ref.dtype)


def _linear_residual_kernel(x_ref, w_ref, b_ref, r_ref, o_ref):
    y = jnp.dot(x_ref[...].astype(w_ref.dtype), w_ref[...],
                preferred_element_type=jnp.float32)
    o_ref[...] = (r_ref[...].astype(jnp.float32) + y + b_ref[...]).astype(o_ref.dtype)


def _ln_linear_kernel(x_ref, g_ref, beta_ref, w_ref, b_ref, o_ref, *, apply_gelu):
    xn = _layernorm_f32(x_ref[...].astype(jnp.float32), g_ref[...], beta_ref[...])
    y = jnp.dot(xn.astype(w_ref.dtype), w_ref[...],
                preferred_element_type=jnp.float32) + b_ref[...]
    if apply_gelu:
        y = _gelu_exact(y)
    o_ref[...] = y.astype(o_ref.dtype)


def _ln_qkv_kernel(x_ref, g_ref, beta_ref,
                   wq_ref, bq_ref, wk_ref, bk_ref, wv_ref, bv_ref,
                   q_ref, k_ref, v_ref):
    # LayerNorm once, three resident-weight matmuls; q/k/v emitted as separate lane-dense buffers.
    xn = _layernorm_f32(x_ref[...].astype(jnp.float32), g_ref[...], beta_ref[...])
    xm = xn.astype(wq_ref.dtype)
    q_ref[...] = (jnp.dot(xm, wq_ref[...], preferred_element_type=jnp.float32)
                  + bq_ref[...]).astype(q_ref.dtype)
    k_ref[...] = (jnp.dot(xm, wk_ref[...], preferred_element_type=jnp.float32)
                  + bk_ref[...]).astype(k_ref.dtype)
    v_ref[...] = (jnp.dot(xm, wv_ref[...], preferred_element_type=jnp.float32)
                  + bv_ref[...]).astype(v_ref.dtype)


def _attn_kernel(q_ref, k_ref, v_ref, o_ref, *, n_heads, scale):
    # One batch element per grid step; all heads handled in-kernel (static unrolled loop).
    q = q_ref[0]                      # (N, D), MXU dtype
    k = k_ref[0]
    v = v_ref[0]
    d_model = q.shape[-1]
    dh = d_model // n_heads
    outs = []
    for h in range(n_heads):
        lo = h * dh
        qh = q[:, lo:lo + dh]
        kh = k[:, lo:lo + dh]
        vh = v[:, lo:lo + dh]
        # Contract the last dims directly -> no explicit K transpose.
        s = lax.dot_general(qh, kh, (((1,), (1,)), ((), ())),
                            preferred_element_type=jnp.float32) * scale        # (N, N) fp32
        m = jnp.max(s, axis=-1, keepdims=True)
        p = jnp.exp(s - m)
        l = jnp.sum(p, axis=-1, keepdims=True)
        oh = jnp.dot(p.astype(vh.dtype), vh, preferred_element_type=jnp.float32)  # (N, dh)
        # Defer normalisation to the (N, dh) output; reciprocal rides on the EUP slot.
        outs.append(oh * pl.reciprocal(l, approx=True))
    o_ref[0] = jnp.concatenate(outs, axis=-1).astype(o_ref.dtype)               # lane-dense (N, D)


# ---------------------------------------------------------------------------
# pallas_call wrappers: row-tiled grids, resident weights, parallel semantics
# ---------------------------------------------------------------------------
def pallas_linear(x, w, b, *, out_dtype=ACT_DTYPE):
    M, K = x.shape
    N = w.shape[1]
    tm = _row_tile(M)
    return pl.pallas_call(
        _linear_kernel,
        out_shape=jax.ShapeDtypeStruct((M, N), out_dtype),
        grid=(pl.cdiv(M, tm),),
        in_specs=[
            pl.BlockSpec((tm, K), lambda i: (i, 0)),
            pl.BlockSpec((K, N), lambda i: (0, 0)),    # weight resident across the row loop
            pl.BlockSpec((1, N), lambda i: (0, 0)),
        ],
        out_specs=pl.BlockSpec((tm, N), lambda i: (i, 0)),
        compiler_params=_compiler_params(),
    )(x, w, b.reshape(1, N))


def pallas_linear_residual(x, w, b, res):
    M, K = x.shape
    N = w.shape[1]
    tm = _row_tile(M)
    return pl.pallas_call(
        _linear_residual_kernel,
        out_shape=jax.ShapeDtypeStruct((M, N), res.dtype),
        grid=(pl.cdiv(M, tm),),
        in_specs=[
            pl.BlockSpec((tm, K), lambda i: (i, 0)),
            pl.BlockSpec((K, N), lambda i: (0, 0)),
            pl.BlockSpec((1, N), lambda i: (0, 0)),
            pl.BlockSpec((tm, N), lambda i: (i, 0)),
        ],
        out_specs=pl.BlockSpec((tm, N), lambda i: (i, 0)),
        input_output_aliases={3: 0},                    # write the residual stream in place
        compiler_params=_compiler_params(),
    )(x, w, b.reshape(1, N), res)


def pallas_ln_linear(x, gamma, beta, w, b, *, apply_gelu=False, out_dtype=ACT_DTYPE):
    M, K = x.shape
    N = w.shape[1]
    tm = _row_tile(M)
    return pl.pallas_call(
        partial(_ln_linear_kernel, apply_gelu=apply_gelu),
        out_shape=jax.ShapeDtypeStruct((M, N), out_dtype),
        grid=(pl.cdiv(M, tm),),
        in_specs=[
            pl.BlockSpec((tm, K), lambda i: (i, 0)),
            pl.BlockSpec((1, K), lambda i: (0, 0)),
            pl.BlockSpec((1, K), lambda i: (0, 0)),
            pl.BlockSpec((K, N), lambda i: (0, 0)),
            pl.BlockSpec((1, N), lambda i: (0, 0)),
        ],
        out_specs=pl.BlockSpec((tm, N), lambda i: (i, 0)),
        compiler_params=_compiler_params(),
    )(x, gamma.reshape(1, K), beta.reshape(1, K), w, b.reshape(1, N))


def pallas_ln_qkv(x, gamma, beta, wq, bq, wk, bk, wv, bv):
    M, K = x.shape
    D = wq.shape[1]
    tm = _row_tile(M)
    row_spec = pl.BlockSpec((tm, K), lambda i: (i, 0))
    vec_k = pl.BlockSpec((1, K), lambda i: (0, 0))
    w_spec = pl.BlockSpec((K, D), lambda i: (0, 0))
    vec_d = pl.BlockSpec((1, D), lambda i: (0, 0))
    out_spec = pl.BlockSpec((tm, D), lambda i: (i, 0))
    out_sds = jax.ShapeDtypeStruct((M, D), MXU_DTYPE)
    return pl.pallas_call(
        _ln_qkv_kernel,
        out_shape=(out_sds, out_sds, out_sds),
        grid=(pl.cdiv(M, tm),),
        in_specs=[row_spec, vec_k, vec_k,
                  w_spec, vec_d, w_spec, vec_d, w_spec, vec_d],
        out_specs=(out_spec, out_spec, out_spec),
        compiler_params=_compiler_params(),
    )(x, gamma.reshape(1, K), beta.reshape(1, K),
      wq, bq.reshape(1, D), wk, bk.reshape(1, D), wv, bv.reshape(1, D))


def pallas_attention(q, k, v, n_heads):
    # q, k, v: (B, N, D); one batch element (all heads) per grid step, lane-dense (N, D) output.
    B, N, D = q.shape
    scale = 1.0 / math.sqrt(D // n_heads)
    spec = pl.BlockSpec((1, N, D), lambda b: (b, 0, 0))
    return pl.pallas_call(
        partial(_attn_kernel, n_heads=n_heads, scale=scale),
        out_shape=jax.ShapeDtypeStruct((B, N, D), MXU_DTYPE),
        grid=(B,),
        in_specs=[spec, spec, spec],
        out_specs=spec,
        compiler_params=_compiler_params(),
    )(q, k, v)


# ---------------------------------------------------------------------------
# Model glue (padding, im2col, token assembly) — cheap XLA ops outside the hot loop
# ---------------------------------------------------------------------------
def _patch_geometry(spec_shape, patch_size, stride):
    # Reproduces PatchEmbed.__init__ / nn.ZeroPad2d((0, freq_pad, 0, time_pad)) semantics:
    # freq_pad is applied to the LAST dim (W), time_pad to the second-to-last dim (H).
    freq_pad = (stride - (spec_shape[0] - patch_size)) % stride
    time_pad = (stride - (spec_shape[1] - patch_size)) % stride
    Hp = spec_shape[0] + time_pad
    Wp = spec_shape[1] + freq_pad
    Hout = (Hp - patch_size) // stride + 1
    Wout = (Wp - patch_size) // stride + 1
    return freq_pad, time_pad, Hout, Wout


def _im2col(x, patch_size, stride):
    # x: (B, C, Hp, Wp) -> (B*Hout*Wout, C*P*P), patch vector order (c, kh, kw),
    # token order row-major over (Hout, Wout) to match conv.flatten(2).transpose(1, 2).
    B, C, Hp, Wp = x.shape
    P, S = patch_size, stride
    Hout = (Hp - P) // S + 1
    Wout = (Wp - P) // S + 1
    ih = (jnp.arange(Hout) * S)[:, None] + jnp.arange(P)[None, :]   # (Hout, P)
    iw = (jnp.arange(Wout) * S)[:, None] + jnp.arange(P)[None, :]   # (Wout, P)
    patches = x[:, :, ih[:, None, :, None], iw[None, :, None, :]]   # (B, C, Hout, Wout, P, P)
    patches = jnp.transpose(patches, (0, 2, 3, 1, 4, 5))            # (B, Hout, Wout, C, P, P)
    return patches.reshape(B * Hout * Wout, C * P * P), Hout, Wout


def ast_forward(params, x, cfg):
    B, C, H, W = x.shape
    D = cfg["d_model"]
    Hh = cfg["n_heads"]
    P, S = cfg["patch_size"], cfg["patch_stride"]
    n_emb = cfg["n_embed_tokens"]

    # --- PatchEmbed: zero pad + conv-as-im2col-matmul ---
    freq_pad, time_pad, _, _ = _patch_geometry(cfg["spec_shape"], P, S)
    xp = jnp.pad(x, ((0, 0), (0, 0), (0, time_pad), (0, freq_pad)))
    patches, Hout, Wout = _im2col(xp, P, S)
    tokens = pallas_linear(patches, params["w_patch"], params["b_patch"])     # (B*T, D) fp32
    tokens = tokens.reshape(B, Hout * Wout, D)

    # --- prepend embed tokens, add positional encoding ---
    et = jnp.broadcast_to(params["embed_tokens"], (B, n_emb, D))
    h = jnp.concatenate([et, tokens], axis=1)
    N = h.shape[1]
    h = h + params["pe"][:, :N, :]
    hf = h.reshape(B * N, D)                                                  # fp32 residual stream

    # --- pre-norm transformer encoder layers ---
    for layer in params["layers"]:
        # self-attention block: x + Wo(MHA(LN1(x)))
        q, k, v = pallas_ln_qkv(hf, layer["ln1_g"], layer["ln1_b"],
                                layer["w_q"], layer["b_q"],
                                layer["w_k"], layer["b_k"],
                                layer["w_v"], layer["b_v"])                   # (B*N, D) each
        attn = pallas_attention(q.reshape(B, N, D), k.reshape(B, N, D),
                                v.reshape(B, N, D), Hh)                       # (B, N, D)
        hf = pallas_linear_residual(attn.reshape(B * N, D),
                                    layer["w_o"], layer["b_o"], hf)

        # feed-forward block: x + W2(gelu(W1(LN2(x))))
        ff = pallas_ln_linear(hf, layer["ln2_g"], layer["ln2_b"],
                              layer["w_ff1"], layer["b_ff1"],
                              apply_gelu=True, out_dtype=MXU_DTYPE)
        hf = pallas_linear_residual(ff, layer["w_ff2"], layer["b_ff2"], hf)

    # --- take embed token(s), MLP projection head ---
    cls = hf.reshape(B, N, D)[:, :n_emb, :].reshape(B * n_emb, D)
    z = pallas_ln_linear(cls, params["head_ln_g"], params["head_ln_b"],
                         params["head_w1"], params["head_b1"],
                         apply_gelu=True, out_dtype=MXU_DTYPE)
    out = pallas_linear(z, params["head_w2"], params["head_b2"], out_dtype=jnp.float32)
    out = out.reshape(B, n_emb, cfg["d_out"])
    if n_emb == 1:
        out = jnp.squeeze(out, axis=1)            # .squeeze(1)
    return out


# ---------------------------------------------------------------------------
# Deterministic synthetic parameter init (shapes match the PyTorch module)
# ---------------------------------------------------------------------------
def init_params(key, cfg, num_tokens):
    D = cfg["d_model"]
    P = cfg["patch_size"]
    C = cfg["input_channels"]
    keys = iter(jax.random.split(key, 16 + 16 * cfg["n_layers"]))

    def nrm(shape, std=0.02):
        return jax.random.normal(next(keys), shape, dtype=jnp.float32) * std

    params = {
        # Conv2d weight (D, C, P, P) stored pre-flattened as (C*P*P, D) in (c, kh, kw) order.
        "w_patch": nrm((C * P * P, D)),
        "b_patch": nrm((D,)),
        "embed_tokens": nrm((1, cfg["n_embed_tokens"], D), std=1e-6),
        "pe": nrm((1, num_tokens + cfg["n_embed_tokens"], D), std=0.02),
        "layers": [],
        "head_ln_g": jnp.ones((D,), jnp.float32),
        "head_ln_b": jnp.zeros((D,), jnp.float32),
        "head_w1": nrm((D, D)),
        "head_b1": nrm((D,)),
        "head_w2": nrm((D, cfg["d_out"])),
        "head_b2": nrm((cfg["d_out"],)),
    }
    for _ in range(cfg["n_layers"]):
        w_qkv = nrm((D, 3 * D))          # packed [q | k | v] columns, split like in_proj_weight
        b_qkv = nrm((3 * D,))
        params["layers"].append({
            "ln1_g": jnp.ones((D,), jnp.float32),
            "ln1_b": jnp.zeros((D,), jnp.float32),
            "w_q": w_qkv[:, :D], "b_q": b_qkv[:D],
            "w_k": w_qkv[:, D:2 * D], "b_k": b_qkv[D:2 * D],
            "w_v": w_qkv[:, 2 * D:], "b_v": b_qkv[2 * D:],
            "w_o": nrm((D, D)),
            "b_o": nrm((D,)),
            "ln2_g": jnp.ones((D,), jnp.float32),
            "ln2_b": jnp.zeros((D,), jnp.float32),
            "w_ff1": nrm((D, D)),        # dim_feedforward = d_model in the module
            "b_ff1": nrm((D,)),
            "w_ff2": nrm((D, D)),
            "b_ff2": nrm((D,)),
        })
    return params


def prepare_params(params):
    """One-time cast of matmul weights to the MXU operand dtype (accumulation stays fp32)."""
    def cw(w):
        return w.astype(MXU_DTYPE)
    p = dict(params)
    p["w_patch"] = cw(params["w_patch"])
    p["head_w1"] = cw(params["head_w1"])
    p["head_w2"] = cw(params["head_w2"])
    layers = []
    for layer in params["layers"]:
        l = dict(layer)
        for name in ("w_q", "w_k", "w_v", "w_o", "w_ff1", "w_ff2"):
            l[name] = cw(layer[name])
        layers.append(l)
    p["layers"] = layers
    return p


# ---------------------------------------------------------------------------
if __name__ == "__main__":
    cfg = dict(
        d_model=32, d_out=16, n_heads=4, n_layers=2, n_embed_tokens=1,
        patch_size=4, patch_stride=3, input_channels=2, spec_shape=(16, 16),
    )
    _, _, Hout, Wout = _patch_geometry(cfg["spec_shape"], cfg["patch_size"], cfg["patch_stride"])
    num_tokens = Hout * Wout

    key = jax.random.PRNGKey(0)
    kx, kp = jax.random.split(key)
    x = jax.random.normal(
        kx, (2, cfg["input_channels"], cfg["spec_shape"][0], cfg["spec_shape"][1]),
        dtype=jnp.float32)

    params = prepare_params(init_params(kp, cfg, num_tokens))
    fwd = jax.jit(partial(ast_forward, cfg=cfg))
    out = fwd(params, x)
    out = jax.block_until_ready(out)
    assert out.shape == (2, cfg["d_out"]), out.shape
    assert bool(jnp.all(jnp.isfinite(out)))
    print("KERNEL_OK")
</pallas_src>

<mosaic_0001>
module attributes {stable_mosaic.version = 11 : i64} {
  func.func @_linear_kernel(%arg0: i32, %arg1: memref<50x32xf32, #tpu.memory_space<vmem>>, %arg2: memref<32x32xbf16, #tpu.memory_space<vmem>>, %arg3: memref<1x32xf32, #tpu.memory_space<vmem>>, %arg4: memref<50x32xf32, #tpu.memory_space<vmem>>) attributes {dimension_semantics = [#tpu.dimension_semantics<parallel>], iteration_bounds = array<i64: 1>, scalar_prefetch = 0 : i64, scratch_operands = 0 : i64, tpu.core_type = #tpu.core_type<tc>, window_params = [{transform_indices = @transform_0, window_bounds = array<i64: 50, 32>}, {pipeline_mode = #tpu.pipeline_mode<synchronous>, transform_indices = @transform_1, window_bounds = array<i64: 32, 32>}, {pipeline_mode = #tpu.pipeline_mode<synchronous>, transform_indices = @transform_2, window_bounds = array<i64: 1, 32>}, {transform_indices = @transform_3, window_bounds = array<i64: 50, 32>}]} {
    %c0 = arith.constant 0 : index
    %c0_0 = arith.constant 0 : index
    %0 = vector.load %arg1[%c0, %c0_0] : memref<50x32xf32, #tpu.memory_space<vmem>>, vector<50x32xf32>
    %1 = arith.truncf %0 : vector<50x32xf32> to vector<50x32xbf16>
    %c0_1 = arith.constant 0 : index
    %c0_2 = arith.constant 0 : index
    %2 = vector.load %arg2[%c0_1, %c0_2] : memref<32x32xbf16, #tpu.memory_space<vmem>>, vector<32x32xbf16>
    %cst = arith.constant dense<0.000000e+00> : vector<50x32xf32>
    %3 = tpu.matmul %1, %2, %cst {dimension_numbers = #tpu.dot_dimension_numbers<[1], [0], [0], [1], [0, 0, 1, 1], [], []>} : vector<50x32xbf16>, vector<32x32xbf16>, vector<50x32xf32> -> vector<50x32xf32>
    %c0_3 = arith.constant 0 : index
    %c0_4 = arith.constant 0 : index
    %4 = vector.load %arg3[%c0_3, %c0_4] : memref<1x32xf32, #tpu.memory_space<vmem>>, vector<1x32xf32>
    %5 = vector.broadcast %4 : vector<1x32xf32> to vector<50x32xf32>
    %6 = arith.addf %3, %5 : vector<50x32xf32>
    %c0_5 = arith.constant 0 : index
    %c0_6 = arith.constant 0 : index
    %7 = vector.load %arg4[%c0_5, %c0_6] : memref<50x32xf32, #tpu.memory_space<vmem>>, vector<50x32xf32>
    tpu.vector_store %arg4[%c0_5, %c0_6], %6 {strides = array<i32>} : memref<50x32xf32, #tpu.memory_space<vmem>>, vector<50x32xf32>,
    return
  }
  func.func @transform_0(%arg0: i32) -> (i32, i32) {
    %c0_i32 = arith.constant 0 : i32
    %c0_i32_0 = arith.constant 0 : i32
    return %arg0, %c0_i32 : i32, i32
  }
  func.func @transform_1(%arg0: i32) -> (i32, i32) {
    %c0_i32 = arith.constant 0 : i32
    %c0_i32_0 = arith.constant 0 : i32
    %c0_i32_1 = arith.constant 0 : i32
    return %c0_i32, %c0_i32_0 : i32, i32
  }
  func.func @transform_2(%arg0: i32) -> (i32, i32) {
    %c0_i32 = arith.constant 0 : i32
    %c0_i32_0 = arith.constant 0 : i32
    %c0_i32_1 = arith.constant 0 : i32
    return %c0_i32, %c0_i32_0 : i32, i32
  }
  func.func @transform_3(%arg0: i32) -> (i32, i32) {
    %c0_i32 = arith.constant 0 : i32
    %c0_i32_0 = arith.constant 0 : i32
    return %arg0, %c0_i32 : i32, i32
  }
}

module attributes {stable_mosaic.version = 11 : i64} {
  func.func @_ln_qkv_kernel(%arg0: i32, %arg1: memref<52x32xf32, #tpu.memory_space<vmem>>, %arg2: memref<1x32xf32, #tpu.memory_space<vmem>>, %arg3: memref<1x32xf32, #tpu.memory_space<vmem>>, %arg4: memref<32x32xbf16, #tpu.memory_space<vmem>>, %arg5: memref<1x32xf32, #tpu.memory_space<vmem>>, %arg6: memref<32x32xbf16, #tpu.memory_space<vmem>>, %arg7: memref<1x32xf32, #tpu.memory_space<vmem>>, %arg8: memref<32x32xbf16, #tpu.memory_space<vmem>>, %arg9: memref<1x32xf32, #tpu.memory_space<vmem>>, %arg10: memref<52x32xbf16, #tpu.memory_space<vmem>>, %arg11: memref<52x32xbf16, #tpu.memory_space<vmem>>, %arg12: memref<52x32xbf16, #tpu.memory_space<vmem>>) attributes {dimension_semantics = [#tpu.dimension_semantics<parallel>], iteration_bounds = array<i64: 1>, scalar_prefetch = 0 : i64, scratch_operands = 0 : i64, tpu.core_type = #tpu.core_type<tc>, window_params = [{transform_indices = @transform_0, window_bounds = array<i64: 52, 32>}, {pipeline_mode = #tpu.pipeline_mode<synchronous>, transform_indices = @transform_1, window_bounds = array<i64: 1, 32>}, {pipeline_mode = #tpu.pipeline_mode<synchronous>, transform_indices = @transform_2, window_bounds = array<i64: 1, 32>}, {pipeline_mode = #tpu.pipeline_mode<synchronous>, transform_indices = @transform_3, window_bounds = array<i64: 32, 32>}, {pipeline_mode = #tpu.pipeline_mode<synchronous>, transform_indices = @transform_4, window_bounds = array<i64: 1, 32>}, {pipeline_mode = #tpu.pipeline_mode<synchronous>, transform_indices = @transform_5, window_bounds = array<i64: 32, 32>}, {pipeline_mode = #tpu.pipeline_mode<synchronous>, transform_indices = @transform_6, window_bounds = array<i64: 1, 32>}, {pipeline_mode = #tpu.pipeline_mode<synchronous>, transform_indices = @transform_7, window_bounds = array<i64: 32, 32>}, {pipeline_mode = #tpu.pipeline_mode<synchronous>, transform_indices = @transform_8, window_bounds = array<i64: 1, 32>}, {transform_indices = @transform_9, window_bounds = array<i64: 52, 32>}, {transform_indices = @transform_10, window_bounds = array<i64: 52, 32>}, {transform_indices = @transform_11, window_bounds = array<i64: 52, 32>}]} {
    %c0 = arith.constant 0 : index
    %c0_0 = arith.constant 0 : index
    %0 = vector.load %arg1[%c0, %c0_0] : memref<52x32xf32, #tpu.memory_space<vmem>>, vector<52x32xf32>
    %c0_1 = arith.constant 0 : index
    %c0_2 = arith.constant 0 : index
    %1 = vector.load %arg2[%c0_1, %c0_2] : memref<1x32xf32, #tpu.memory_space<vmem>>, vector<1x32xf32>
    %c0_3 = arith.constant 0 : index
    %c0_4 = arith.constant 0 : index
    %2 = vector.load %arg3[%c0_3, %c0_4] : memref<1x32xf32, #tpu.memory_space<vmem>>, vector<1x32xf32>
    %cst = arith.constant dense<0.000000e+00> : vector<52xf32>
    %3 = vector.multi_reduction <add>, %0, %cst [1] : vector<52x32xf32> to vector<52xf32>
    %4 = vector.shape_cast %3 : vector<52xf32> to vector<52x1xf32>
    %cst_5 = arith.constant 3.200000e+01 : f32
    %5 = vector.broadcast %cst_5 : f32 to vector<52x1xf32>
    %6 = arith.divf %4, %5 : vector<52x1xf32>
    %7 = vector.broadcast %6 : vector<52x1xf32> to vector<52x32xf32>
    %8 = arith.subf %0, %7 : vector<52x32xf32>
    %9 = arith.mulf %8, %8 : vector<52x32xf32>
    %cst_6 = arith.constant dense<0.000000e+00> : vector<52xf32>
    %10 = vector.multi_reduction <add>, %9, %cst_6 [1] : vector<52x32xf32> to vector<52xf32>
    %11 = vector.shape_cast %10 : vector<52xf32> to vector<52x1xf32>
    %cst_7 = arith.constant 3.200000e+01 : f32
    %12 = vector.broadcast %cst_7 : f32 to vector<52x1xf32>
    %13 = arith.divf %11, %12 : vector<52x1xf32>
    %cst_8 = arith.constant 9.99999974E-6 : f32
    %14 = vector.broadcast %cst_8 : f32 to vector<52x1xf32>
    %15 = arith.addf %13, %14 : vector<52x1xf32>
    %16 = math.rsqrt %15 : vector<52x1xf32>
    %17 = vector.broadcast %16 : vector<52x1xf32> to vector<52x32xf32>
    %18 = arith.mulf %8, %17 : vector<52x32xf32>
    %19 = vector.broadcast %1 : vector<1x32xf32> to vector<52x32xf32>
    %20 = arith.mulf %18, %19 : vector<52x32xf32>
    %21 = vector.broadcast %2 : vector<1x32xf32> to vector<52x32xf32>
    %22 = arith.addf %20, %21 : vector<52x32xf32>
    %23 = arith.truncf %22 : vector<52x32xf32> to vector<52x32xbf16>
    %c0_9 = arith.constant 0 : index
    %c0_10 = arith.constant 0 : index
    %24 = vector.load %arg4[%c0_9, %c0_10] : memref<32x32xbf16, #tpu.memory_space<vmem>>, vector<32x32xbf16>
    %cst_11 = arith.constant dense<0.000000e+00> : vector<52x32xf32>
    %25 = tpu.matmul %23, %24, %cst_11 {dimension_numbers = #tpu.dot_dimension_numbers<[1], [0], [0], [1], [0, 0, 1, 1], [], []>} : vector<52x32xbf16>, vector<32x32xbf16>, vector<52x32xf32> -> vector<52x32xf32>
    %c0_12 = arith.constant 0 : index
    %c0_13 = arith.constant 0 : index
    %26 = vector.load %arg5[%c0_12, %c0_13] : memref<1x32xf32, #tpu.memory_space<vmem>>, vector<1x32xf32>
    %27 = vector.broadcast %26 : vector<1x32xf32> to vector<52x32xf32>
    %28 = arith.addf %25, %27 : vector<52x32xf32>
    %29 = arith.truncf %28 : vector<52x32xf32> to vector<52x32xbf16>
    %c0_14 = arith.constant 0 : index
    %c0_15 = arith.constant 0 : index
    %30 = vector.load %arg10[%c0_14, %c0_15] : memref<52x32xbf16, #tpu.memory_space<vmem>>, vector<52x32xbf16>
    tpu.vector_store %arg10[%c0_14, %c0_15], %29 {strides = array<i32>} : memref<52x32xbf16, #tpu.memory_space<vmem>>, vector<52x32xbf16>,
    %c0_16 = arith.constant 0 : index
    %c0_17 = arith.constant 0 : index
    %31 = vector.load %arg6[%c0_16, %c0_17] : memref<32x32xbf16, #tpu.memory_space<vmem>>, vector<32x32xbf16>
    %cst_18 = arith.constant dense<0.000000e+00> : vector<52x32xf32>
    %32 = tpu.matmul %23, %31, %cst_18 {dimension_numbers = #tpu.dot_dimension_numbers<[1], [0], [0], [1], [0, 0, 1, 1], [], []>} : vector<52x32xbf16>, vector<32x32xbf16>, vector<52x32xf32> -> vector<52x32xf32>
    %c0_19 = arith.constant 0 : index
    %c0_20 = arith.constant 0 : index
    %33 = vector.load %arg7[%c0_19, %c0_20] : memref<1x32xf32, #tpu.memory_space<vmem>>, vector<1x32xf32>
    %34 = vector.broadcast %33 : vector<1x32xf32> to vector<52x32xf32>
    %35 = arith.addf %32, %34 : vector<52x32xf32>
    %36 = arith.truncf %35 : vector<52x32xf32> to vector<52x32xbf16>
    %c0_21 = arith.constant 0 : index
    %c0_22 = arith.constant 0 : index
    %37 = vector.load %arg11[%c0_21, %c0_22] : memref<52x32xbf16, #tpu.memory_space<vmem>>, vector<52x32xbf16>
    tpu.vector_store %arg11[%c0_21, %c0_22], %36 {strides = array<i32>} : memref<52x32xbf16, #tpu.memory_space<vmem>>, vector<52x32xbf16>,
    %c0_23 = arith.constant 0 : index
    %c0_24 = arith.constant 0 : index
    %38 = vector.load %arg8[%c0_23, %c0_24] : memref<32x32xbf16, #tpu.memory_space<vmem>>, vector<32x32xbf16>
    %cst_25 = arith.constant dense<0.000000e+00> : vector<52x32xf32>
    %39 = tpu.matmul %23, %38, %cst_25 {dimension_numbers = #tpu.dot_dimension_numbers<[1], [0], [0], [1], [0, 0, 1, 1], [], []>} : vector<52x32xbf16>, vector<32x32xbf16>, vector<52x32xf32> -> vector<52x32xf32>
    %c0_26 = arith.constant 0 : index
    %c0_27 = arith.constant 0 : index
    %40 = vector.load %arg9[%c0_26, %c0_27] : memref<1x32xf32, #tpu.memory_space<vmem>>, vector<1x32xf32>
    %41 = vector.broadcast %40 : vector<1x32xf32> to vector<52x32xf32>
    %42 = arith.addf %39, %41 : vector<52x32xf32>
    %43 = arith.truncf %42 : vector<52x32xf32> to vector<52x32xbf16>
    %c0_28 = arith.constant 0 : index
    %c0_29 = arith.constant 0 : index
    %44 = vector.load %arg12[%c0_28, %c0_29] : memref<52x32xbf16, #tpu.memory_space<vmem>>, vector<52x32xbf16>
    tpu.vector_store %arg12[%c0_28, %c0_29], %43 {strides = array<i32>} : memref<52x32xbf16, #tpu.memory_space<vmem>>, vector<52x32xbf16>,
    return
  }
  func.func @transform_0(%arg0: i32) -> (i32, i32) {
    %c0_i32 = arith.constant 0 : i32
    %c0_i32_0 = arith.constant 0 : i32
    return %arg0, %c0_i32 : i32, i32
  }
  func.func @transform_1(%arg0: i32) -> (i32, i32) {
    %c0_i32 = arith.constant 0 : i32
    %c0_i32_0 = arith.constant 0 : i32
    %c0_i32_1 = arith.constant 0 : i32
    return %c0_i32, %c0_i32_0 : i32, i32
  }
  func.func @transform_2(%arg0: i32) -> (i32, i32) {
    %c0_i32 = arith.constant 0 : i32
    %c0_i32_0 = arith.constant 0 : i32
    %c0_i32_1 = arith.constant 0 : i32
    return %c0_i32, %c0_i32_0 : i32, i32
  }
  func.func @transform_3(%arg0: i32) -> (i32, i32) {
    %c0_i32 = arith.constant 0 : i32
    %c0_i32_0 = arith.constant 0 : i32
    %c0_i32_1 = arith.constant 0 : i32
    return %c0_i32, %c0_i32_0 : i32, i32
  }
  func.func @transform_4(%arg0: i32) -> (i32, i32) {
    %c0_i32 = arith.constant 0 : i32
    %c0_i32_0 = arith.constant 0 : i32
    %c0_i32_1 = arith.constant 0 : i32
    return %c0_i32, %c0_i32_0 : i32, i32
  }
  func.func @transform_5(%arg0: i32) -> (i32, i32) {
    %c0_i32 = arith.constant 0 : i32
    %c0_i32_0 = arith.constant 0 : i32
    %c0_i32_1 = arith.constant 0 : i32
    return %c0_i32, %c0_i32_0 : i32, i32
  }
  func.func @transform_6(%arg0: i32) -> (i32, i32) {
    %c0_i32 = arith.constant 0 : i32
    %c0_i32_0 = arith.constant 0 : i32
    %c0_i32_1 = arith.constant 0 : i32
    return %c0_i32, %c0_i32_0 : i32, i32
  }
  func.func @transform_7(%arg0: i32) -> (i32, i32) {
    %c0_i32 = arith.constant 0 : i32
    %c0_i32_0 = arith.constant 0 : i32
    %c0_i32_1 = arith.constant 0 : i32
    return %c0_i32, %c0_i32_0 : i32, i32
  }
  func.func @transform_8(%arg0: i32) -> (i32, i32) {
    %c0_i32 = arith.constant 0 : i32
    %c0_i32_0 = arith.constant 0 : i32
    %c0_i32_1 = arith.constant 0 : i32
    return %c0_i32, %c0_i32_0 : i32, i32
  }
  func.func @transform_9(%arg0: i32) -> (i32, i32) {
    %c0_i32 = arith.constant 0 : i32
    %c0_i32_0 = arith.constant 0 : i32
    return %arg0, %c0_i32 : i32, i32
  }
  func.func @transform_10(%arg0: i32) -> (i32, i32) {
    %c0_i32 = arith.constant 0 : i32
    %c0_i32_0 = arith.constant 0 : i32
    return %arg0, %c0_i32 : i32, i32
  }
  func.func @transform_11(%arg0: i32) -> (i32, i32) {
    %c0_i32 = arith.constant 0 : i32
    %c0_i32_0 = arith.constant 0 : i32
    return %arg0, %c0_i32 : i32, i32
  }
}

module attributes {stable_mosaic.version = 11 : i64} {
  func.func @_attn_kernel(%arg0: i32, %arg1: memref<1x26x32xbf16, #tpu.memory_space<vmem>>, %arg2: memref<1x26x32xbf16, #tpu.memory_space<vmem>>, %arg3: memref<1x26x32xbf16, #tpu.memory_space<vmem>>, %arg4: memref<1x26x32xbf16, #tpu.memory_space<vmem>>) attributes {dimension_semantics = [#tpu.dimension_semantics<parallel>], iteration_bounds = array<i64: 2>, scalar_prefetch = 0 : i64, scratch_operands = 0 : i64, tpu.core_type = #tpu.core_type<tc>, window_params = [{transform_indices = @transform_0, window_bounds = array<i64: 1, 26, 32>}, {transform_indices = @transform_1, window_bounds = array<i64: 1, 26, 32>}, {transform_indices = @transform_2, window_bounds = array<i64: 1, 26, 32>}, {transform_indices = @transform_3, window_bounds = array<i64: 1, 26, 32>}]} {
    %c0 = arith.constant 0 : index
    %c0_0 = arith.constant 0 : index
    %c0_1 = arith.constant 0 : index
    %0 = vector.load %arg1[%c0, %c0_0, %c0_1] : memref<1x26x32xbf16, #tpu.memory_space<vmem>>, vector<1x26x32xbf16>
    %1 = vector.shape_cast %0 : vector<1x26x32xbf16> to vector<26x32xbf16>
    %c0_2 = arith.constant 0 : index
    %c0_3 = arith.constant 0 : index
    %c0_4 = arith.constant 0 : index
    %2 = vector.load %arg2[%c0_2, %c0_3, %c0_4] : memref<1x26x32xbf16, #tpu.memory_space<vmem>>, vector<1x26x32xbf16>
    %3 = vector.shape_cast %2 : vector<1x26x32xbf16> to vector<26x32xbf16>
    %c0_5 = arith.constant 0 : index
    %c0_6 = arith.constant 0 : index
    %c0_7 = arith.constant 0 : index
    %4 = vector.load %arg3[%c0_5, %c0_6, %c0_7] : memref<1x26x32xbf16, #tpu.memory_space<vmem>>, vector<1x26x32xbf16>
    %5 = vector.shape_cast %4 : vector<1x26x32xbf16> to vector<26x32xbf16>
    %6 = vector.extract_strided_slice %1 {offsets = [0, 0], sizes = [26, 8], strides = [1, 1]} : vector<26x32xbf16> to vector<26x8xbf16>
    %7 = vector.extract_strided_slice %3 {offsets = [0, 0], sizes = [26, 8], strides = [1, 1]} : vector<26x32xbf16> to vector<26x8xbf16>
    %8 = vector.extract_strided_slice %5 {offsets = [0, 0], sizes = [26, 8], strides = [1, 1]} : vector<26x32xbf16> to vector<26x8xbf16>
    %cst = arith.constant dense<0.000000e+00> : vector<26x26xf32>
    %9 = tpu.matmul %6, %7, %cst {dimension_numbers = #tpu.dot_dimension_numbers<[1], [1], [0], [0], [0, 0, 1, 0], [], []>} : vector<26x8xbf16>, vector<26x8xbf16>, vector<26x26xf32> -> vector<26x26xf32>
    %cst_8 = arith.constant 0.353553385 : f32
    %10 = vector.broadcast %cst_8 : f32 to vector<26x26xf32>
    %11 = arith.mulf %9, %10 : vector<26x26xf32>
    %cst_9 = arith.constant dense<0xFF800000> : vector<26xf32>
    %12 = vector.multi_reduction <maximumf>, %11, %cst_9 [1] : vector<26x26xf32> to vector<26xf32>
    %13 = vector.shape_cast %12 : vector<26xf32> to vector<26x1xf32>
    %14 = vector.broadcast %13 : vector<26x1xf32> to vector<26x26xf32>
    %15 = arith.subf %11, %14 : vector<26x26xf32>
    %16 = math.exp %15 : vector<26x26xf32>
    %cst_10 = arith.constant dense<0.000000e+00> : vector<26xf32>
    %17 = vector.multi_reduction <add>, %16, %cst_10 [1] : vector<26x26xf32> to vector<26xf32>
    %18 = vector.shape_cast %17 : vector<26xf32> to vector<26x1xf32>
    %19 = arith.truncf %16 : vector<26x26xf32> to vector<26x26xbf16>
    %cst_11 = arith.constant dense<0.000000e+00> : vector<26x8xf32>
    %20 = tpu.matmul %19, %8, %cst_11 {dimension_numbers = #tpu.dot_dimension_numbers<[1], [0], [0], [1], [0, 0, 1, 1], [], []>} : vector<26x26xbf16>, vector<26x8xbf16>, vector<26x8xf32> -> vector<26x8xf32>
    %21 = tpu.reciprocal %18 {approx = true} : vector<26x1xf32> -> vector<26x1xf32>
    %22 = vector.broadcast %21 : vector<26x1xf32> to vector<26x8xf32>
    %23 = arith.mulf %20, %22 : vector<26x8xf32>
    %24 = vector.extract_strided_slice %1 {offsets = [0, 8], sizes = [26, 8], strides = [1, 1]} : vector<26x32xbf16> to vector<26x8xbf16>
    %25 = vector.extract_strided_slice %3 {offsets = [0, 8], sizes = [26, 8], strides = [1, 1]} : vector<26x32xbf16> to vector<26x8xbf16>
    %26 = vector.extract_strided_slice %5 {offsets = [0, 8], sizes = [26, 8], strides = [1, 1]} : vector<26x32xbf16> to vector<26x8xbf16>
    %cst_12 = arith.constant dense<0.000000e+00> : vector<26x26xf32>
    %27 = tpu.matmul %24, %25, %cst_12 {dimension_numbers = #tpu.dot_dimension_numbers<[1], [1], [0], [0], [0, 0, 1, 0], [], []>} : vector<26x8xbf16>, vector<26x8xbf16>, vector<26x26xf32> -> vector<26x26xf32>
    %cst_13 = arith.constant 0.353553385 : f32
    %28 = vector.broadcast %cst_13 : f32 to vector<26x26xf32>
    %29 = arith.mulf %27, %28 : vector<26x26xf32>
    %cst_14 = arith.constant dense<0xFF800000> : vector<26xf32>
    %30 = vector.multi_reduction <maximumf>, %29, %cst_14 [1] : vector<26x26xf32> to vector<26xf32>
    %31 = vector.shape_cast %30 : vector<26xf32> to vector<26x1xf32>
    %32 = vector.broadcast %31 : vector<26x1xf32> to vector<26x26xf32>
    %33 = arith.subf %29, %32 : vector<26x26xf32>
    %34 = math.exp %33 : vector<26x26xf32>
    %cst_15 = arith.constant dense<0.000000e+00> : vector<26xf32>
    %35 = vector.multi_reduction <add>, %34, %cst_15 [1] : vector<26x26xf32> to vector<26xf32>
    %36 = vector.shape_cast %35 : vector<26xf32> to vector<26x1xf32>
    %37 = arith.truncf %34 : vector<26x26xf32> to vector<26x26xbf16>
    %cst_16 = arith.constant dense<0.000000e+00> : vector<26x8xf32>
    %38 = tpu.matmul %37, %26, %cst_16 {dimension_numbers = #tpu.dot_dimension_numbers<[1], [0], [0], [1], [0, 0, 1, 1], [], []>} : vector<26x26xbf16>, vector<26x8xbf16>, vector<26x8xf32> -> vector<26x8xf32>
    %39 = tpu.reciprocal %36 {approx = true} : vector<26x1xf32> -> vector<26x1xf32>
    %40 = vector.broadcast %39 : vector<26x1xf32> to vector<26x8xf32>
    %41 = arith.mulf %38, %40 : vector<26x8xf32>
    %42 = vector.extract_strided_slice %1 {offsets = [0, 16], sizes = [26, 8], strides = [1, 1]} : vector<26x32xbf16> to vector<26x8xbf16>
    %43 = vector.extract_strided_slice %3 {offsets = [0, 16], sizes = [26, 8], strides = [1, 1]} : vector<26x32xbf16> to vector<26x8xbf16>
    %44 = vector.extract_strided_slice %5 {offsets = [0, 16], sizes = [26, 8], strides = [1, 1]} : vector<26x32xbf16> to vector<26x8xbf16>
    %cst_17 = arith.constant dense<0.000000e+00> : vector<26x26xf32>
    %45 = tpu.matmul %42, %43, %cst_17 {dimension_numbers = #tpu.dot_dimension_numbers<[1], [1], [0], [0], [0, 0, 1, 0], [], []>} : vector<26x8xbf16>, vector<26x8xbf16>, vector<26x26xf32> -> vector<26x26xf32>
    %cst_18 = arith.constant 0.353553385 : f32
    %46 = vector.broadcast %cst_18 : f32 to vector<26x26xf32>
    %47 = arith.mulf %45, %46 : vector<26x26xf32>
    %cst_19 = arith.constant dense<0xFF800000> : vector<26xf32>
    %48 = vector.multi_reduction <maximumf>, %47, %cst_19 [1] : vector<26x26xf32> to vector<26xf32>
    %49 = vector.shape_cast %48 : vector<26xf32> to vector<26x1xf32>
    %50 = vector.broadcast %49 : vector<26x1xf32> to vector<26x26xf32>
    %51 = arith.subf %47, %50 : vector<26x26xf32>
    %52 = math.exp %51 : vector<26x26xf32>
    %cst_20 = arith.constant dense<0.000000e+00> : vector<26xf32>
    %53 = vector.multi_reduction <add>, %52, %cst_20 [1] : vector<26x26xf32> to vector<26xf32>
    %54 = vector.shape_cast %53 : vector<26xf32> to vector<26x1xf32>
    %55 = arith.truncf %52 : vector<26x26xf32> to vector<26x26xbf16>
    %cst_21 = arith.constant dense<0.000000e+00> : vector<26x8xf32>
    %56 = tpu.matmul %55, %44, %cst_21 {dimension_numbers = #tpu.dot_dimension_numbers<[1], [0], [0], [1], [0, 0, 1, 1], [], []>} : vector<26x26xbf16>, vector<26x8xbf16>, vector<26x8xf32> -> vector<26x8xf32>
    %57 = tpu.reciprocal %54 {approx = true} : vector<26x1xf32> -> vector<26x1xf32>
    %58 = vector.broadcast %57 : vector<26x1xf32> to vector<26x8xf32>
    %59 = arith.mulf %56, %58 : vector<26x8xf32>
    %60 = vector.extract_strided_slice %1 {offsets = [0, 24], sizes = [26, 8], strides = [1, 1]} : vector<26x32xbf16> to vector<26x8xbf16>
    %61 = vector.extract_strided_slice %3 {offsets = [0, 24], sizes = [26, 8], strides = [1, 1]} : vector<26x32xbf16> to vector<26x8xbf16>
    %62 = vector.extract_strided_slice %5 {offsets = [0, 24], sizes = [26, 8], strides = [1, 1]} : vector<26x32xbf16> to vector<26x8xbf16>
    %cst_22 = arith.constant dense<0.000000e+00> : vector<26x26xf32>
    %63 = tpu.matmul %60, %61, %cst_22 {dimension_numbers = #tpu.dot_dimension_numbers<[1], [1], [0], [0], [0, 0, 1, 0], [], []>} : vector<26x8xbf16>, vector<26x8xbf16>, vector<26x26xf32> -> vector<26x26xf32>
    %cst_23 = arith.constant 0.353553385 : f32
    %64 = vector.broadcast %cst_23 : f32 to vector<26x26xf32>
    %65 = arith.mulf %63, %64 : vector<26x26xf32>
    %cst_24 = arith.constant dense<0xFF800000> : vector<26xf32>
    %66 = vector.multi_reduction <maximumf>, %65, %cst_24 [1] : vector<26x26xf32> to vector<26xf32>
    %67 = vector.shape_cast %66 : vector<26xf32> to vector<26x1xf32>
    %68 = vector.broadcast %67 : vector<26x1xf32> to vector<26x26xf32>
    %69 = arith.subf %65, %68 : vector<26x26xf32>
    %70 = math.exp %69 : vector<26x26xf32>
    %cst_25 = arith.constant dense<0.000000e+00> : vector<26xf32>
    %71 = vector.multi_reduction <add>, %70, %cst_25 [1] : vector<26x26xf32> to vector<26xf32>
    %72 = vector.shape_cast %71 : vector<26xf32> to vector<26x1xf32>
    %73 = arith.truncf %70 : vector<26x26xf32> to vector<26x26xbf16>
    %cst_26 = arith.constant dense<0.000000e+00> : vector<26x8xf32>
    %74 = tpu.matmul %73, %62, %cst_26 {dimension_numbers = #tpu.dot_dimension_numbers<[1], [0], [0], [1], [0, 0, 1, 1], [], []>} : vector<26x26xbf16>, vector<26x8xbf16>, vector<26x8xf32> -> vector<26x8xf32>
    %75 = tpu.reciprocal %72 {approx = true} : vector<26x1xf32> -> vector<26x1xf32>
    %76 = vector.broadcast %75 : vector<26x1xf32> to vector<26x8xf32>
    %77 = arith.mulf %74, %76 : vector<26x8xf32>
    %78 = tpu.concatenate %23, %41, %59, %77 in 1 : vector<26x8xf32>, vector<26x8xf32>, vector<26x8xf32>, vector<26x8xf32> -> vector<26x32xf32>
    %79 = arith.truncf %78 : vector<26x32xf32> to vector<26x32xbf16>
    %c0_27 = arith.constant 0 : index
    %c0_28 = arith.constant 0 : index
    %c0_29 = arith.constant 0 : index
    %80 = vector.load %arg4[%c0_27, %c0_28, %c0_29] : memref<1x26x32xbf16, #tpu.memory_space<vmem>>, vector<1x26x32xbf16>
    %81 = vector.shape_cast %80 : vector<1x26x32xbf16> to vector<26x32xbf16>
    %82 = vector.shape_cast %79 : vector<26x32xbf16> to vector<1x26x32xbf16>
    tpu.vector_store %arg4[%c0_27, %c0_28, %c0_29], %82 {strides = array<i32>} : memref<1x26x32xbf16, #tpu.memory_space<vmem>>, vector<1x26x32xbf16>,
    return
  }
  func.func @transform_0(%arg0: i32) -> (i32, i32, i32) {
    %c0_i32 = arith.constant 0 : i32
    %c0_i32_0 = arith.constant 0 : i32
    %c0_i32_1 = arith.constant 0 : i32
    return %arg0, %c0_i32, %c0_i32_0 : i32, i32, i32
  }
  func.func @transform_1(%arg0: i32) -> (i32, i32, i32) {
    %c0_i32 = arith.constant 0 : i32
    %c0_i32_0 = arith.constant 0 : i32
    %c0_i32_1 = arith.constant 0 : i32
    return %arg0, %c0_i32, %c0_i32_0 : i32, i32, i32
  }
  func.func @transform_2(%arg0: i32) -> (i32, i32, i32) {
    %c0_i32 = arith.constant 0 : i32
    %c0_i32_0 = arith.constant 0 : i32
    %c0_i32_1 = arith.constant 0 : i32
    return %arg0, %c0_i32, %c0_i32_0 : i32, i32, i32
  }
  func.func @transform_3(%arg0: i32) -> (i32, i32, i32) {
    %c0_i32 = arith.constant 0 : i32
    %c0_i32_0 = arith.constant 0 : i32
    %c0_i32_1 = arith.constant 0 : i32
    return %arg0, %c0_i32, %c0_i32_0 : i32, i32, i32
  }
}

module attributes {stable_mosaic.version = 11 : i64} {
  func.func @_ln_linear_kernel(%arg0: i32, %arg1: memref<52x32xf32, #tpu.memory_space<vmem>>, %arg2: memref<1x32xf32, #tpu.memory_space<vmem>>, %arg3: memref<1x32xf32, #tpu.memory_space<vmem>>, %arg4: memref<32x32xbf16, #tpu.memory_space<vmem>>, %arg5: memref<1x32xf32, #tpu.memory_space<vmem>>, %arg6: memref<52x32xbf16, #tpu.memory_space<vmem>>) attributes {dimension_semantics = [#tpu.dimension_semantics<parallel>], iteration_bounds = array<i64: 1>, scalar_prefetch = 0 : i64, scratch_operands = 0 : i64, tpu.core_type = #tpu.core_type<tc>, window_params = [{transform_indices = @transform_0, window_bounds = array<i64: 52, 32>}, {pipeline_mode = #tpu.pipeline_mode<synchronous>, transform_indices = @transform_1, window_bounds = array<i64: 1, 32>}, {pipeline_mode = #tpu.pipeline_mode<synchronous>, transform_indices = @transform_2, window_bounds = array<i64: 1, 32>}, {pipeline_mode = #tpu.pipeline_mode<synchronous>, transform_indices = @transform_3, window_bounds = array<i64: 32, 32>}, {pipeline_mode = #tpu.pipeline_mode<synchronous>, transform_indices = @transform_4, window_bounds = array<i64: 1, 32>}, {transform_indices = @transform_5, window_bounds = array<i64: 52, 32>}]} {
    %c0 = arith.constant 0 : index
    %c0_0 = arith.constant 0 : index
    %0 = vector.load %arg1[%c0, %c0_0] : memref<52x32xf32, #tpu.memory_space<vmem>>, vector<52x32xf32>
    %c0_1 = arith.constant 0 : index
    %c0_2 = arith.constant 0 : index
    %1 = vector.load %arg2[%c0_1, %c0_2] : memref<1x32xf32, #tpu.memory_space<vmem>>, vector<1x32xf32>
    %c0_3 = arith.constant 0 : index
    %c0_4 = arith.constant 0 : index
    %2 = vector.load %arg3[%c0_3, %c0_4] : memref<1x32xf32, #tpu.memory_space<vmem>>, vector<1x32xf32>
    %cst = arith.constant dense<0.000000e+00> : vector<52xf32>
    %3 = vector.multi_reduction <add>, %0, %cst [1] : vector<52x32xf32> to vector<52xf32>
    %4 = vector.shape_cast %3 : vector<52xf32> to vector<52x1xf32>
    %cst_5 = arith.constant 3.200000e+01 : f32
    %5 = vector.broadcast %cst_5 : f32 to vector<52x1xf32>
    %6 = arith.divf %4, %5 : vector<52x1xf32>
    %7 = vector.broadcast %6 : vector<52x1xf32> to vector<52x32xf32>
    %8 = arith.subf %0, %7 : vector<52x32xf32>
    %9 = arith.mulf %8, %8 : vector<52x32xf32>
    %cst_6 = arith.constant dense<0.000000e+00> : vector<52xf32>
    %10 = vector.multi_reduction <add>, %9, %cst_6 [1] : vector<52x32xf32> to vector<52xf32>
    %11 = vector.shape_cast %10 : vector<52xf32> to vector<52x1xf32>
    %cst_7 = arith.constant 3.200000e+01 : f32
    %12 = vector.broadcast %cst_7 : f32 to vector<52x1xf32>
    %13 = arith.divf %11, %12 : vector<52x1xf32>
    %cst_8 = arith.constant 9.99999974E-6 : f32
    %14 = vector.broadcast %cst_8 : f32 to vector<52x1xf32>
    %15 = arith.addf %13, %14 : vector<52x1xf32>
    %16 = math.rsqrt %15 : vector<52x1xf32>
    %17 = vector.broadcast %16 : vector<52x1xf32> to vector<52x32xf32>
    %18 = arith.mulf %8, %17 : vector<52x32xf32>
    %19 = vector.broadcast %1 : vector<1x32xf32> to vector<52x32xf32>
    %20 = arith.mulf %18, %19 : vector<52x32xf32>
    %21 = vector.broadcast %2 : vector<1x32xf32> to vector<52x32xf32>
    %22 = arith.addf %20, %21 : vector<52x32xf32>
    %23 = arith.truncf %22 : vector<52x32xf32> to vector<52x32xbf16>
    %c0_9 = arith.constant 0 : index
    %c0_10 = arith.constant 0 : index
    %24 = vector.load %arg4[%c0_9, %c0_10] : memref<32x32xbf16, #tpu.memory_space<vmem>>, vector<32x32xbf16>
    %cst_11 = arith.constant dense<0.000000e+00> : vector<52x32xf32>
    %25 = tpu.matmul %23, %24, %cst_11 {dimension_numbers = #tpu.dot_dimension_numbers<[1], [0], [0], [1], [0, 0, 1, 1], [], []>} : vector<52x32xbf16>, vector<32x32xbf16>, vector<52x32xf32> -> vector<52x32xf32>
    %c0_12 = arith.constant 0 : index
    %c0_13 = arith.constant 0 : index
    %26 = vector.load %arg5[%c0_12, %c0_13] : memref<1x32xf32, #tpu.memory_space<vmem>>, vector<1x32xf32>
    %27 = vector.broadcast %26 : vector<1x32xf32> to vector<52x32xf32>
    %28 = arith.addf %25, %27 : vector<52x32xf32>
    %cst_14 = arith.constant 5.000000e-01 : f32
    %29 = vector.broadcast %cst_14 : f32 to vector<52x32xf32>
    %30 = arith.mulf %29, %28 : vector<52x32xf32>
    %cst_15 = arith.constant 0.707106769 : f32
    %31 = vector.broadcast %cst_15 : f32 to vector<52x32xf32>
    %32 = arith.mulf %28, %31 : vector<52x32xf32>
    %33 = math.absf %32 : vector<52x32xf32>
    %cst_16 = arith.constant 0.327591091 : f32
    %34 = vector.broadcast %cst_16 : f32 to vector<52x32xf32>
    %35 = arith.mulf %34, %33 : vector<52x32xf32>
    %cst_17 = arith.constant 1.000000e+00 : f32
    %36 = vector.broadcast %cst_17 : f32 to vector<52x32xf32>
    %37 = arith.addf %36, %35 : vector<52x32xf32>
    %cst_18 = arith.constant 1.000000e+00 : f32
    %38 = vector.broadcast %cst_18 : f32 to vector<52x32xf32>
    %39 = arith.divf %38, %37 : vector<52x32xf32>
    %cst_19 = arith.constant 1.06140542 : f32
    %40 = vector.broadcast %cst_19 : f32 to vector<52x32xf32>
    %41 = arith.mulf %40, %39 : vector<52x32xf32>
    %cst_20 = arith.constant -1.45315206 : f32
    %42 = vector.broadcast %cst_20 : f32 to vector<52x32xf32>
    %43 = arith.addf %41, %42 : vector<52x32xf32>
    %44 = arith.mulf %43, %39 : vector<52x32xf32>
    %cst_21 = arith.constant 1.42141378 : f32
    %45 = vector.broadcast %cst_21 : f32 to vector<52x32xf32>
    %46 = arith.addf %44, %45 : vector<52x32xf32>
    %47 = arith.mulf %46, %39 : vector<52x32xf32>
    %cst_22 = arith.constant -0.284496725 : f32
    %48 = vector.broadcast %cst_22 : f32 to vector<52x32xf32>
    %49 = arith.addf %47, %48 : vector<52x32xf32>
    %50 = arith.mulf %49, %39 : vector<52x32xf32>
    %cst_23 = arith.constant 0.254829586 : f32
    %51 = vector.broadcast %cst_23 : f32 to vector<52x32xf32>
    %52 = arith.addf %50, %51 : vector<52x32xf32>
    %53 = arith.mulf %52, %39 : vector<52x32xf32>
    %54 = arith.mulf %33, %33 : vector<52x32xf32>
    %cst_24 = arith.constant 0.000000e+00 : f32
    %55 = vector.broadcast %cst_24 : f32 to vector<52x32xf32>
    %56 = arith.subf %55, %54 : vector<52x32xf32>
    %57 = math.exp %56 : vector<52x32xf32>
    %58 = arith.mulf %53, %57 : vector<52x32xf32>
    %cst_25 = arith.constant 1.000000e+00 : f32
    %59 = vector.broadcast %cst_25 : f32 to vector<52x32xf32>
    %60 = arith.subf %59, %58 : vector<52x32xf32>
    %cst_26 = arith.constant 0.000000e+00 : f32
    %61 = vector.broadcast %cst_26 : f32 to vector<52x32xf32>
    %62 = arith.cmpf olt, %32, %61 : vector<52x32xf32>
    %cst_27 = arith.constant 0.000000e+00 : f32
    %63 = vector.broadcast %cst_27 : f32 to vector<52x32xf32>
    %64 = arith.subf %63, %60 : vector<52x32xf32>
    %65 = arith.select %62, %64, %60 : vector<52x32xi1>, vector<52x32xf32>
    %cst_28 = arith.constant 1.000000e+00 : f32
    %66 = vector.broadcast %cst_28 : f32 to vector<52x32xf32>
    %67 = arith.addf %66, %65 : vector<52x32xf32>
    %68 = arith.mulf %30, %67 : vector<52x32xf32>
    %69 = arith.truncf %68 : vector<52x32xf32> to vector<52x32xbf16>
    %c0_29 = arith.constant 0 : index
    %c0_30 = arith.constant 0 : index
    %70 = vector.load %arg6[%c0_29, %c0_30] : memref<52x32xbf16, #tpu.memory_space<vmem>>, vector<52x32xbf16>
    tpu.vector_store %arg6[%c0_29, %c0_30], %69 {strides = array<i32>} : memref<52x32xbf16, #tpu.memory_space<vmem>>, vector<52x32xbf16>,
    return
  }
  func.func @transform_0(%arg0: i32) -> (i32, i32) {
    %c0_i32 = arith.constant 0 : i32
    %c0_i32_0 = arith.constant 0 : i32
    return %arg0, %c0_i32 : i32, i32
  }
  func.func @transform_1(%arg0: i32) -> (i32, i32) {
    %c0_i32 = arith.constant 0 : i32
    %c0_i32_0 = arith.constant 0 : i32
    %c0_i32_1 = arith.constant 0 : i32
    return %c0_i32, %c0_i32_0 : i32, i32
  }
  func.func @transform_2(%arg0: i32) -> (i32, i32) {
    %c0_i32 = arith.constant 0 : i32
    %c0_i32_0 = arith.constant 0 : i32
    %c0_i32_1 = arith.constant 0 : i32
    return %c0_i32, %c0_i32_0 : i32, i32
  }
  func.func @transform_3(%arg0: i32) -> (i32, i32) {
    %c0_i32 = arith.constant 0 : i32
    %c0_i32_0 = arith.constant 0 : i32
    %c0_i32_1 = arith.constant 0 : i32
    return %c0_i32, %c0_i32_0 : i32, i32
  }
  func.func @transform_4(%arg0: i32) -> (i32, i32) {
    %c0_i32 = arith.constant 0 : i32
    %c0_i32_0 = arith.constant 0 : i32
    %c0_i32_1 = arith.constant 0 : i32
    return %c0_i32, %c0_i32_0 : i32, i32
  }
  func.func @transform_5(%arg0: i32) -> (i32, i32) {
    %c0_i32 = arith.constant 0 : i32
    %c0_i32_0 = arith.constant 0 : i32
    return %arg0, %c0_i32 : i32, i32
  }
}

module attributes {stable_mosaic.version = 11 : i64} {
  func.func @_linear_residual_kernel(%arg0: i32, %arg1: memref<52x32xbf16, #tpu.memory_space<vmem>>, %arg2: memref<32x32xbf16, #tpu.memory_space<vmem>>, %arg3: memref<1x32xf32, #tpu.memory_space<vmem>>, %arg4: memref<52x32xf32, #tpu.memory_space<vmem>>, %arg5: memref<52x32xf32, #tpu.memory_space<vmem>>) attributes {dimension_semantics = [#tpu.dimension_semantics<parallel>], iteration_bounds = array<i64: 1>, scalar_prefetch = 0 : i64, scratch_operands = 0 : i64, tpu.core_type = #tpu.core_type<tc>, window_params = [{transform_indices = @transform_0, window_bounds = array<i64: 52, 32>}, {pipeline_mode = #tpu.pipeline_mode<synchronous>, transform_indices = @transform_1, window_bounds = array<i64: 32, 32>}, {pipeline_mode = #tpu.pipeline_mode<synchronous>, transform_indices = @transform_2, window_bounds = array<i64: 1, 32>}, {transform_indices = @transform_3, window_bounds = array<i64: 52, 32>}, {transform_indices = @transform_4, window_bounds = array<i64: 52, 32>}]} {
    %c0 = arith.constant 0 : index
    %c0_0 = arith.constant 0 : index
    %0 = vector.load %arg1[%c0, %c0_0] : memref<52x32xbf16, #tpu.memory_space<vmem>>, vector<52x32xbf16>
    %c0_1 = arith.constant 0 : index
    %c0_2 = arith.constant 0 : index
    %1 = vector.load %arg2[%c0_1, %c0_2] : memref<32x32xbf16, #tpu.memory_space<vmem>>, vector<32x32xbf16>
    %cst = arith.constant dense<0.000000e+00> : vector<52x32xf32>
    %2 = tpu.matmul %0, %1, %cst {dimension_numbers = #tpu.dot_dimension_numbers<[1], [0], [0], [1], [0, 0, 1, 1], [], []>} : vector<52x32xbf16>, vector<32x32xbf16>, vector<52x32xf32> -> vector<52x32xf32>
    %c0_3 = arith.constant 0 : index
    %c0_4 = arith.constant 0 : index
    %3 = vector.load %arg4[%c0_3, %c0_4] : memref<52x32xf32, #tpu.memory_space<vmem>>, vector<52x32xf32>
    %4 = arith.addf %3, %2 : vector<52x32xf32>
    %c0_5 = arith.constant 0 : index
    %c0_6 = arith.constant 0 : index
    %5 = vector.load %arg3[%c0_5, %c0_6] : memref<1x32xf32, #tpu.memory_space<vmem>>, vector<1x32xf32>
    %6 = vector.broadcast %5 : vector<1x32xf32> to vector<52x32xf32>
    %7 = arith.addf %4, %6 : vector<52x32xf32>
    %c0_7 = arith.constant 0 : index
    %c0_8 = arith.constant 0 : index
    %8 = vector.load %arg5[%c0_7, %c0_8] : memref<52x32xf32, #tpu.memory_space<vmem>>, vector<52x32xf32>
    tpu.vector_store %arg5[%c0_7, %c0_8], %7 {strides = array<i32>} : memref<52x32xf32, #tpu.memory_space<vmem>>, vector<52x32xf32>,
    return
  }
  func.func @transform_0(%arg0: i32) -> (i32, i32) {
    %c0_i32 = arith.constant 0 : i32
    %c0_i32_0 = arith.constant 0 : i32
    return %arg0, %c0_i32 : i32, i32
  }
  func.func @transform_1(%arg0: i32) -> (i32, i32) {
    %c0_i32 = arith.constant 0 : i32
    %c0_i32_0 = arith.constant 0 : i32
    %c0_i32_1 = arith.constant 0 : i32
    return %c0_i32, %c0_i32_0 : i32, i32
  }
  func.func @transform_2(%arg0: i32) -> (i32, i32) {
    %c0_i32 = arith.constant 0 : i32
    %c0_i32_0 = arith.constant 0 : i32
    %c0_i32_1 = arith.constant 0 : i32
    return %c0_i32, %c0_i32_0 : i32, i32
  }
  func.func @transform_3(%arg0: i32) -> (i32, i32) {
    %c0_i32 = arith.constant 0 : i32
    %c0_i32_0 = arith.constant 0 : i32
    return %arg0, %c0_i32 : i32, i32
  }
  func.func @transform_4(%arg0: i32) -> (i32, i32) {
    %c0_i32 = arith.constant 0 : i32
    %c0_i32_0 = arith.constant 0 : i32
    return %arg0, %c0_i32 : i32, i32
  }
}

module attributes {stable_mosaic.version = 11 : i64} {
  func.func @_linear_kernel(%arg0: i32, %arg1: memref<2x32xbf16, #tpu.memory_space<vmem>>, %arg2: memref<32x16xbf16, #tpu.memory_space<vmem>>, %arg3: memref<1x16xf32, #tpu.memory_space<vmem>>, %arg4: memref<2x16xf32, #tpu.memory_space<vmem>>) attributes {dimension_semantics = [#tpu.dimension_semantics<parallel>], iteration_bounds = array<i64: 1>, scalar_prefetch = 0 : i64, scratch_operands = 0 : i64, tpu.core_type = #tpu.core_type<tc>, window_params = [{transform_indices = @transform_0, window_bounds = array<i64: 2, 32>}, {pipeline_mode = #tpu.pipeline_mode<synchronous>, transform_indices = @transform_1, window_bounds = array<i64: 32, 16>}, {pipeline_mode = #tpu.pipeline_mode<synchronous>, transform_indices = @transform_2, window_bounds = array<i64: 1, 16>}, {transform_indices = @transform_3, window_bounds = array<i64: 2, 16>}]} {
    %c0 = arith.constant 0 : index
    %c0_0 = arith.constant 0 : index
    %0 = vector.load %arg1[%c0, %c0_0] : memref<2x32xbf16, #tpu.memory_space<vmem>>, vector<2x32xbf16>
    %c0_1 = arith.constant 0 : index
    %c0_2 = arith.constant 0 : index
    %1 = vector.load %arg2[%c0_1, %c0_2] : memref<32x16xbf16, #tpu.memory_space<vmem>>, vector<32x16xbf16>
    %cst = arith.constant dense<0.000000e+00> : vector<2x16xf32>
    %2 = tpu.matmul %0, %1, %cst {dimension_numbers = #tpu.dot_dimension_numbers<[1], [0], [0], [1], [0, 0, 1, 1], [], []>} : vector<2x32xbf16>, vector<32x16xbf16>, vector<2x16xf32> -> vector<2x16xf32>
    %c0_3 = arith.constant 0 : index
    %c0_4 = arith.constant 0 : index
    %3 = vector.load %arg3[%c0_3, %c0_4] : memref<1x16xf32, #tpu.memory_space<vmem>>, vector<1x16xf32>
    %4 = vector.broadcast %3 : vector<1x16xf32> to vector<2x16xf32>
    %5 = arith.addf %2, %4 : vector<2x16xf32>
    %c0_5 = arith.constant 0 : index
    %c0_6 = arith.constant 0 : index
    %6 = vector.load %arg4[%c0_5, %c0_6] : memref<2x16xf32, #tpu.memory_space<vmem>>, vector<2x16xf32>
    tpu.vector_store %arg4[%c0_5, %c0_6], %5 {strides = array<i32>} : memref<2x16xf32, #tpu.memory_space<vmem>>, vector<2x16xf32>,
    return
  }
  func.func @transform_0(%arg0: i32) -> (i32, i32) {
    %c0_i32 = arith.constant 0 : i32
    %c0_i32_0 = arith.constant 0 : i32
    return %arg0, %c0_i32 : i32, i32
  }
  func.func @transform_1(%arg0: i32) -> (i32, i32) {
    %c0_i32 = arith.constant 0 : i32
    %c0_i32_0 = arith.constant 0 : i32
    %c0_i32_1 = arith.constant 0 : i32
    return %c0_i32, %c0_i32_0 : i32, i32
  }
  func.func @transform_2(%arg0: i32) -> (i32, i32) {
    %c0_i32 = arith.constant 0 : i32
    %c0_i32_0 = arith.constant 0 : i32
    %c0_i32_1 = arith.constant 0 : i32
    return %c0_i32, %c0_i32_0 : i32, i32
  }
  func.func @transform_3(%arg0: i32) -> (i32, i32) {
    %c0_i32 = arith.constant 0 : i32
    %c0_i32_0 = arith.constant 0 : i32
    return %arg0, %c0_i32 : i32, i32
  }
}

module attributes {stable_mosaic.version = 11 : i64} {
  func.func @_ln_linear_kernel(%arg0: i32, %arg1: memref<2x32xf32, #tpu.memory_space<vmem>>, %arg2: memref<1x32xf32, #tpu.memory_space<vmem>>, %arg3: memref<1x32xf32, #tpu.memory_space<vmem>>, %arg4: memref<32x32xbf16, #tpu.memory_space<vmem>>, %arg5: memref<1x32xf32, #tpu.memory_space<vmem>>, %arg6: memref<2x32xbf16, #tpu.memory_space<vmem>>) attributes {dimension_semantics = [#tpu.dimension_semantics<parallel>], iteration_bounds = array<i64: 1>, scalar_prefetch = 0 : i64, scratch_operands = 0 : i64, tpu.core_type = #tpu.core_type<tc>, window_params = [{transform_indices = @transform_0, window_bounds = array<i64: 2, 32>}, {pipeline_mode = #tpu.pipeline_mode<synchronous>, transform_indices = @transform_1, window_bounds = array<i64: 1, 32>}, {pipeline_mode = #tpu.pipeline_mode<synchronous>, transform_indices = @transform_2, window_bounds = array<i64: 1, 32>}, {pipeline_mode = #tpu.pipeline_mode<synchronous>, transform_indices = @transform_3, window_bounds = array<i64: 32, 32>}, {pipeline_mode = #tpu.pipeline_mode<synchronous>, transform_indices = @transform_4, window_bounds = array<i64: 1, 32>}, {transform_indices = @transform_5, window_bounds = array<i64: 2, 32>}]} {
    %c0 = arith.constant 0 : index
    %c0_0 = arith.constant 0 : index
    %0 = vector.load %arg1[%c0, %c0_0] : memref<2x32xf32, #tpu.memory_space<vmem>>, vector<2x32xf32>
    %c0_1 = arith.constant 0 : index
    %c0_2 = arith.constant 0 : index
    %1 = vector.load %arg2[%c0_1, %c0_2] : memref<1x32xf32, #tpu.memory_space<vmem>>, vector<1x32xf32>
    %c0_3 = arith.constant 0 : index
    %c0_4 = arith.constant 0 : index
    %2 = vector.load %arg3[%c0_3, %c0_4] : memref<1x32xf32, #tpu.memory_space<vmem>>, vector<1x32xf32>
    %cst = arith.constant dense<0.000000e+00> : vector<2xf32>
    %3 = vector.multi_reduction <add>, %0, %cst [1] : vector<2x32xf32> to vector<2xf32>
    %4 = vector.shape_cast %3 : vector<2xf32> to vector<2x1xf32>
    %cst_5 = arith.constant 3.200000e+01 : f32
    %5 = vector.broadcast %cst_5 : f32 to vector<2x1xf32>
    %6 = arith.divf %4, %5 : vector<2x1xf32>
    %7 = vector.broadcast %6 : vector<2x1xf32> to vector<2x32xf32>
    %8 = arith.subf %0, %7 : vector<2x32xf32>
    %9 = arith.mulf %8, %8 : vector<2x32xf32>
    %cst_6 = arith.constant dense<0.000000e+00> : vector<2xf32>
    %10 = vector.multi_reduction <add>, %9, %cst_6 [1] : vector<2x32xf32> to vector<2xf32>
    %11 = vector.shape_cast %10 : vector<2xf32> to vector<2x1xf32>
    %cst_7 = arith.constant 3.200000e+01 : f32
    %12 = vector.broadcast %cst_7 : f32 to vector<2x1xf32>
    %13 = arith.divf %11, %12 : vector<2x1xf32>
    %cst_8 = arith.constant 9.99999974E-6 : f32
    %14 = vector.broadcast %cst_8 : f32 to vector<2x1xf32>
    %15 = arith.addf %13, %14 : vector<2x1xf32>
    %16 = math.rsqrt %15 : vector<2x1xf32>
    %17 = vector.broadcast %16 : vector<2x1xf32> to vector<2x32xf32>
    %18 = arith.mulf %8, %17 : vector<2x32xf32>
    %19 = vector.broadcast %1 : vector<1x32xf32> to vector<2x32xf32>
    %20 = arith.mulf %18, %19 : vector<2x32xf32>
    %21 = vector.broadcast %2 : vector<1x32xf32> to vector<2x32xf32>
    %22 = arith.addf %20, %21 : vector<2x32xf32>
    %23 = arith.truncf %22 : vector<2x32xf32> to vector<2x32xbf16>
    %c0_9 = arith.constant 0 : index
    %c0_10 = arith.constant 0 : index
    %24 = vector.load %arg4[%c0_9, %c0_10] : memref<32x32xbf16, #tpu.memory_space<vmem>>, vector<32x32xbf16>
    %cst_11 = arith.constant dense<0.000000e+00> : vector<2x32xf32>
    %25 = tpu.matmul %23, %24, %cst_11 {dimension_numbers = #tpu.dot_dimension_numbers<[1], [0], [0], [1], [0, 0, 1, 1], [], []>} : vector<2x32xbf16>, vector<32x32xbf16>, vector<2x32xf32> -> vector<2x32xf32>
    %c0_12 = arith.constant 0 : index
    %c0_13 = arith.constant 0 : index
    %26 = vector.load %arg5[%c0_12, %c0_13] : memref<1x32xf32, #tpu.memory_space<vmem>>, vector<1x32xf32>
    %27 = vector.broadcast %26 : vector<1x32xf32> to vector<2x32xf32>
    %28 = arith.addf %25, %27 : vector<2x32xf32>
    %cst_14 = arith.constant 5.000000e-01 : f32
    %29 = vector.broadcast %cst_14 : f32 to vector<2x32xf32>
    %30 = arith.mulf %29, %28 : vector<2x32xf32>
    %cst_15 = arith.constant 0.707106769 : f32
    %31 = vector.broadcast %cst_15 : f32 to vector<2x32xf32>
    %32 = arith.mulf %28, %31 : vector<2x32xf32>
    %33 = math.absf %32 : vector<2x32xf32>
    %cst_16 = arith.constant 0.327591091 : f32
    %34 = vector.broadcast %cst_16 : f32 to vector<2x32xf32>
    %35 = arith.mulf %34, %33 : vector<2x32xf32>
    %cst_17 = arith.constant 1.000000e+00 : f32
    %36 = vector.broadcast %cst_17 : f32 to vector<2x32xf32>
    %37 = arith.addf %36, %35 : vector<2x32xf32>
    %cst_18 = arith.constant 1.000000e+00 : f32
    %38 = vector.broadcast %cst_18 : f32 to vector<2x32xf32>
    %39 = arith.divf %38, %37 : vector<2x32xf32>
    %cst_19 = arith.constant 1.06140542 : f32
    %40 = vector.broadcast %cst_19 : f32 to vector<2x32xf32>
    %41 = arith.mulf %40, %39 : vector<2x32xf32>
    %cst_20 = arith.constant -1.45315206 : f32
    %42 = vector.broadcast %cst_20 : f32 to vector<2x32xf32>
    %43 = arith.addf %41, %42 : vector<2x32xf32>
    %44 = arith.mulf %43, %39 : vector<2x32xf32>
    %cst_21 = arith.constant 1.42141378 : f32
    %45 = vector.broadcast %cst_21 : f32 to vector<2x32xf32>
    %46 = arith.addf %44, %45 : vector<2x32xf32>
    %47 = arith.mulf %46, %39 : vector<2x32xf32>
    %cst_22 = arith.constant -0.284496725 : f32
    %48 = vector.broadcast %cst_22 : f32 to vector<2x32xf32>
    %49 = arith.addf %47, %48 : vector<2x32xf32>
    %50 = arith.mulf %49, %39 : vector<2x32xf32>
    %cst_23 = arith.constant 0.254829586 : f32
    %51 = vector.broadcast %cst_23 : f32 to vector<2x32xf32>
    %52 = arith.addf %50, %51 : vector<2x32xf32>
    %53 = arith.mulf %52, %39 : vector<2x32xf32>
    %54 = arith.mulf %33, %33 : vector<2x32xf32>
    %cst_24 = arith.constant 0.000000e+00 : f32
    %55 = vector.broadcast %cst_24 : f32 to vector<2x32xf32>
    %56 = arith.subf %55, %54 : vector<2x32xf32>
    %57 = math.exp %56 : vector<2x32xf32>
    %58 = arith.mulf %53, %57 : vector<2x32xf32>
    %cst_25 = arith.constant 1.000000e+00 : f32
    %59 = vector.broadcast %cst_25 : f32 to vector<2x32xf32>
    %60 = arith.subf %59, %58 : vector<2x32xf32>
    %cst_26 = arith.constant 0.000000e+00 : f32
    %61 = vector.broadcast %cst_26 : f32 to vector<2x32xf32>
    %62 = arith.cmpf olt, %32, %61 : vector<2x32xf32>
    %cst_27 = arith.constant 0.000000e+00 : f32
    %63 = vector.broadcast %cst_27 : f32 to vector<2x32xf32>
    %64 = arith.subf %63, %60 : vector<2x32xf32>
    %65 = arith.select %62, %64, %60 : vector<2x32xi1>, vector<2x32xf32>
    %cst_28 = arith.constant 1.000000e+00 : f32
    %66 = vector.broadcast %cst_28 : f32 to vector<2x32xf32>
    %67 = arith.addf %66, %65 : vector<2x32xf32>
    %68 = arith.mulf %30, %67 : vector<2x32xf32>
    %69 = arith.truncf %68 : vector<2x32xf32> to vector<2x32xbf16>
    %c0_29 = arith.constant 0 : index
    %c0_30 = arith.constant 0 : index
    %70 = vector.load %arg6[%c0_29, %c0_30] : memref<2x32xbf16, #tpu.memory_space<vmem>>, vector<2x32xbf16>
    tpu.vector_store %arg6[%c0_29, %c0_30], %69 {strides = array<i32>} : memref<2x32xbf16, #tpu.memory_space<vmem>>, vector<2x32xbf16>,
    return
  }
  func.func @transform_0(%arg0: i32) -> (i32, i32) {
    %c0_i32 = arith.constant 0 : i32
    %c0_i32_0 = arith.constant 0 : i32
    return %arg0, %c0_i32 : i32, i32
  }
  func.func @transform_1(%arg0: i32) -> (i32, i32) {
    %c0_i32 = arith.constant 0 : i32
    %c0_i32_0 = arith.constant 0 : i32
    %c0_i32_1 = arith.constant 0 : i32
    return %c0_i32, %c0_i32_0 : i32, i32
  }
  func.func @transform_2(%arg0: i32) -> (i32, i32) {
    %c0_i32 = arith.constant 0 : i32
    %c0_i32_0 = arith.constant 0 : i32
    %c0_i32_1 = arith.constant 0 : i32
    return %c0_i32, %c0_i32_0 : i32, i32
  }
  func.func @transform_3(%arg0: i32) -> (i32, i32) {
    %c0_i32 = arith.constant 0 : i32
    %c0_i32_0 = arith.constant 0 : i32
    %c0_i32_1 = arith.constant 0 : i32
    return %c0_i32, %c0_i32_0 : i32, i32
  }
  func.func @transform_4(%arg0: i32) -> (i32, i32) {
    %c0_i32 = arith.constant 0 : i32
    %c0_i32_0 = arith.constant 0 : i32
    %c0_i32_1 = arith.constant 0 : i32
    return %c0_i32, %c0_i32_0 : i32, i32
  }
  func.func @transform_5(%arg0: i32) -> (i32, i32) {
    %c0_i32 = arith.constant 0 : i32
    %c0_i32_0 = arith.constant 0 : i32
    return %arg0, %c0_i32 : i32, i32
  }
}

</mosaic_0001>

<bundles_post_ra>
// kernel: ast_forward.13
= control target key start
LH: loop header
LB: loop body
LE: loop exit
PB: predicated region body
PF: predicated region fallthrough
CT: control target
= control target key end

     0   :  { %vm49_vm0 = vcmask 261120   ;;  %vm132_vm1 = vcmask 254976   ;;  %s250_s1 = inlined_call_operand.vmem [shape: bf16[32,32], index: 1, kind: input, shape index: {}]   ;;  %s251_s0 = inlined_call_operand.vmem [shape: f32[50,32], index: 0, kind: input, shape index: {}]   ;;  %s252_s2 = inlined_call_operand.vmem [shape: f32[1,32], index: 2, kind: input, shape index: {}]   ;;  %s253_s3 = inlined_call_operand.vmem [shape: f32[50,32], index: 3, kind: output, shape index: {}]  }
   0x1   :  { %v167_v0 = vld [vmem:[%s250_s1 + $0x8] sm:$0xff]   ;;  %v168_v1 = vld [vmem:[%s250_s1] sm:$0xff]   ;;  %v17_v7 = vld [vmem:[%s251_s0 + $0x10] sm:$0xff] }
   0x2   :  { %151 = vmatprep.subr.bf16.mxu0 %v167_v0  ;;  %163 = vmatprep.subr.bf16.mxu1 %v167_v0  ;;  %v15_v2 = vld [vmem:[%s251_s0] sm:$0xff]  ;;  %v16_v3 = vld [vmem:[%s251_s0 + $0x8] sm:$0xff]  ;;  %v18_v8 = vld [vmem:[%s251_s0 + $0x18] sm:$0xff] }
   0x3   :  { %v19_v4 = vld [vmem:[%s251_s0 + $0x20] sm:$0xff]  ;;  %152 = vmatpush3.bf16.msra.mxu0 %v167_v0  ;;  %165 = vmatpush3.bf16.msra.mxu1 %v167_v0  ;;  %v22_v5 = vpack.c.bf16 %v16_v3, %v15_v2  ;;  %v20_v6 = vld [vmem:[%s251_s0 + $0x28] sm:$0xff]  ;;  %v21_v10 = vld [vmem:[%s251_s0 + $0x30] sm:$0x3]  ;;  %v23_v11 = vpack.c.bf16 %v18_v8, %v17_v7 }
   0x4   :  { %153 = vmatprep.subr.bf16.mxu0 %v168_v1  ;;  %164 = vmatprep.subr.bf16.mxu1 %v168_v1  ;;  %v24_v9 = vpack.c.bf16 %v20_v6, %v19_v4  ;;  %v25_v12 = vpack.c.bf16 %v21_v10, %v21_v10  ;;  %v138_v13 = vld [vmem:[%s252_s2] ss:$0 sm:$0xff] }
   0x5   :  { %155 = vmatprep.mubr.msk.bf16.mxu0 %vm49_vm0, %v22_v5 }
   0x6   :  { %159 = vmatprep.mubr.msk.bf16.mxu1 %vm49_vm0, %v24_v9 }
   0x7   :  { %154 = vmatpush3.bf16.msra.mxu0 %v168_v1  ;;  %166 = vmatpush3.bf16.msra.mxu1 %v168_v1 }
   0xa   :  { %156 = vmatmul.mubr.msk.bf16.vlgmr.msra.gmra.mxu0 %vm49_vm0, %v23_v11  ;;  %160 = vmatmul.mubr.msk.bf16.vlgmr.msra.gmra.mxu1 %vm49_vm0, %v25_v12 }
  0xca   :  { %v157_v14 = vpop.f32.mrf.mxu0  ;;  %v161_v15 = vpop.f32.mrf.mxu1 }
  0xcb   :  { %v105_v16 = vadd.f32 %v157_v14, %v138_v13  ;;  %v121_v17 = vadd.f32 %v161_v15, %v138_v13 }
  0xcc   :  { %v96_v18 = vpop.f32.mrf.mxu0  ;;  %v112_v19 = vpop.f32.mrf.mxu1 }
  0xcd   :  { %128 = vst.msk [vmem:[%s253_s3 + $0x10] sm:$0xff] %vm49_vm0, %v105_v16  ;;  %v97_v20 = vadd.f32 %v138_v13, %v96_v18  ;;  %v113_v21 = vadd.f32 %v138_v13, %v112_v19 }
  0xce   :  { %133 = vst.msk [vmem:[%s253_s3 + $0x30] sm:$0x3] %vm132_vm1, %v121_v17  ;;  %v158_v22 = vpop.f32.mrf.mxu0  ;;  %v162_v23 = vpop.f32.mrf.mxu1 }
  0xcf   :  { %126 = vst.msk [vmem:[%s253_s3] sm:$0xff] %vm49_vm0, %v97_v20  ;;  %130 = vst.msk [vmem:[%s253_s3 + $0x20] sm:$0xff] %vm49_vm0, %v113_v21  ;;  %v108_v24 = vadd.f32 %v158_v22, %v138_v13 }
  0xd0   :  { %v99_v25 = vpop.f32.mrf.mxu0  ;;  %v115_v26 = vpop.f32.mrf.mxu1 }
  0xd1   :  { %129 = vst.msk [vmem:[%s253_s3 + $0x18] sm:$0xff] %vm49_vm0, %v108_v24  ;;  %v100_v27 = vadd.f32 %v138_v13, %v99_v25  ;;  %v116_v28 = vadd.f32 %v138_v13, %v115_v26 }
  0xd3   :  { %127 = vst.msk [vmem:[%s253_s3 + $0x8] sm:$0xff] %vm49_vm0, %v100_v27  ;;  %131 = vst.msk [vmem:[%s253_s3 + $0x28] sm:$0xff] %vm49_vm0, %v116_v28 }

// kernel: ast_forward.14
= control target key start
LH: loop header
LB: loop body
LE: loop exit
PB: predicated region body
PF: predicated region fallthrough
CT: control target
= control target key end

     0   :  { %vm45_vm0 = vcmask 261120   ;;  %vm64_vm1 = vcmask 257024   ;;  %vm303_vm2 = vcmask 254976   ;;  %s991_s0 = inlined_call_operand.vmem [shape: f32[52,32], index: 0, kind: input, shape index: {}]   ;;  %s992_s3 = inlined_call_operand.vmem [shape: bf16[32,32], index: 3, kind: input, shape index: {}]   ;;  %s993_s5 = inlined_call_operand.vmem [shape: bf16[32,32], index: 5, kind: input, shape index: {}]   ;;  %s994_s7 = inlined_call_operand.vmem [shape: bf16[32,32], index: 7, kind: input, shape index: {}]   ;;  %s995_s1 = inlined_call_operand.vmem [shape: f32[1,32], index: 1, kind: input, shape index: {}]   ;;  %s996_s2 = inlined_call_operand.vmem [shape: f32[1,32], index: 2, kind: input, shape index: {}]   ;;  %s997_s4 = inlined_call_operand.vmem [shape: f32[1,32], index: 4, kind: input, shape index: {}]   ;;  %s998_s9 = inlined_call_operand.vmem [shape: bf16[52,32], index: 9, kind: output, shape index: {0}]   ;;  %s999_s6 = inlined_call_operand.vmem [shape: f32[1,32], index: 6, kind: input, shape index: {}]   ;;  %s1000_s8 = inlined_call_operand.vmem [shape: f32[1,32], index: 8, kind: input, shape index: {}]   ;;  %s1001_s10 = inlined_call_operand.vmem [shape: bf16[52,32], index: 10, kind: output, shape index: {1}]   ;;  %s1002_s11 = inlined_call_operand.vmem [shape: bf16[52,32], index: 11, kind: output, shape index: {2}]  }
   0x1   :  { %v36_v0 = vld [vmem:[%s991_s0] sm:$0xff]  ;;  %v37_v2 = vld [vmem:[%s991_s0 + $0x8] sm:$0xff]  ;;  %v38_v8 = vld [vmem:[%s991_s0 + $0x10] sm:$0xff] }
   0x2   :  { %v40_v1 = vld [vmem:[%s991_s0 + $0x20] sm:$0xff]  ;;  %v46_v3 = vsel %vm45_vm0, %v36_v0, 0.0  ;;  %v41_v5 = vld [vmem:[%s991_s0 + $0x28] sm:$0xff]  ;;  %v49_v6 = vsel %vm45_vm0, %v37_v2, 0.0  ;;  %v39_v9 = vld [vmem:[%s991_s0 + $0x18] sm:$0xff]  ;;  %v52_v10 = vsel %vm45_vm0, %v38_v8, 0.0 }
   0x3   :  { %v58_v4 = vsel %vm45_vm0, %v40_v1, 0.0  ;;  %47 = vadd.xlane.f32.xlu0 %v46_v3  ;;  %v61_v7 = vsel %vm45_vm0, %v41_v5, 0.0  ;;  %v55_v11 = vsel %vm45_vm0, %v39_v9, 0.0  ;;  %v42_v12 = vld [vmem:[%s991_s0 + $0x30] sm:$0xf]  ;;  %v686_v49 = vld [vmem:[%s992_s3 + $0x8] sm:$0xff]  }
   0x4   :  { %59 = vadd.xlane.f32.xlu1 %v58_v4  ;;  %v65_v13 = vsel %vm64_vm1, %v42_v12, 0.0  ;;  %646 = vmatprep.subr.bf16.mxu0 %v686_v49  ;;  %v687_v50 = vld [vmem:[%s992_s3] sm:$0xff]   ;;  %v838_v51 = vld [vmem:[%s993_s5 + $0x8] sm:$0xff]  }
   0x5   :  { %682 = vmatprep.subr.bf16.mxu1 %v686_v49  ;;  %647 = vmatpush3.bf16.msra.mxu0 %v686_v49  ;;  %v843_v52 = vld [vmem:[%s994_s7 + $0x8] sm:$0xff]  }
   0x6   :  { %684 = vmatpush3.bf16.msra.mxu1 %v686_v49  ;;  %648 = vmatprep.subr.bf16.mxu0 %v687_v50 }
   0x7   :  { %50 = vadd.xlane.f32.xlu0 %v49_v6  ;;  %683 = vmatprep.subr.bf16.mxu1 %v687_v50 }
   0x8   :  { %62 = vadd.xlane.f32.xlu1 %v61_v7 }
   0x9   :  { %649 = vmatpush3.bf16.msra.mxu0 %v687_v50 }
   0xa   :  { %685 = vmatpush3.bf16.msra.mxu1 %v687_v50  ;;  %670 = vmatprep.subr.bf16.mxu0 %v843_v52 }
   0xb   :  { %53 = vadd.xlane.f32.xlu0 %v52_v10  ;;  %658 = vmatprep.subr.bf16.mxu1 %v838_v51 }
   0xc   :  { %56 = vadd.xlane.f32.xlu1 %v55_v11 }
   0xf   :  { %66 = vadd.xlane.f32.xlu0 %v65_v13 }
  0x8c   :  { %v48_v14 = vpop.xlane.xlu0 %47 }
  0x8d   :  { %v60_v15 = vpop.xlane.xlu1 %59  ;;  %v69_v16 = vmul.f32 0.03125, %v48_v14 }
  0x8e   :  { %v73_v17 = vmul.f32 0.03125, %v60_v15 }
  0x8f   :  { %v794_v18 = vsub.f32 %v36_v0, %v69_v16  ;;  %v564_v16 = vld [vmem:[%s996_s2] ss:$0 sm:$0xff] }
  0x90   :  { %v796_v19 = vsub.f32 %v40_v1, %v73_v17  ;;  %v51_v20 = vpop.xlane.xlu0 %50 }
  0x91   :  { %v63_v21 = vpop.xlane.xlu1 %62  ;;  %v70_v22 = vmul.f32 0.03125, %v51_v20  ;;  %v83_v24 = vmul.f32 %v794_v18, %v794_v18 }
  0x92   :  { %v74_v23 = vmul.f32 0.03125, %v63_v21  ;;  %v87_v25 = vmul.f32 %v796_v19, %v796_v19 }
  0x93   :  { %v802_v26 = vsub.f32 %v37_v2, %v70_v22  ;;  %v90_v28 = vsel %vm45_vm0, %v83_v24, 0.0 }
  0x94   :  { %v804_v27 = vsub.f32 %v41_v5, %v74_v23  ;;  %91 = vadd.xlane.f32.xlu1 %v90_v28  ;;  %v54_v29 = vpop.xlane.xlu0 %53  ;;  %v102_v31 = vsel %vm45_vm0, %v87_v25, 0.0 }
  0x95   :  { %v57_v30 = vpop.xlane.xlu1 %56  ;;  %v71_v32 = vmul.f32 0.03125, %v54_v29  ;;  %v84_v34 = vmul.f32 %v802_v26, %v802_v26 }
  0x96   :  { %v72_v33 = vmul.f32 0.03125, %v57_v30  ;;  %v88_v35 = vmul.f32 %v804_v27, %v804_v27 }
  0x97   :  { %v812_v36 = vsub.f32 %v38_v8, %v71_v32  ;;  %v93_v38 = vsel %vm45_vm0, %v84_v34, 0.0 }
  0x98   :  { %v814_v37 = vsub.f32 %v39_v9, %v72_v33  ;;  %103 = vadd.xlane.f32.xlu1 %v102_v31  ;;  %94 = vadd.xlane.f32.xlu0 %v93_v38  ;;  %v67_v39 = vpop.xlane.xlu0 %66  ;;  %v105_v41 = vsel %vm45_vm0, %v88_v35, 0.0 }
  0x99   :  { %v75_v40 = vmul.f32 0.03125, %v67_v39  ;;  %v85_v42 = vmul.f32 %v812_v36, %v812_v36 }
  0x9a   :  { %v86_v43 = vmul.f32 %v814_v37, %v814_v37 }
  0x9b   :  { %v822_v44 = vsub.f32 %v42_v12, %v75_v40  ;;  %v96_v45 = vsel %vm45_vm0, %v85_v42, 0.0  ;;  %v563_v12 = vld [vmem:[%s995_s1] ss:$0 sm:$0xff] }
  0x9c   :  { %106 = vadd.xlane.f32.xlu0 %v105_v41  ;;  %97 = vadd.xlane.f32.xlu1 %v96_v45  ;;  %v99_v46 = vsel %vm45_vm0, %v86_v43, 0.0 }
  0x9d   :  { %v89_v47 = vmul.f32 %v822_v44, %v822_v44 }
  0x9f   :  { %v108_v48 = vsel %vm64_vm1, %v89_v47, 0.0 }
  0xa0   :  { %100 = vadd.xlane.f32.xlu0 %v99_v46  ;;  %109 = vadd.xlane.f32.xlu1 %v108_v48  ;;  %v565_v46 = vld [vmem:[%s997_s4] ss:$0 sm:$0xff] }
 0x11d   :  { %v92_v53 = vpop.xlane.xlu1 %91 }
 0x11e   :  { %v111_v54 = vmul.f32 0.03125, %v92_v53 }
 0x120   :  { %v118_v55 = vadd.f32 1e-05, %v111_v54 }
 0x121   :  { %v104_v56 = vpop.xlane.xlu1 %103  ;;  %v95_v57 = vpop.xlane.xlu0 %94 }
 0x122   :  { %692 = vrsqrt.f32 %v118_v55  ;;  %v115_v58 = vmul.f32 0.03125, %v104_v56  ;;  %v112_v59 = vmul.f32 0.03125, %v95_v57 }
 0x124   :  { %v122_v60 = vadd.f32 1e-05, %v115_v58  ;;  %v119_v61 = vadd.f32 1e-05, %v112_v59 }
 0x125   :  { %v98_v62 = vpop.xlane.xlu1 %97  ;;  %v107_v63 = vpop.xlane.xlu0 %106 }
 0x126   :  { %694 = vrsqrt.f32 %v122_v60  ;;  %v113_v0 = vmul.f32 0.03125, %v98_v62  ;;  %v116_v1 = vmul.f32 0.03125, %v107_v63  ;;  %v894_v63 = vld [vmem:[%s999_s6] ss:$0 sm:$0xff] }
 0x127   :  { %696 = vrsqrt.f32 %v119_v61 }
 0x128   :  { %v120_v2 = vadd.f32 1e-05, %v113_v0  ;;  %v123_v3 = vadd.f32 1e-05, %v116_v1 }
 0x129   :  { %v110_v4 = vpop.xlane.xlu1 %109  ;;  %v101_v5 = vpop.xlane.xlu0 %100 }
 0x12a   :  { %698 = vrsqrt.f32 %v120_v2  ;;  %v117_v6 = vmul.f32 0.03125, %v110_v4  ;;  %v114_v7 = vmul.f32 0.03125, %v101_v5  ;;  %v903_v2 = vld [vmem:[%s1000_s8] ss:$0 sm:$0xff] }
 0x12b   :  { %700 = vrsqrt.f32 %v123_v3 }
 0x12c   :  { %v124_v8 = vadd.f32 1e-05, %v117_v6  ;;  %v121_v9 = vadd.f32 1e-05, %v114_v7 }
 0x12e   :  { %702 = vrsqrt.f32 %v124_v8 }
 0x12f   :  { %v693_v10 = vpop.eup %692  ;;  %704 = vrsqrt.f32 %v121_v9 }
 0x130   :  { %v132_v11 = vmul.f32 %v693_v10, %v794_v18 }
 0x132   :  { %v145_v15 = vmul.f32 %v563_v12, %v132_v11 }
 0x133   :  { %v695_v13 = vpop.eup %694 }
 0x134   :  { %v697_v14 = vpop.eup %696  ;;  %v136_v20 = vmul.f32 %v695_v13, %v796_v19  ;;  %v158_v24 = vadd.f32 %v564_v16, %v145_v15 }
 0x135   :  { %v133_v17 = vmul.f32 %v697_v14, %v802_v26 }
 0x136   :  { %v149_v28 = vmul.f32 %v563_v12, %v136_v20 }
 0x137   :  { %v699_v21 = vpop.eup %698  ;;  %v146_v22 = vmul.f32 %v563_v12, %v133_v17 }
 0x138   :  { %v701_v23 = vpop.eup %700  ;;  %v134_v29 = vmul.f32 %v699_v21, %v812_v36  ;;  %v162_v26 = vadd.f32 %v564_v16, %v149_v28 }
 0x139   :  { %v159_v18 = vadd.f32 %v564_v16, %v146_v22  ;;  %v137_v25 = vmul.f32 %v701_v23, %v804_v27 }
 0x13a   :  { %v147_v38 = vmul.f32 %v563_v12, %v134_v29 }
 0x13b   :  { %v703_v30 = vpop.eup %702  ;;  %v165_v31 = vpack.c.bf16 %v159_v18, %v158_v24  ;;  %v150_v32 = vmul.f32 %v563_v12, %v137_v25 }
 0x13c   :  { %v705_v33 = vpop.eup %704  ;;  %v138_v34 = vmul.f32 %v703_v30, %v822_v44  ;;  %v160_v36 = vadd.f32 %v564_v16, %v147_v38  ;;  %v690_v44 = vld [vmem:[%s993_s5] sm:$0xff]  }
 0x13d   :  { %650 = vmatprep.mubr.msk.bf16.mxu0 %vm45_vm0, %v165_v31  ;;  %v163_v19 = vadd.f32 %v564_v16, %v150_v32  ;;  %v135_v35 = vmul.f32 %v705_v33, %v814_v37  ;;  %v691_v37 = vld [vmem:[%s994_s7] sm:$0xff]  }
 0x13e   :  { %v151_v39 = vmul.f32 %v563_v12, %v138_v34 }
 0x13f   :  { %v167_v40 = vpack.c.bf16 %v163_v19, %v162_v26  ;;  %v148_v41 = vmul.f32 %v563_v12, %v135_v35 }
 0x140   :  { %v164_v27 = vadd.f32 %v564_v16, %v151_v39 }
 0x141   :  { %654 = vmatprep.mubr.msk.bf16.mxu1 %vm45_vm0, %v167_v40  ;;  %v161_v42 = vadd.f32 %v564_v16, %v148_v41 }
 0x142   :  { %v168_v43 = vpack.c.bf16 %v164_v27, %v164_v27 }
 0x143   :  { %v166_v45 = vpack.c.bf16 %v161_v42, %v160_v36 }
 0x144   :  { %655 = vmatmul.mubr.msk.bf16.vlgmr.msra.gmra.mxu1 %vm45_vm0, %v168_v43 }
 0x145   :  { %651 = vmatmul.mubr.msk.bf16.vlgmr.msra.gmra.mxu0 %vm45_vm0, %v166_v45  ;;  %659 = vmatpush3.bf16.msra.mxu1 %v838_v51 }
 0x146   :  { %671 = vmatpush3.bf16.msra.mxu0 %v843_v52  ;;  %662 = vmatprep.mubr.msk.bf16.mxu1 %vm45_vm0, %v165_v31 }
 0x147   :  { %674 = vmatprep.mubr.msk.bf16.mxu0 %vm45_vm0, %v165_v31  ;;  %660 = vmatprep.subr.bf16.mxu1 %v690_v44 }
 0x148   :  { %672 = vmatprep.subr.bf16.mxu0 %v691_v37 }
 0x149   :  { %661 = vmatpush3.bf16.msra.mxu1 %v690_v44 }
 0x14a   :  { %673 = vmatpush3.bf16.msra.mxu0 %v691_v37 }
 0x14c   :  { %663 = vmatmul.mubr.msk.bf16.vlgmr.msra.gmra.mxu1 %vm45_vm0, %v166_v45 }
 0x14d   :  { %675 = vmatmul.mubr.msk.bf16.vlgmr.msra.gmra.mxu0 %vm45_vm0, %v166_v45  ;;  %666 = vmatprep.mubr.msk.bf16.mxu1 %vm45_vm0, %v167_v40 }
 0x14e   :  { %678 = vmatprep.mubr.msk.bf16.mxu0 %vm45_vm0, %v167_v40 }
 0x154   :  { %667 = vmatmul.mubr.msk.bf16.gmra.mxu1 %vm45_vm0, %v168_v43 }
 0x155   :  { %679 = vmatmul.mubr.msk.bf16.gmra.mxu0 %vm45_vm0, %v168_v43 }
 0x204   :  { %v656_v47 = vpop.f32.mrf.mxu1 }
 0x205   :  { %v652_v48 = vpop.f32.mrf.mxu0  ;;  %v263_v49 = vadd.f32 %v656_v47, %v565_v46 }
 0x206   :  { %v247_v50 = vadd.f32 %v652_v48, %v565_v46  ;;  %v254_v51 = vpop.f32.mrf.mxu1 }
 0x207   :  { %v613_v52 = vpack.c.bf16 %v263_v49, %v263_v49  ;;  %v238_v53 = vpop.f32.mrf.mxu0  ;;  %v255_v54 = vadd.f32 %v565_v46, %v254_v51 }
 0x208   :  { %v609_v55 = vpack.c.bf16 %v247_v50, %v247_v50  ;;  %v239_v56 = vadd.f32 %v565_v46, %v238_v53  ;;  %v657_v57 = vpop.f32.mrf.mxu1 }
 0x209   :  { %304 = vst.msk [vmem:[%s998_s9 + $0x18] sm:$0x3] %vm303_vm2, %v613_v52  ;;  %v611_v58 = vpack.c.bf16 %v255_v54, %v255_v54  ;;  %v653_v59 = vpop.f32.mrf.mxu0 }
 0x20a   :  { %299 = vst.msk [vmem:[%s998_s9 + $0x8] sm:$0xf] %vm64_vm1, %v609_v55  ;;  %v607_v60 = vpack.c.bf16 %v239_v56, %v239_v56  ;;  %v250_v61 = vadd.f32 %v653_v59, %v565_v46  ;;  %v257_v62 = vpop.f32.mrf.mxu1 }
 0x20b   :  { %301 = vst.msk [vmem:[%s998_s9 + $0x10] sm:$0xf] %vm64_vm1, %v611_v58  ;;  %v241_v0 = vpop.f32.mrf.mxu0  ;;  %v258_v1 = vadd.f32 %v565_v46, %v257_v62 }
 0x20c   :  { %297 = vst.msk [vmem:[%s998_s9] sm:$0xf] %vm64_vm1, %v607_v60  ;;  %v610_v3 = vpack.c.bf16 %v250_v61, %v250_v61  ;;  %v242_v4 = vadd.f32 %v565_v46, %v241_v0  ;;  %v664_v5 = vpop.f32.mrf.mxu1 }
 0x20d   :  { %v612_v6 = vpack.c.bf16 %v258_v1, %v258_v1  ;;  %v371_v7 = vadd.f32 %v664_v5, %v894_v63  ;;  %v676_v8 = vpop.f32.mrf.mxu0 }
 0x20e   :  { %300 = vst.msk [vmem:[%s998_s9 + $0xc] sm:$0xf] %vm64_vm1, %v610_v3  ;;  %v608_v9 = vpack.c.bf16 %v242_v4, %v242_v4  ;;  %v494_v10 = vadd.f32 %v676_v8, %v903_v2  ;;  %v362_v11 = vpop.f32.mrf.mxu1 }
 0x20f   :  { %302 = vst.msk [vmem:[%s998_s9 + $0x14] sm:$0xf] %vm64_vm1, %v612_v6  ;;  %v616_v12 = vpack.c.bf16 %v371_v7, %v371_v7  ;;  %v363_v13 = vadd.f32 %v894_v63, %v362_v11  ;;  %v485_v14 = vpop.f32.mrf.mxu0 }
 0x210   :  { %298 = vst.msk [vmem:[%s998_s9 + $0x4] sm:$0xf] %vm64_vm1, %v608_v9  ;;  %v623_v15 = vpack.c.bf16 %v494_v10, %v494_v10  ;;  %v486_v16 = vadd.f32 %v903_v2, %v485_v14  ;;  %v665_v17 = vpop.f32.mrf.mxu1 }
 0x211   :  { %423 = vst.msk [vmem:[%s1001_s10 + $0x8] sm:$0xf] %vm64_vm1, %v616_v12  ;;  %v614_v20 = vpack.c.bf16 %v363_v13, %v363_v13  ;;  %v374_v21 = vadd.f32 %v665_v17, %v894_v63  ;;  %v677_v22 = vpop.f32.mrf.mxu0 }
 0x212   :  { %546 = vst.msk [vmem:[%s1002_s11 + $0x8] sm:$0xf] %vm64_vm1, %v623_v15  ;;  %v621_v23 = vpack.c.bf16 %v486_v16, %v486_v16  ;;  %v497_v24 = vadd.f32 %v677_v22, %v903_v2  ;;  %v365_v18 = vpop.f32.mrf.mxu1 }
 0x213   :  { %421 = vst.msk [vmem:[%s1001_s10] sm:$0xf] %vm64_vm1, %v614_v20  ;;  %v617_v25 = vpack.c.bf16 %v374_v21, %v374_v21  ;;  %v366_v28 = vadd.f32 %v894_v63, %v365_v18  ;;  %v488_v29 = vpop.f32.mrf.mxu0 }
 0x214   :  { %544 = vst.msk [vmem:[%s1002_s11] sm:$0xf] %vm64_vm1, %v621_v23  ;;  %v624_v30 = vpack.c.bf16 %v497_v24, %v497_v24  ;;  %v489_v31 = vadd.f32 %v903_v2, %v488_v29  ;;  %v668_v32 = vpop.f32.mrf.mxu1 }
 0x215   :  { %424 = vst.msk [vmem:[%s1001_s10 + $0xc] sm:$0xf] %vm64_vm1, %v617_v25  ;;  %v615_v33 = vpack.c.bf16 %v366_v28, %v366_v28  ;;  %v387_v34 = vadd.f32 %v668_v32, %v894_v63  ;;  %v680_v26 = vpop.f32.mrf.mxu0 }
 0x216   :  { %547 = vst.msk [vmem:[%s1002_s11 + $0xc] sm:$0xf] %vm64_vm1, %v624_v30  ;;  %v622_v19 = vpack.c.bf16 %v489_v31, %v489_v31  ;;  %v510_v35 = vadd.f32 %v680_v26, %v903_v2  ;;  %v378_v38 = vpop.f32.mrf.mxu1 }
 0x217   :  { %422 = vst.msk [vmem:[%s1001_s10 + $0x4] sm:$0xf] %vm64_vm1, %v615_v33  ;;  %v620_v39 = vpack.c.bf16 %v387_v34, %v387_v34  ;;  %v379_v40 = vadd.f32 %v894_v63, %v378_v38  ;;  %v501_v41 = vpop.f32.mrf.mxu0 }
 0x218   :  { %545 = vst.msk [vmem:[%s1002_s11 + $0x4] sm:$0xf] %vm64_vm1, %v622_v19  ;;  %v627_v27 = vpack.c.bf16 %v510_v35, %v510_v35  ;;  %v502_v36 = vadd.f32 %v903_v2, %v501_v41  ;;  %v669_v42 = vpop.f32.mrf.mxu1 }
 0x219   :  { %427 = vst.msk [vmem:[%s1001_s10 + $0x18] sm:$0x3] %vm303_vm2, %v620_v39  ;;  %v618_v43 = vpack.c.bf16 %v379_v40, %v379_v40  ;;  %v681_v45 = vpop.f32.mrf.mxu0 }
 0x21a   :  { %550 = vst.msk [vmem:[%s1002_s11 + $0x18] sm:$0x3] %vm303_vm2, %v627_v27  ;;  %v625_v44 = vpack.c.bf16 %v502_v36, %v502_v36  ;;  %v381_v37 = vpop.f32.mrf.mxu1 }
 0x21b   :  { %425 = vst.msk [vmem:[%s1001_s10 + $0x10] sm:$0xf] %vm64_vm1, %v618_v43  ;;  %v382_v46 = vadd.f32 %v894_v63, %v381_v37  ;;  %v504_v47 = vpop.f32.mrf.mxu0 }
 0x21c   :  { %548 = vst.msk [vmem:[%s1002_s11 + $0x10] sm:$0xf] %vm64_vm1, %v625_v44  ;;  %v505_v48 = vadd.f32 %v903_v2, %v504_v47 }
 0x21d   :  { %v619_v49 = vpack.c.bf16 %v382_v46, %v382_v46 }
 0x21e   :  { %v626_v50 = vpack.c.bf16 %v505_v48, %v505_v48 }
 0x21f   :  { %426 = vst.msk [vmem:[%s1001_s10 + $0x14] sm:$0xf] %vm64_vm1, %v619_v49 }
 0x220   :  { %549 = vst.msk [vmem:[%s1002_s11 + $0x14] sm:$0xf] %vm64_vm1, %v626_v50 }

// kernel: ast_forward.15
= control target key start
LH: loop header
LB: loop body
LE: loop exit
PB: predicated region body
PF: predicated region fallthrough
CT: control target
= control target key end

     0   :  { %s1442_s12 = smov 0   ;;  %s1685_s0 = inlined_call_operand.vmem [shape: bf16[2,26,32], index: 0, kind: input, shape index: {}]   ;;  %s1686_s1 = inlined_call_operand.vmem [shape: bf16[2,26,32], index: 1, kind: input, shape index: {}]   ;;  %s1687_s2 = inlined_call_operand.vmem [shape: bf16[2,26,32], index: 2, kind: input, shape index: {}]   ;;  %s1688_s3 = inlined_call_operand.vmem [shape: bf16[2,26,32], index: 3, kind: output, shape index: {}]  }
   0x1 LB: > { %s1137_s13 = sadd.s32 4294967295, %s1414_s12   ;;  %p1141_p0 = scmp.ge.s32.totalorder %s1414_s12, 1  ;;  %s1414_s12 = sphi %s1442_s12, %s13_s12  }
   0x2   : > { %p157_p1 = scmp.lt.s32.totalorder %s1414_s12, 3 }
   0x4   : > { %p158_p2 = pnand %p1141_p0, %p157_p1 }
   0x5   : > { %p191_p3 = scmp.lt.s32.totalorder (!%p158_p2), %s1137_s13, 1  ;;  %s1416_s24 = smov (!%p158_p2), 120  }
   0x6   : > { %161 = sbr.rel (%p158_p2) target bundleno = 1850 (0x73a), region = 32  ;;  %s1417_s25 = smov (!%p158_p2), 112  }
   0x7   : > { %s1418_s26 = smov (!%p158_p2), 104   ;;  %s1419_s27 = smov (!%p158_p2), 8  }
   0x8   : > { %s1420_s28 = smov (!%p158_p2), 16   ;;  %s1421_s29 = smov (!%p158_p2), 24  }
   0xb   : > { %s1690_s13 = smov (!%p191_p3, %s1137_s13), 1  ;;  %vm244_vm0 = vcmask 64512   ;;  %vm310_vm1 = vcmask 211968   ;;  %vm320_vm2 = vcmask 205824   ;;  %vm367_vm3 = vcmask 1044480  }
   0xc   : > { %s1450_s14 = sshll.u32 %s1690_s13, 4  ;;  %vm1026_vm4 = vcmask 130048   ;;  %vm1031_vm5 = vcmask 195584   ;;  %vm1052_vm6 = vcmask 257024   ;;  %vm1056_vm7 = vcmask 253952  }
   0xd   : > { %s200_s17 = scalar_lea.vmem %s1686_s1, %s1450_s14  ;;  %s195_s20 = scalar_lea.vmem %s1685_s0, %s1450_s14 }
   0xe   : > { %v1460_v0 = vld [vmem:[%s200_s17 + $0x8] sm:$0x1f]   ;;  %v1462_v1 = vld [vmem:[%s200_s17] sm:$0xff]   ;;  %s205_s23 = scalar_lea.vmem %s1687_s2, %s1450_s14  ;;  %s210_s5 = scalar_lea.vmem %s1688_s3, %s1450_s14 }
   0xf   : > { %1282 = vmatprep.subr.msk.bf16.mxu0 %vm244_vm0, %v1460_v0  ;;  %v255_v2 = vsel %vm244_vm0, %v1460_v0, 0  ;;  %v1468_v3 = vld [vmem:[%s195_s20] sm:$0xff]   ;;  %v252_v4 = vsel %vm244_vm0, %v1462_v1, 0  ;;  %v1476_v5 = vld [vmem:[%s195_s20 + $0x8] sm:$0x1f]  }
  0x10   : > { %1219 = vmatpush3.bf16.xpose.msra.mxu0 %v255_v2  ;;  %1222 = vmatprep.mubr.msk.bf16.mxu0 %vm244_vm0, %v1468_v3  ;;  %v1490_v18 = vld [vmem:[%s205_s23 + $0x8] sm:$0x1f]   ;;  %v1492_v19 = vld [vmem:[%s205_s23] sm:$0xff]  }
  0x11   : > { %1283 = vmatprep.subr.msk.bf16.mxu0 %vm244_vm0, %v1462_v1  ;;  %1284 = vmatprep.subr.msk.bf16.mxu1 %vm367_vm3, %v1490_v18  ;;  %v369_v20 = vsel %vm367_vm3, %v1490_v18, 0 }
  0x12   : > { %1227 = vmatpush3.bf16.msra.mxu1 %v369_v20 }
  0x13   : > { %1228 = vmatprep.subr.bf16.mxu1 %v1492_v19 }
  0x16   : > { %1229 = vmatpush3.bf16.msra.mxu1 %v1492_v19 }
  0x18   : > { %1221 = vmatpush3.bf16.xpose.msra.mxu0 %v252_v4 }
  0x1f   : > { %1223 = vmatmul.mubr.msk.bf16.vlgmr.msra.gmra.mxu0 %vm244_vm0, %v1476_v5 }
  0xdf   : > { %v1224_v6 = vpop.f32.mrf.mxu0 }
  0xe0   : > { %v308_v7 = vmul.f32 0.35355338, %v1224_v6 }
  0xe1   : > { %v291_v8 = vpop.f32.mrf.mxu0 }
  0xe2   : > { %v306_v9 = vmul.f32 0.35355338, %v291_v8  ;;  %v317_v10 = vsel %vm310_vm1, %v308_v7, -inf }
  0xe3   : > { %318 = vmax.xlane.f32.xlu1 %v317_v10  ;;  %v1225_v11 = vpop.f32.mrf.mxu0 }
  0xe4   : > { %v309_v12 = vmul.f32 0.35355338, %v1225_v11  ;;  %v311_v13 = vsel %vm310_vm1, %v306_v9, -inf }
  0xe5   : > { %312 = vmax.xlane.f32.xlu0 %v311_v13  ;;  %v294_v14 = vpop.f32.mrf.mxu0 }
  0xe6   : > { %v307_v15 = vmul.f32 0.35355338, %v294_v14  ;;  %v321_v16 = vsel %vm320_vm2, %v309_v12, -inf }
  0xe7   : > { %322 = vmax.xlane.f32.xlu1 %v321_v16 }
  0xe8   : > { %v314_v17 = vsel %vm310_vm1, %v307_v15, -inf }
  0xe9   : > { %315 = vmax.xlane.f32.xlu0 %v314_v17 }
  0xf8   : > { %432 = vrot.lane.b32.xlu1 %v1462_v1, %s1416_s24 }
  0xfc   : > { %428 = vrot.lane.b32.xlu1 %v1468_v3, %s1416_s24 }
  0xff   : > { %434 = vrot.lane.b32.xlu0 %v1460_v0, %s1416_s24 }
 0x100   : > { %430 = vrot.lane.b32.xlu1 %v1476_v5, %s1416_s24 }
 0x104   : > { %539 = vrot.lane.b32.xlu1 %v1492_v19, %s1416_s24 }
 0x16c   : > { %v319_v21 = vpop.xlane.xlu1 %318 }
 0x16d   : > { %v326_v24 = vsub.f32 %v308_v7, %v319_v21 }
 0x16e   : > { %v313_v22 = vpop.xlane.xlu0 %312 }
 0x16f   : > { %v324_v23 = vsub.f32 %v306_v9, %v313_v22  ;;  %v332_v31 = vmul.f32 1.442695, %v326_v24 }
 0x170   : > { %v323_v25 = vpop.xlane.xlu1 %322 }
 0x171   : > { %v328_v26 = vmul.f32 1.442695, %v324_v23  ;;  %v327_v27 = vsub.f32 %v309_v12, %v323_v25 }
 0x172   : > { %v316_v28 = vpop.xlane.xlu0 %315 }
 0x173   : > { %v334_v29 = vmul.f32 1.442695, %v327_v27  ;;  %v325_v30 = vsub.f32 %v307_v15, %v316_v28  ;;  %1344 = vpow2.f32 %v328_v26 }
 0x174   : > { %v433_v34 = vpop.permute.xlu1 %432 }
 0x175   : > { %v330_v32 = vmul.f32 1.442695, %v325_v30  ;;  %1346 = vpow2.f32 %v334_v29  ;;  %v443_v43 = vsel %vm244_vm0, %v433_v34, 0 }
 0x176   : > { %v435_v33 = vpop.permute.xlu0 %434 }
 0x177   : > { %1348 = vpow2.f32 %v330_v32  ;;  %1285 = vmatprep.subr.msk.bf16.mxu1 %vm244_vm0, %v435_v33  ;;  %v446_v40 = vsel %vm244_vm0, %v435_v33, 0 }
 0x178   : > { %1350 = vpow2.f32 %v332_v31  ;;  %v429_v42 = vpop.permute.xlu1 %428 }
 0x17c   : > { %v431_v44 = vpop.permute.xlu1 %430 }
 0x180   : > { %v1509_v35 = vpop.eup %1344  ;;  %v540_v62 = vpop.permute.xlu1 %539 }
 0x182   : > { %v1511_v36 = vpop.eup %1346 }
 0x184   : > { %v1513_v37 = vpop.eup %1348 }
 0x185   : > { %v1515_v38 = vpop.eup %1350  ;;  %v348_v39 = vpack.c.bf16 %v1513_v37, %v1509_v35 }
 0x186   : > { %v349_v41 = vpack.c.bf16 %v1511_v36, %v1515_v38 }
 0x187   : > { %1230 = vmatprep.mubr.msk.bf16.mxu1 %vm310_vm1, %v348_v39 }
 0x188   : > { %1231 = vmatmul.mubr.msk.bf16.vlgmr.msra.gmra.mxu1 %vm310_vm1, %v349_v41 }
 0x189   : > { %1235 = vmatpush3.bf16.xpose.msra.mxu1 %v446_v40  ;;  %1238 = vmatprep.mubr.msk.bf16.mxu1 %vm244_vm0, %v429_v42 }
 0x18a   : > { %1286 = vmatprep.subr.msk.bf16.mxu1 %vm244_vm0, %v433_v34 }
 0x191   : > { %1237 = vmatpush3.bf16.xpose.msra.mxu1 %v443_v43 }
 0x198   : > { %1239 = vmatmul.mubr.msk.bf16.vlgmr.msra.gmra.mxu1 %vm244_vm0, %v431_v44 }
 0x248   : > { %v1528_v45 = vpop.f32.mrf.mxu1 }
 0x24a   : > { %v1530_v46 = vpop.f32.mrf.mxu1 }
 0x24c   : > { %v1532_v47 = vpop.f32.mrf.mxu1 }
 0x24e   : > { %v1534_v48 = vpop.f32.mrf.mxu1 }
 0x258   : > { %v1240_v49 = vpop.f32.mrf.mxu1 }
 0x259   : > { %v499_v50 = vmul.f32 0.35355338, %v1240_v49 }
 0x25a   : > { %v482_v51 = vpop.f32.mrf.mxu1 }
 0x25b   : > { %v497_v52 = vmul.f32 0.35355338, %v482_v51  ;;  %v507_v53 = vsel %vm310_vm1, %v499_v50, -inf }
 0x25c   : > { %508 = vmax.xlane.f32.xlu0 %v507_v53  ;;  %v1241_v54 = vpop.f32.mrf.mxu1 }
 0x25d   : > { %v500_v56 = vmul.f32 0.35355338, %v1241_v54  ;;  %v501_v58 = vsel %vm310_vm1, %v497_v52, -inf }
 0x25e   : > { %v485_v55 = vpop.f32.mrf.mxu1 }
 0x25f   : > { %v498_v57 = vmul.f32 0.35355338, %v485_v55  ;;  %v510_v60 = vsel %vm320_vm2, %v500_v56, -inf }
 0x260   : > { %502 = vmax.xlane.f32.xlu0 %v501_v58 }
 0x261   : > { %v504_v59 = vsel %vm310_vm1, %v498_v57, -inf }
 0x262   : > { %505 = vmax.xlane.f32.xlu1 %v504_v59 }
 0x264   : > { %511 = vmax.xlane.f32.xlu0 %v510_v60 }
 0x273   : > { %616 = vrot.lane.b32.xlu1 %v1460_v0, %s1417_s25 }
 0x277   : > { %614 = vrot.lane.b32.xlu1 %v1462_v1, %s1417_s25 }
 0x27a   : > { %541 = vrot.lane.b32.xlu0 %v1490_v18, %s1416_s24 }
 0x27b   : > { %612 = vrot.lane.b32.xlu1 %v1476_v5, %s1417_s25 }
 0x27e   : > { %610 = vrot.lane.b32.xlu0 %v1468_v3, %s1417_s25 }
 0x27f   : > { %721 = vrot.lane.b32.xlu1 %v1492_v19, %s1417_s25 }
 0x2e5   : > { %v509_v61 = vpop.xlane.xlu0 %508 }
 0x2e6   : > { %v515_v63 = vsub.f32 %v499_v50, %v509_v61 }
 0x2e8   : > { %v521_v9 = vmul.f32 1.442695, %v515_v63 }
 0x2e9   : > { %v503_v2 = vpop.xlane.xlu0 %502 }
 0x2ea   : > { %v513_v4 = vsub.f32 %v497_v52, %v503_v2 }
 0x2eb   : > { %v506_v6 = vpop.xlane.xlu1 %505 }
 0x2ec   : > { %v517_v7 = vmul.f32 1.442695, %v513_v4  ;;  %v514_v8 = vsub.f32 %v498_v57, %v506_v6 }
 0x2ed   : > { %v512_v10 = vpop.xlane.xlu0 %511 }
 0x2ee   : > { %v519_v11 = vmul.f32 1.442695, %v514_v8  ;;  %v516_v12 = vsub.f32 %v500_v56, %v512_v10  ;;  %1352 = vpow2.f32 %v517_v7 }
 0x2ef   : > { %v617_v16 = vpop.permute.xlu1 %616 }
 0x2f0   : > { %1354 = vpow2.f32 %v519_v11  ;;  %v523_v13 = vmul.f32 1.442695, %v516_v12  ;;  %v628_v24 = vsel %vm244_vm0, %v617_v16, 0 }
 0x2f1   : > { %1356 = vpow2.f32 %v521_v9  ;;  %v542_v14 = vpop.permute.xlu0 %541 }
 0x2f2   : > { %1358 = vpow2.f32 %v523_v13  ;;  %v551_v15 = vsel %vm367_vm3, %v542_v14, 0  ;;  %1287 = vmatprep.subr.msk.bf16.mxu0 %vm367_vm3, %v542_v14 }
 0x2f3   : > { %1243 = vmatpush3.bf16.msra.mxu0 %v551_v15  ;;  %v615_v27 = vpop.permute.xlu1 %614 }
 0x2f4   : > { %1244 = vmatprep.subr.bf16.mxu0 %v540_v62  ;;  %v625_v28 = vsel %vm244_vm0, %v615_v27, 0 }
 0x2f5   : > { %v611_v26 = vpop.permute.xlu0 %610 }
 0x2f7   : > { %1245 = vmatpush3.bf16.msra.mxu0 %v540_v62  ;;  %v613_v29 = vpop.permute.xlu1 %612 }
 0x2f8   : > { %1288 = vmatprep.subr.msk.bf16.mxu0 %vm244_vm0, %v617_v16 }
 0x2fb   : > { %v1555_v17 = vpop.eup %1352  ;;  %v722_v55 = vpop.permute.xlu1 %721 }
 0x2fd   : > { %v1557_v20 = vpop.eup %1354 }
 0x2fe   : > { %v1559_v21 = vpop.eup %1356  ;;  %v537_v22 = vpack.c.bf16 %v1557_v20, %v1555_v17 }
 0x2ff   : > { %v1563_v23 = vpop.eup %1358 }
 0x300   : > { %1246 = vmatprep.mubr.msk.bf16.mxu0 %vm310_vm1, %v537_v22  ;;  %v538_v25 = vpack.c.bf16 %v1563_v23, %v1559_v21 }
 0x302   : > { %1247 = vmatmul.mubr.msk.bf16.vlgmr.msra.gmra.mxu0 %vm310_vm1, %v538_v25 }
 0x303   : > { %1251 = vmatpush3.bf16.xpose.msra.mxu0 %v628_v24  ;;  %1254 = vmatprep.mubr.msk.bf16.mxu0 %vm244_vm0, %v611_v26 }
 0x304   : > { %1289 = vmatprep.subr.msk.bf16.mxu0 %vm244_vm0, %v615_v27 }
 0x30b   : > { %1253 = vmatpush3.bf16.xpose.msra.mxu0 %v625_v28 }
 0x312   : > { %1255 = vmatmul.mubr.msk.bf16.vlgmr.msra.gmra.mxu0 %vm244_vm0, %v613_v29 }
 0x3c2   : > { %v1574_v30 = vpop.f32.mrf.mxu0 }
 0x3c4   : > { %v1576_v31 = vpop.f32.mrf.mxu0 }
 0x3c6   : > { %v1578_v32 = vpop.f32.mrf.mxu0 }
 0x3c8   : > { %v1580_v33 = vpop.f32.mrf.mxu0 }
 0x3d2   : > { %v1256_v34 = vpop.f32.mrf.mxu0 }
 0x3d3   : > { %v681_v39 = vmul.f32 0.35355338, %v1256_v34 }
 0x3d4   : > { %v664_v40 = vpop.f32.mrf.mxu0 }
 0x3d5   : > { %v679_v41 = vmul.f32 0.35355338, %v664_v40  ;;  %v689_v42 = vsel %vm310_vm1, %v681_v39, -inf }
 0x3d6   : > { %690 = vmax.xlane.f32.xlu0 %v689_v42  ;;  %v1257_v43 = vpop.f32.mrf.mxu0 }
 0x3d7   : > { %v682_v49 = vmul.f32 0.35355338, %v1257_v43  ;;  %v683_v51 = vsel %vm310_vm1, %v679_v41, -inf }
 0x3d8   : > { %v667_v44 = vpop.f32.mrf.mxu0 }
 0x3d9   : > { %v680_v50 = vmul.f32 0.35355338, %v667_v44  ;;  %v692_v53 = vsel %vm320_vm2, %v682_v49, -inf }
 0x3da   : > { %684 = vmax.xlane.f32.xlu0 %v683_v51  ;;  %v525_v51 = vsel %vm310_vm1, %v1555_v17, 0.0 }
 0x3db   : > { %v686_v52 = vsel %vm310_vm1, %v680_v50, -inf }
 0x3dc   : > { %687 = vmax.xlane.f32.xlu1 %v686_v52  ;;  %v528_v52 = vsel %vm310_vm1, %v1557_v20, 0.0 }
 0x3de   : > { %693 = vmax.xlane.f32.xlu0 %v692_v53  ;;  %v534_v53 = vsel %vm320_vm2, %v1563_v23, 0.0 }
 0x3ed   : > { %798 = vrot.lane.b32.xlu1 %v1460_v0, %s1418_s26 }
 0x3f1   : > { %796 = vrot.lane.b32.xlu1 %v1462_v1, %s1418_s26 }
 0x3f4   : > { %723 = vrot.lane.b32.xlu0 %v1490_v18, %s1417_s25 }
 0x3f5   : > { %794 = vrot.lane.b32.xlu1 %v1476_v5, %s1418_s26 }
 0x3f8   : > { %792 = vrot.lane.b32.xlu0 %v1468_v3, %s1418_s26 }
 0x45f   : > { %v691_v54 = vpop.xlane.xlu0 %690 }
 0x460   : > { %v697_v56 = vsub.f32 %v681_v39, %v691_v54  ;;  %v531_v54 = vsel %vm310_vm1, %v1559_v21, 0.0 }
 0x462   : > { %v703_v61 = vmul.f32 1.442695, %v697_v56 }
 0x463   : > { %v685_v57 = vpop.xlane.xlu0 %684 }
 0x464   : > { %v695_v58 = vsub.f32 %v679_v41, %v685_v57 }
 0x465   : > { %v688_v59 = vpop.xlane.xlu1 %687 }
 0x466   : > { %v699_v60 = vmul.f32 1.442695, %v695_v58  ;;  %v696_v0 = vsub.f32 %v680_v50, %v688_v59 }
 0x467   : > { %v694_v62 = vpop.xlane.xlu0 %693 }
 0x468   : > { %v701_v1 = vmul.f32 1.442695, %v696_v0  ;;  %v698_v63 = vsub.f32 %v682_v49, %v694_v62  ;;  %1360 = vpow2.f32 %v699_v60 }
 0x469   : > { %v799_v4 = vpop.permute.xlu1 %798 }
 0x46a   : > { %1362 = vpow2.f32 %v701_v1  ;;  %v705_v2 = vmul.f32 1.442695, %v698_v63  ;;  %v810_v11 = vsel %vm244_vm0, %v799_v4, 0 }
 0x46b   : > { %1364 = vpow2.f32 %v703_v61  ;;  %v724_v5 = vpop.permute.xlu0 %723 }
 0x46c   : > { %1366 = vpow2.f32 %v705_v2  ;;  %v733_v3 = vsel %vm367_vm3, %v724_v5, 0  ;;  %1290 = vmatprep.subr.msk.bf16.mxu1 %vm367_vm3, %v724_v5 }
 0x46d   : > { %1259 = vmatpush3.bf16.msra.mxu1 %v733_v3  ;;  %v797_v14 = vpop.permute.xlu1 %796 }
 0x46e   : > { %1260 = vmatprep.subr.bf16.mxu1 %v722_v55  ;;  %v807_v15 = vsel %vm244_vm0, %v797_v14, 0 }
 0x46f   : > { %v793_v13 = vpop.permute.xlu0 %792 }
 0x471   : > { %1261 = vmatpush3.bf16.msra.mxu1 %v722_v55  ;;  %v795_v16 = vpop.permute.xlu1 %794 }
 0x472   : > { %1291 = vmatprep.subr.msk.bf16.mxu1 %vm244_vm0, %v799_v4 }
 0x475   : > { %v1361_v6 = vpop.eup %1360 }
 0x477   : > { %v1363_v7 = vpop.eup %1362 }
 0x478   : > { %v1365_v8 = vpop.eup %1364  ;;  %v719_v9 = vpack.c.bf16 %v1363_v7, %v1361_v6 }
 0x479   : > { %v1367_v10 = vpop.eup %1366  ;;  %v713_v20 = vsel %vm310_vm1, %v1365_v8, 0.0 }
 0x47a   : > { %1262 = vmatprep.mubr.msk.bf16.mxu1 %vm310_vm1, %v719_v9  ;;  %v720_v12 = vpack.c.bf16 %v1367_v10, %v1365_v8  ;;  %v716_v17 = vsel %vm320_vm2, %v1367_v10, 0.0 }
 0x47c   : > { %1263 = vmatmul.mubr.msk.bf16.vlgmr.msra.gmra.mxu1 %vm310_vm1, %v720_v12 }
 0x47d   : > { %1267 = vmatpush3.bf16.xpose.msra.mxu1 %v810_v11  ;;  %1270 = vmatprep.mubr.msk.bf16.mxu1 %vm244_vm0, %v793_v13 }
 0x47e   : > { %1292 = vmatprep.subr.msk.bf16.mxu1 %vm244_vm0, %v797_v14  ;;  %v336_v14 = vsel %vm310_vm1, %v1509_v35, 0.0 }
 0x485   : > { %1269 = vmatpush3.bf16.xpose.msra.mxu1 %v807_v15  ;;  %v339_v15 = vsel %vm310_vm1, %v1513_v37, 0.0 }
 0x48c   : > { %1271 = vmatmul.mubr.msk.bf16.vlgmr.msra.gmra.mxu1 %vm244_vm0, %v795_v16  ;;  %v342_v16 = vsel %vm310_vm1, %v1515_v38, 0.0 }
 0x53c   : > { %v1606_v22 = vpop.f32.mrf.mxu1 }
 0x53e   : > { %v1608_v24 = vpop.f32.mrf.mxu1 }
 0x540   : > { %v1610_v25 = vpop.f32.mrf.mxu1 }
 0x542   : > { %v1612_v26 = vpop.f32.mrf.mxu1 }
 0x54c   : > { %v1272_v27 = vpop.f32.mrf.mxu1 }
 0x54d   : > { %v863_v28 = vmul.f32 0.35355338, %v1272_v27  ;;  %v345_v27 = vsel %vm320_vm2, %v1511_v36, 0.0 }
 0x54e   : > { %v846_v29 = vpop.f32.mrf.mxu1 }
 0x54f   : > { %v861_v34 = vmul.f32 0.35355338, %v846_v29  ;;  %v871_v39 = vsel %vm310_vm1, %v863_v28, -inf }
 0x550   : > { %872 = vmax.xlane.f32.xlu0 %v871_v39  ;;  %v1273_v40 = vpop.f32.mrf.mxu1 }
 0x551   : > { %v864_v42 = vmul.f32 0.35355338, %v1273_v40  ;;  %v865_v44 = vsel %vm310_vm1, %v861_v34, -inf }
 0x552   : > { %v849_v41 = vpop.f32.mrf.mxu1 }
 0x553   : > { %v862_v43 = vmul.f32 0.35355338, %v849_v41  ;;  %v874_v50 = vsel %vm320_vm2, %v864_v42, -inf }
 0x554   : > { %866 = vmax.xlane.f32.xlu0 %v865_v44 }
 0x555   : > { %v868_v49 = vsel %vm310_vm1, %v862_v43, -inf }
 0x556   : > { %869 = vmax.xlane.f32.xlu1 %v868_v49 }
 0x558   : > { %875 = vmax.xlane.f32.xlu0 %v874_v50 }
 0x567   : > { %903 = vrot.lane.b32.xlu1 %v1492_v19, %s1418_s26  ;;  %v710_v19 = vsel %vm310_vm1, %v1363_v7, 0.0 }
 0x56e   : > { %905 = vrot.lane.b32.xlu0 %v1490_v18, %s1418_s26  ;;  %v707_v18 = vsel %vm310_vm1, %v1361_v6, 0.0 }
 0x58b   : > { %526 = vadd.xlane.f32.xlu1 %v525_v51 }
 0x58d   : > { %529 = vadd.xlane.f32.xlu0 %v528_v52 }
 0x58f   : > { %535 = vadd.xlane.f32.xlu1 %v534_v53 }
 0x591   : > { %532 = vadd.xlane.f32.xlu0 %v531_v54 }
 0x593   : > { %711 = vadd.xlane.f32.xlu1 %v710_v19 }
 0x595   : > { %708 = vadd.xlane.f32.xlu0 %v707_v18 }
 0x597   : > { %717 = vadd.xlane.f32.xlu1 %v716_v17 }
 0x599   : > { %714 = vadd.xlane.f32.xlu0 %v713_v20 }
 0x5d9   : > { %v873_v55 = vpop.xlane.xlu0 %872 }
 0x5da   : > { %v879_v56 = vsub.f32 %v863_v28, %v873_v55 }
 0x5dc   : > { %v885_v58 = vmul.f32 1.442695, %v879_v56 }
 0x5dd   : > { %v867_v23 = vpop.xlane.xlu0 %866 }
 0x5de   : > { %v877_v57 = vsub.f32 %v861_v34, %v867_v23 }
 0x5df   : > { %v870_v59 = vpop.xlane.xlu1 %869 }
 0x5e0   : > { %v881_v21 = vmul.f32 1.442695, %v877_v57  ;;  %v878_v60 = vsub.f32 %v862_v43, %v870_v59 }
 0x5e1   : > { %v876_v0 = vpop.xlane.xlu0 %875 }
 0x5e2   : > { %1368 = vpow2.f32 %v881_v21  ;;  %v883_v61 = vmul.f32 1.442695, %v878_v60  ;;  %v880_v62 = vsub.f32 %v864_v42, %v876_v0 }
 0x5e3   : > { %1370 = vpow2.f32 %v885_v58  ;;  %v904_v2 = vpop.permute.xlu1 %903 }
 0x5e4   : > { %1372 = vpow2.f32 %v883_v61  ;;  %v887_v1 = vmul.f32 1.442695, %v880_v62 }
 0x5e5   : > { %v906_v63 = vpop.permute.xlu0 %905 }
 0x5e6   : > { %1374 = vpow2.f32 %v887_v1  ;;  %v915_v5 = vsel %vm367_vm3, %v906_v63, 0  ;;  %1293 = vmatprep.subr.msk.bf16.mxu0 %vm367_vm3, %v906_v63 }
 0x5e7   : > { %1275 = vmatpush3.bf16.msra.mxu0 %v915_v5 }
 0x5e8   : > { %1276 = vmatprep.subr.bf16.mxu0 %v904_v2 }
 0x5eb   : > { %1277 = vmatpush3.bf16.msra.mxu0 %v904_v2 }
 0x5ef   : > { %v1369_v3 = vpop.eup %1368 }
 0x5f0   : > { %v1371_v4 = vpop.eup %1370  ;;  %v889_v6 = vsel %vm310_vm1, %v1369_v3, 0.0 }
 0x5f1   : > { %v1373_v7 = vpop.eup %1372  ;;  %890 = vadd.xlane.f32.xlu0 %v889_v6  ;;  %v895_v11 = vsel %vm310_vm1, %v1371_v4, 0.0 }
 0x5f2   : > { %v892_v8 = vsel %vm310_vm1, %v1373_v7, 0.0  ;;  %v901_v9 = vpack.c.bf16 %v1373_v7, %v1369_v3 }
 0x5f3   : > { %v1375_v10 = vpop.eup %1374  ;;  %893 = vadd.xlane.f32.xlu1 %v892_v8 }
 0x5f4   : > { %1278 = vmatprep.mubr.msk.bf16.mxu0 %vm310_vm1, %v901_v9  ;;  %v902_v12 = vpack.c.bf16 %v1375_v10, %v1371_v4  ;;  %v898_v13 = vsel %vm320_vm2, %v1375_v10, 0.0 }
 0x5f5   : > { %896 = vadd.xlane.f32.xlu0 %v895_v11 }
 0x5f6   : > { %1279 = vmatmul.mubr.msk.bf16.vlgmr.msra.gmra.mxu0 %vm310_vm1, %v902_v12 }
 0x5f7   : > { %899 = vadd.xlane.f32.xlu1 %v898_v13 }
 0x5f9   : > { %337 = vadd.xlane.f32.xlu0 %v336_v14 }
 0x5fb   : > { %340 = vadd.xlane.f32.xlu1 %v339_v15 }
 0x5fd   : > { %343 = vadd.xlane.f32.xlu0 %v342_v16 }
 0x5ff   : > { %346 = vadd.xlane.f32.xlu1 %v345_v27 }
 0x614   : > { %v527_v28 = vpop.xlane.xlu1 %526 }
 0x615   : > { %1376 = vrcp.f32 %v527_v28 }
 0x616   : > { %v530_v29 = vpop.xlane.xlu0 %529 }
 0x617   : > { %1378 = vrcp.f32 %v530_v29 }
 0x618   : > { %v536_v34 = vpop.xlane.xlu1 %535 }
 0x619   : > { %1380 = vrcp.f32 %v536_v34 }
 0x61a   : > { %v533_v35 = vpop.xlane.xlu0 %532 }
 0x61b   : > { %1382 = vrcp.f32 %v533_v35 }
 0x61c   : > { %v712_v39 = vpop.xlane.xlu1 %711 }
 0x61d   : > { %1384 = vrcp.f32 %v712_v39 }
 0x61e   : > { %v709_v37 = vpop.xlane.xlu0 %708 }
 0x61f   : > { %1386 = vrcp.f32 %v709_v37 }
 0x620   : > { %v718_v40 = vpop.xlane.xlu1 %717 }
 0x621   : > { %1388 = vrcp.f32 %v718_v40 }
 0x622   : > { %v1377_v38 = vpop.eup %1376  ;;  %v715_v41 = vpop.xlane.xlu0 %714 }
 0x623   : > { %1390 = vrcp.f32 %v715_v41  ;;  %v606_v36 = vmul.f32 %v1377_v38, %v1576_v31 }
 0x624   : > { %v1379_v42 = vpop.eup %1378 }
 0x625   : > { %v607_v43 = vmul.f32 %v1379_v42, %v1580_v33 }
 0x626   : > { %v1381_v44 = vpop.eup %1380 }
 0x627   : > { %v1308_v49 = vpack.i.bf16 %v607_v43, %v606_v36  ;;  %v609_v52 = vmul.f32 %v1381_v44, %v1578_v32 }
 0x628   : > { %v1383_v50 = vpop.eup %1382 }
 0x629   : > { %1309 = vrot.lane.b32.xlu0 %v1308_v49, %s1419_s27  ;;  %v608_v51 = vmul.f32 %v1383_v50, %v1574_v30 }
 0x62a   : > { %v1385_v53 = vpop.eup %1384 }
 0x62b   : > { %v1313_v54 = vpack.i.bf16 %v609_v52, %v608_v51  ;;  %v789_v17 = vmul.f32 %v1385_v53, %v1612_v26 }
 0x62c   : > { %v1387_v19 = vpop.eup %1386 }
 0x62d   : > { %1314 = vrot.lane.b32.xlu1 %v1313_v54, %s1419_s27  ;;  %v788_v18 = vmul.f32 %v1387_v19, %v1608_v24 }
 0x62e   : > { %v1389_v31 = vpop.eup %1388 }
 0x62f   : > { %v1318_v20 = vpack.i.bf16 %v789_v17, %v788_v18  ;;  %v791_v56 = vmul.f32 %v1389_v31, %v1610_v25 }
 0x630   : > { %v1391_v33 = vpop.eup %1390 }
 0x631   : > { %1319 = vrot.lane.b32.xlu1 %v1318_v20, %s1420_s28  ;;  %v790_v55 = vmul.f32 %v1391_v33, %v1606_v22 }
 0x633   : > { %v1323_v30 = vpack.i.bf16 %v791_v56, %v790_v55 }
 0x635   : > { %1324 = vrot.lane.b32.xlu1 %v1323_v30, %s1420_s28 }
 0x67a   : > { %v891_v32 = vpop.xlane.xlu0 %890 }
 0x67c   : > { %v894_v23 = vpop.xlane.xlu1 %893 }
 0x67e   : > { %v897_v57 = vpop.xlane.xlu0 %896 }
 0x67f   : > { %1392 = vrcp.f32 %v897_v57 }
 0x680   : > { %v900_v58 = vpop.xlane.xlu1 %899 }
 0x681   : > { %1394 = vrcp.f32 %v900_v58 }
 0x682   : > { %1396 = vrcp.f32 %v891_v32  ;;  %v338_v3 = vpop.xlane.xlu0 %337 }
 0x683   : > { %1398 = vrcp.f32 %v894_v23 }
 0x684   : > { %v341_v4 = vpop.xlane.xlu1 %340  ;;  %1400 = vrcp.f32 %v338_v3 }
 0x686   : > { %v344_v6 = vpop.xlane.xlu0 %343 }
 0x687   : > { %1402 = vrcp.f32 %v344_v6 }
 0x688   : > { %v347_v7 = vpop.xlane.xlu1 %346 }
 0x689   : > { %1404 = vrcp.f32 %v347_v7 }
 0x68a   : > { %1406 = vrcp.f32 %v341_v4 }
 0x68c   : > { %v1393_v59 = vpop.eup %1392 }
 0x68e   : > { %v1395_v21 = vpop.eup %1394 }
 0x68f   : > { %v1397_v0 = vpop.eup %1396 }
 0x690   : > { %v1399_v62 = vpop.eup %1398 }
 0x691   : > { %v1401_v10 = vpop.eup %1400 }
 0x692   : > { %v424_v40 = vmul.f32 %v1401_v10, %v1530_v46 }
 0x694   : > { %v1403_v11 = vpop.eup %1402 }
 0x695   : > { %v426_v39 = vmul.f32 %v1403_v11, %v1528_v45 }
 0x696   : > { %v1405_v14 = vpop.eup %1404 }
 0x697   : > { %v1407_v15 = vpop.eup %1406  ;;  %v427_v37 = vmul.f32 %v1405_v14, %v1532_v47 }
 0x698   : > { %v425_v38 = vmul.f32 %v1407_v15, %v1534_v48 }
 0x69b   : > { %v1310_v12 = vpop.permute.xlu0 %1309 }
 0x69c   : > { %v1312_v28 = vunpack.i.h.bf16 %v1310_v12  ;;  %v1311_v29 = vunpack.i.l.bf16 %v1310_v12 }
 0x69e   : > { %v1022_v45 = vsel %vm244_vm0, %v424_v40, %v1311_v29  ;;  %v1023_v47 = vsel %vm244_vm0, %v425_v38, %v1312_v28 }
 0x69f   : > { %v1315_v8 = vpop.permute.xlu1 %1314 }
 0x6a0   : > { %v1317_v16 = vunpack.i.h.bf16 %v1315_v8  ;;  %v1316_v27 = vunpack.i.l.bf16 %v1315_v8 }
 0x6a2   : > { %v1025_v43 = vsel %vm244_vm0, %v427_v37, %v1317_v16  ;;  %v1024_v44 = vsel %vm244_vm0, %v426_v39, %v1316_v27 }
 0x6a3   : > { %v1320_v9 = vpop.permute.xlu1 %1319 }
 0x6a4   : > { %v1322_v41 = vunpack.i.h.bf16 %v1320_v9  ;;  %v1321_v42 = vunpack.i.l.bf16 %v1320_v9 }
 0x6a6   : > { %v1028_v18 = vsel %vm1026_vm4, %v1023_v47, %v1322_v41  ;;  %v1027_v17 = vsel %vm1026_vm4, %v1022_v45, %v1321_v42 }
 0x6a7   : > { %v1325_v13 = vpop.permute.xlu1 %1324 }
 0x6a8   : > { %v1327_v34 = vunpack.i.h.bf16 %v1325_v13  ;;  %v1326_v35 = vunpack.i.l.bf16 %v1325_v13 }
 0x6aa   : > { %v1029_v51 = vsel %vm1026_vm4, %v1024_v44, %v1326_v35  ;;  %v1030_v52 = vsel %vm1026_vm4, %v1025_v43, %v1327_v34 }
 0x6b6   : > { %v1280_v24 = vpop.f32.mrf.mxu0 }
 0x6b7   : > { %v972_v61 = vmul.f32 %v1393_v59, %v1280_v24 }
 0x6b8   : > { %v951_v26 = vpop.f32.mrf.mxu0 }
 0x6b9   : > { %v970_v1 = vmul.f32 %v1397_v0, %v951_v26 }
 0x6ba   : > { %v1281_v60 = vpop.f32.mrf.mxu0 }
 0x6bb   : > { %v973_v22 = vmul.f32 %v1395_v21, %v1281_v60 }
 0x6bc   : > { %v954_v25 = vpop.f32.mrf.mxu0 }
 0x6bd   : > { %v1333_v63 = vpack.i.bf16 %v973_v22, %v972_v61  ;;  %v971_v2 = vmul.f32 %v1399_v62, %v954_v25 }
 0x6bf   : > { %v1328_v5 = vpack.i.bf16 %v971_v2, %v970_v1  ;;  %1334 = vrot.lane.b32.xlu1 %v1333_v63, %s1421_s29 }
 0x6c1   : > { %1329 = vrot.lane.b32.xlu0 %v1328_v5, %s1421_s29 }
 0x731   : > { %v1335_v36 = vpop.permute.xlu1 %1334 }
 0x732   : > { %v1337_v49 = vunpack.i.h.bf16 %v1335_v36  ;;  %v1336_v50 = vunpack.i.l.bf16 %v1335_v36 }
 0x733   : > { %v1330_v46 = vpop.permute.xlu0 %1329 }
 0x734   : > { %v1034_v48 = vsel %vm1031_vm5, %v1029_v51, %v1336_v50  ;;  %v1035_v53 = vsel %vm1031_vm5, %v1030_v52, %v1337_v49  ;;  %v1332_v54 = vunpack.i.h.bf16 %v1330_v46  ;;  %v1331_v19 = vunpack.i.l.bf16 %v1330_v46 }
 0x735   : > { %v1184_v31 = vpack.c.bf16 %v1034_v48, %v1034_v48  ;;  %v1185_v20 = vpack.c.bf16 %v1035_v53, %v1035_v53 }
 0x736   : > { %v1032_v33 = vsel %vm1031_vm5, %v1027_v17, %v1331_v19  ;;  %v1033_v55 = vsel %vm1031_vm5, %v1028_v18, %v1332_v54 }
 0x737   : > { %1055 = vst.msk [vmem:[%s210_s5 + $0x8] sm:$0xf] %vm1052_vm6, %v1184_v31  ;;  %v1182_v56 = vpack.c.bf16 %v1032_v33, %v1032_v33  ;;  %v1183_v30 = vpack.c.bf16 %v1033_v55, %v1033_v55 }
 0x738   : > { %1057 = vst.msk [vmem:[%s210_s5 + $0xc] sm:$0x1] %vm1056_vm7, %v1185_v20 }
 0x739   : > { %1053 = vst.msk [vmem:[%s210_s5] sm:$0xf] %vm1052_vm6, %v1182_v56  ;;  %1054 = vst.msk [vmem:[%s210_s5 + $0x4] sm:$0xf] %vm1052_vm6, %v1183_v30 }
 0x73a PF: > { %s13_s12 = sadd.s32 1, %s1414_s12  }
 0x73b   : > { %p10_p4 = scmp.ge.s32.totalorder %s13_s12, 4  }
 0x73d   :  { %12 = sbr.rel (!%p10_p4) target bundleno = 1 (0x1), region = 68 }

// kernel: ast_forward.17
= control target key start
LH: loop header
LB: loop body
LE: loop exit
PB: predicated region body
PF: predicated region fallthrough
CT: control target
= control target key end

     0   :  { %vm30_vm0 = vcmask 261120   ;;  %vm49_vm1 = vcmask 257024   ;;  %vm477_vm4 = vcmask 254976   ;;  %s836_s0 = inlined_call_operand.vmem [shape: f32[52,32], index: 0, kind: input, shape index: {}]   ;;  %s837_s3 = inlined_call_operand.vmem [shape: bf16[32,32], index: 3, kind: input, shape index: {}]   ;;  %s838_s1 = inlined_call_operand.vmem [shape: f32[1,32], index: 1, kind: input, shape index: {}]   ;;  %s839_s2 = inlined_call_operand.vmem [shape: f32[1,32], index: 2, kind: input, shape index: {}]   ;;  %s840_s4 = inlined_call_operand.vmem [shape: f32[1,32], index: 4, kind: input, shape index: {}]   ;;  %s841_s5 = inlined_call_operand.vmem [shape: bf16[52,32], index: 5, kind: output, shape index: {}]  }
   0x1   :  { %v21_v0 = vld [vmem:[%s836_s0] sm:$0xff]  ;;  %v22_v2 = vld [vmem:[%s836_s0 + $0x8] sm:$0xff]  ;;  %v23_v8 = vld [vmem:[%s836_s0 + $0x10] sm:$0xff] }
   0x2   :  { %v25_v1 = vld [vmem:[%s836_s0 + $0x20] sm:$0xff]  ;;  %v31_v3 = vsel %vm30_vm0, %v21_v0, 0.0  ;;  %v26_v5 = vld [vmem:[%s836_s0 + $0x28] sm:$0xff]  ;;  %v34_v6 = vsel %vm30_vm0, %v22_v2, 0.0  ;;  %v24_v9 = vld [vmem:[%s836_s0 + $0x18] sm:$0xff]  ;;  %v37_v10 = vsel %vm30_vm0, %v23_v8, 0.0 }
   0x3   :  { %v43_v4 = vsel %vm30_vm0, %v25_v1, 0.0  ;;  %32 = vadd.xlane.f32.xlu0 %v31_v3  ;;  %v46_v7 = vsel %vm30_vm0, %v26_v5, 0.0  ;;  %v40_v11 = vsel %vm30_vm0, %v24_v9, 0.0  ;;  %v27_v12 = vld [vmem:[%s836_s0 + $0x30] sm:$0xf]  ;;  %v528_v49 = vld [vmem:[%s837_s3 + $0x8] sm:$0xff]  }
   0x4   :  { %44 = vadd.xlane.f32.xlu1 %v43_v4  ;;  %v50_v13 = vsel %vm49_vm1, %v27_v12, 0.0  ;;  %512 = vmatprep.subr.bf16.mxu0 %v528_v49  ;;  %v529_v50 = vld [vmem:[%s837_s3] sm:$0xff]  }
   0x5   :  { %524 = vmatprep.subr.bf16.mxu1 %v528_v49  ;;  %513 = vmatpush3.bf16.msra.mxu0 %v528_v49 }
   0x6   :  { %526 = vmatpush3.bf16.msra.mxu1 %v528_v49  ;;  %514 = vmatprep.subr.bf16.mxu0 %v529_v50 }
   0x7   :  { %35 = vadd.xlane.f32.xlu0 %v34_v6  ;;  %525 = vmatprep.subr.bf16.mxu1 %v529_v50 }
   0x8   :  { %47 = vadd.xlane.f32.xlu1 %v46_v7 }
   0x9   :  { %515 = vmatpush3.bf16.msra.mxu0 %v529_v50 }
   0xa   :  { %527 = vmatpush3.bf16.msra.mxu1 %v529_v50 }
   0xb   :  { %38 = vadd.xlane.f32.xlu0 %v37_v10  ;;  %v483_v10 = vld [vmem:[%s838_s1] ss:$0 sm:$0xff] }
   0xc   :  { %41 = vadd.xlane.f32.xlu1 %v40_v11 }
   0xf   :  { %51 = vadd.xlane.f32.xlu0 %v50_v13 }
  0x8c   :  { %v33_v14 = vpop.xlane.xlu0 %32 }
  0x8d   :  { %v45_v15 = vpop.xlane.xlu1 %44  ;;  %v54_v16 = vmul.f32 0.03125, %v33_v14  ;;  %v484_v14 = vld [vmem:[%s839_s2] ss:$0 sm:$0xff] }
  0x8e   :  { %v58_v17 = vmul.f32 0.03125, %v45_v15 }
  0x8f   :  { %v630_v18 = vsub.f32 %v21_v0, %v54_v16 }
  0x90   :  { %v632_v19 = vsub.f32 %v25_v1, %v58_v17  ;;  %v36_v20 = vpop.xlane.xlu0 %35 }
  0x91   :  { %v48_v21 = vpop.xlane.xlu1 %47  ;;  %v55_v22 = vmul.f32 0.03125, %v36_v20  ;;  %v68_v24 = vmul.f32 %v630_v18, %v630_v18 }
  0x92   :  { %v59_v23 = vmul.f32 0.03125, %v48_v21  ;;  %v72_v25 = vmul.f32 %v632_v19, %v632_v19 }
  0x93   :  { %v638_v26 = vsub.f32 %v22_v2, %v55_v22  ;;  %v75_v28 = vsel %vm30_vm0, %v68_v24, 0.0 }
  0x94   :  { %v640_v27 = vsub.f32 %v26_v5, %v59_v23  ;;  %76 = vadd.xlane.f32.xlu1 %v75_v28  ;;  %v39_v29 = vpop.xlane.xlu0 %38  ;;  %v87_v31 = vsel %vm30_vm0, %v72_v25, 0.0 }
  0x95   :  { %v42_v30 = vpop.xlane.xlu1 %41  ;;  %v56_v32 = vmul.f32 0.03125, %v39_v29  ;;  %v69_v34 = vmul.f32 %v638_v26, %v638_v26 }
  0x96   :  { %v57_v33 = vmul.f32 0.03125, %v42_v30  ;;  %v73_v35 = vmul.f32 %v640_v27, %v640_v27 }
  0x97   :  { %v648_v36 = vsub.f32 %v23_v8, %v56_v32  ;;  %v78_v38 = vsel %vm30_vm0, %v69_v34, 0.0 }
  0x98   :  { %v650_v37 = vsub.f32 %v24_v9, %v57_v33  ;;  %88 = vadd.xlane.f32.xlu1 %v87_v31  ;;  %79 = vadd.xlane.f32.xlu0 %v78_v38  ;;  %v52_v39 = vpop.xlane.xlu0 %51  ;;  %v90_v41 = vsel %vm30_vm0, %v73_v35, 0.0 }
  0x99   :  { %v60_v40 = vmul.f32 0.03125, %v52_v39  ;;  %v70_v42 = vmul.f32 %v648_v36, %v648_v36 }
  0x9a   :  { %v71_v43 = vmul.f32 %v650_v37, %v650_v37 }
  0x9b   :  { %v658_v44 = vsub.f32 %v27_v12, %v60_v40  ;;  %v81_v45 = vsel %vm30_vm0, %v70_v42, 0.0 }
  0x9c   :  { %91 = vadd.xlane.f32.xlu0 %v90_v41  ;;  %82 = vadd.xlane.f32.xlu1 %v81_v45  ;;  %v84_v46 = vsel %vm30_vm0, %v71_v43, 0.0  ;;  %v485_v43 = vld [vmem:[%s840_s4] ss:$0 sm:$0xff] }
  0x9d   :  { %v74_v47 = vmul.f32 %v658_v44, %v658_v44 }
  0x9f   :  { %v93_v48 = vsel %vm49_vm1, %v74_v47, 0.0 }
  0xa0   :  { %85 = vadd.xlane.f32.xlu0 %v84_v46  ;;  %94 = vadd.xlane.f32.xlu1 %v93_v48 }
 0x11d   :  { %v77_v51 = vpop.xlane.xlu1 %76 }
 0x11e   :  { %v96_v52 = vmul.f32 0.03125, %v77_v51 }
 0x120   :  { %v103_v53 = vadd.f32 1e-05, %v96_v52 }
 0x121   :  { %v89_v54 = vpop.xlane.xlu1 %88  ;;  %v80_v55 = vpop.xlane.xlu0 %79 }
 0x122   :  { %530 = vrsqrt.f32 %v103_v53  ;;  %v100_v56 = vmul.f32 0.03125, %v89_v54  ;;  %v97_v57 = vmul.f32 0.03125, %v80_v55 }
 0x124   :  { %v107_v58 = vadd.f32 1e-05, %v100_v56  ;;  %v104_v59 = vadd.f32 1e-05, %v97_v57 }
 0x125   :  { %v83_v60 = vpop.xlane.xlu1 %82  ;;  %v92_v61 = vpop.xlane.xlu0 %91 }
 0x126   :  { %532 = vrsqrt.f32 %v107_v58  ;;  %v98_v62 = vmul.f32 0.03125, %v83_v60  ;;  %v101_v63 = vmul.f32 0.03125, %v92_v61 }
 0x127   :  { %534 = vrsqrt.f32 %v104_v59 }
 0x128   :  { %v105_v0 = vadd.f32 1e-05, %v98_v62  ;;  %v108_v1 = vadd.f32 1e-05, %v101_v63 }
 0x129   :  { %v95_v2 = vpop.xlane.xlu1 %94  ;;  %v86_v3 = vpop.xlane.xlu0 %85 }
 0x12a   :  { %536 = vrsqrt.f32 %v105_v0  ;;  %v102_v4 = vmul.f32 0.03125, %v95_v2  ;;  %v99_v5 = vmul.f32 0.03125, %v86_v3 }
 0x12b   :  { %538 = vrsqrt.f32 %v108_v1 }
 0x12c   :  { %v109_v6 = vadd.f32 1e-05, %v102_v4  ;;  %v106_v7 = vadd.f32 1e-05, %v99_v5 }
 0x12e   :  { %540 = vrsqrt.f32 %v109_v6 }
 0x12f   :  { %v531_v8 = vpop.eup %530  ;;  %542 = vrsqrt.f32 %v106_v7 }
 0x130   :  { %v117_v9 = vmul.f32 %v531_v8, %v630_v18 }
 0x132   :  { %v130_v13 = vmul.f32 %v483_v10, %v117_v9 }
 0x133   :  { %v533_v11 = vpop.eup %532 }
 0x134   :  { %v535_v12 = vpop.eup %534  ;;  %v121_v16 = vmul.f32 %v533_v11, %v632_v19  ;;  %v143_v22 = vadd.f32 %v484_v14, %v130_v13 }
 0x135   :  { %v118_v15 = vmul.f32 %v535_v12, %v638_v26 }
 0x136   :  { %v134_v24 = vmul.f32 %v483_v10, %v121_v16 }
 0x137   :  { %v537_v17 = vpop.eup %536  ;;  %v131_v20 = vmul.f32 %v483_v10, %v118_v15 }
 0x138   :  { %v539_v21 = vpop.eup %538  ;;  %v119_v25 = vmul.f32 %v537_v17, %v648_v36  ;;  %v147_v26 = vadd.f32 %v484_v14, %v134_v24 }
 0x139   :  { %v144_v18 = vadd.f32 %v484_v14, %v131_v20  ;;  %v122_v23 = vmul.f32 %v539_v21, %v640_v27 }
 0x13a   :  { %v132_v34 = vmul.f32 %v483_v10, %v119_v25 }
 0x13b   :  { %v541_v28 = vpop.eup %540  ;;  %v150_v29 = vpack.c.bf16 %v144_v18, %v143_v22  ;;  %v135_v30 = vmul.f32 %v483_v10, %v122_v23 }
 0x13c   :  { %v543_v31 = vpop.eup %542  ;;  %v123_v32 = vmul.f32 %v541_v28, %v658_v44  ;;  %v145_v36 = vadd.f32 %v484_v14, %v132_v34 }
 0x13d   :  { %516 = vmatprep.mubr.msk.bf16.mxu0 %vm30_vm0, %v150_v29  ;;  %v148_v19 = vadd.f32 %v484_v14, %v135_v30  ;;  %v120_v33 = vmul.f32 %v543_v31, %v650_v37 }
 0x13e   :  { %v136_v35 = vmul.f32 %v483_v10, %v123_v32 }
 0x13f   :  { %v152_v38 = vpack.c.bf16 %v148_v19, %v147_v26  ;;  %v133_v39 = vmul.f32 %v483_v10, %v120_v33 }
 0x140   :  { %v149_v27 = vadd.f32 %v484_v14, %v136_v35 }
 0x141   :  { %520 = vmatprep.mubr.msk.bf16.mxu1 %vm30_vm0, %v152_v38  ;;  %v146_v40 = vadd.f32 %v484_v14, %v133_v39 }
 0x142   :  { %v153_v41 = vpack.c.bf16 %v149_v27, %v149_v27 }
 0x143   :  { %v151_v42 = vpack.c.bf16 %v146_v40, %v145_v36 }
 0x144   :  { %521 = vmatmul.mubr.msk.bf16.vlgmr.msra.gmra.mxu1 %vm30_vm0, %v153_v41 }
 0x145   :  { %517 = vmatmul.mubr.msk.bf16.vlgmr.msra.gmra.mxu0 %vm30_vm0, %v151_v42 }
 0x204   :  { %v522_v37 = vpop.f32.mrf.mxu1 }
 0x205   :  { %v518_v44 = vpop.f32.mrf.mxu0  ;;  %v691_v45 = vadd.f32 %v522_v37, %v485_v43 }
 0x206   :  { %v693_v46 = vadd.f32 %v518_v44, %v485_v43  ;;  %v239_v47 = vpop.f32.mrf.mxu1 }
 0x207   :  { %v696_v48 = vmul.f32 0.70710677, %v691_v45  ;;  %v223_v49 = vpop.f32.mrf.mxu0  ;;  %v698_v50 = vadd.f32 %v485_v43, %v239_v47 }
 0x208   :  { %v701_v51 = vmul.f32 0.70710677, %v693_v46  ;;  %v703_v52 = vadd.f32 %v485_v43, %v223_v49  ;;  %v523_v53 = vpop.f32.mrf.mxu1 }
 0x209   :  { %v273_v54 = vand.u32 2147483647, %v696_v48  ;;  %v707_v55 = vmul.f32 0.70710677, %v698_v50  ;;  %v519_v58 = vpop.f32.mrf.mxu0  ;;  %vm413_vm2 = vcmp.lt.f32.partialorder %v696_v48, 0.0 }
 0x20a   :  { %v269_v56 = vand.u32 2147483647, %v701_v51  ;;  %v711_v57 = vmul.f32 0.70710677, %v703_v52  ;;  %v242_v4 = vpop.f32.mrf.mxu1  ;;  %v715_v7 = vadd.f32 %v519_v58, %v485_v43  ;;  %vm409_vm3 = vcmp.lt.f32.partialorder %v701_v51, 0.0 }
 0x20b   :  { %v280_v59 = vmul.f32 0.3275911, %v273_v54  ;;  %v271_v60 = vand.u32 2147483647, %v707_v55  ;;  %v226_v3 = vpop.f32.mrf.mxu0  ;;  %v719_v9 = vadd.f32 %v485_v43, %v242_v4  ;;  %v371_v13 = vmul.f32 %v273_v54, %v273_v54 }
 0x20c   :  { %v276_v61 = vmul.f32 0.3275911, %v269_v56  ;;  %v267_v62 = vand.u32 2147483647, %v711_v57  ;;  %v717_v8 = vadd.f32 %v485_v43, %v226_v3  ;;  %v722_v10 = vmul.f32 0.70710677, %v715_v7 }
 0x20d   :  { %v287_v63 = vadd.f32 1.0, %v280_v59  ;;  %v278_v0 = vmul.f32 0.3275911, %v271_v60  ;;  %v728_v12 = vmul.f32 0.70710677, %v719_v9  ;;  %v367_v15 = vmul.f32 %v269_v56, %v269_v56 }
 0x20e   :  { %v283_v1 = vadd.f32 1.0, %v276_v61  ;;  %v274_v2 = vmul.f32 0.3275911, %v267_v62  ;;  %v725_v11 = vmul.f32 0.70710677, %v717_v8  ;;  %v378_v18 = vsub.f32 0.0, %v371_v13 }
 0x20f   :  { %544 = vrcp.f32 %v287_v63  ;;  %v285_v6 = vadd.f32 1.0, %v278_v0  ;;  %v270_v14 = vand.u32 2147483647, %v722_v10  ;;  %v272_v17 = vand.u32 2147483647, %v728_v12 }
 0x210   :  { %546 = vrcp.f32 %v283_v1  ;;  %v281_v5 = vadd.f32 1.0, %v274_v2  ;;  %v268_v16 = vand.u32 2147483647, %v725_v11  ;;  %v365_v23 = vmul.f32 %v267_v62, %v267_v62 }
 0x211   :  { %v277_v20 = vmul.f32 0.3275911, %v270_v14  ;;  %v279_v22 = vmul.f32 0.3275911, %v272_v17  ;;  %v374_v25 = vsub.f32 0.0, %v367_v15  ;;  %v369_v28 = vmul.f32 %v271_v60, %v271_v60 }
 0x212   :  { %548 = vrcp.f32 %v281_v5  ;;  %v275_v21 = vmul.f32 0.3275911, %v268_v16  ;;  %v391_v19 = vmul.f32 1.442695, %v378_v18  ;;  %v372_v33 = vsub.f32 0.0, %v365_v23 }
 0x213   :  { %550 = vrcp.f32 %v285_v6  ;;  %v284_v24 = vadd.f32 1.0, %v277_v20  ;;  %v286_v30 = vadd.f32 1.0, %v279_v22  ;;  %v383_v35 = vmul.f32 1.442695, %v374_v25 }
 0x214   :  { %v282_v29 = vadd.f32 1.0, %v275_v21  ;;  %v376_v38 = vsub.f32 0.0, %v369_v28  ;;  %v368_v40 = vmul.f32 %v270_v14, %v270_v14  ;;  %v379_v43 = vmul.f32 1.442695, %v372_v33 }
 0x215   :  { %552 = vrcp.f32 %v284_v24  ;;  %v366_v49 = vmul.f32 %v268_v16, %v268_v16  ;;  %v370_v60 = vmul.f32 %v272_v17, %v272_v17  ;;  %v754_v13 = vmul.f32 0.5, %v691_v45 }
 0x216   :  { %554 = vrcp.f32 %v282_v29  ;;  %v387_v47 = vmul.f32 1.442695, %v376_v38  ;;  %v375_v59 = vsub.f32 0.0, %v368_v40  ;;  %v762_v18 = vmul.f32 0.5, %v693_v46 }
 0x217   :  { %556 = vrcp.f32 %v286_v30  ;;  %v373_v1 = vsub.f32 0.0, %v366_v49  ;;  %v377_v15 = vsub.f32 0.0, %v370_v60  ;;  %vm411_vm5 = vcmp.lt.f32.partialorder %v707_v55, 0.0 }
 0x218   :  { %558 = vpow2.f32 %v391_v19  ;;  %v385_v14 = vmul.f32 1.442695, %v375_v59  ;;  %vm407_vm6 = vcmp.lt.f32.partialorder %v711_v57, 0.0  ;;  %vm410_vm7 = vcmp.lt.f32.partialorder %v722_v10, 0.0 }
 0x219   :  { %560 = vpow2.f32 %v383_v35  ;;  %v381_v45 = vmul.f32 1.442695, %v373_v1  ;;  %vm408_vm8 = vcmp.lt.f32.partialorder %v725_v11, 0.0  ;;  %vm412_vm9 = vcmp.lt.f32.partialorder %v728_v12, 0.0 }
 0x21a   :  { %562 = vpow2.f32 %v379_v43 }
 0x21b   :  { %564 = vpow2.f32 %v387_v47 }
 0x21c   :  { %v733_v31 = vpop.eup %544  ;;  %566 = vpow2.f32 %v385_v14 }
 0x21d   :  { %v735_v32 = vpop.eup %546  ;;  %v308_v26 = vmul.f32 1.0614054, %v733_v31  ;;  %568 = vpow2.f32 %v381_v45 }
 0x21e   :  { %v304_v34 = vmul.f32 1.0614054, %v735_v32 }
 0x21f   :  { %v315_v39 = vadd.f32 -1.4531521, %v308_v26  ;;  %v739_v27 = vpop.eup %548 }
 0x220   :  { %v311_v36 = vadd.f32 -1.4531521, %v304_v34  ;;  %v302_v42 = vmul.f32 1.0614054, %v739_v27  ;;  %v743_v37 = vpop.eup %550  ;;  %v389_v34 = vmul.f32 1.442695, %v377_v15 }
 0x221   :  { %v322_v41 = vmul.f32 %v733_v31, %v315_v39  ;;  %v306_v56 = vmul.f32 1.0614054, %v743_v37 }
 0x222   :  { %v318_v44 = vmul.f32 %v735_v32, %v311_v36  ;;  %v309_v54 = vadd.f32 -1.4531521, %v302_v42  ;;  %v751_v5 = vpop.eup %552  ;;  %570 = vpow2.f32 %v389_v34 }
 0x223   :  { %v329_v53 = vadd.f32 1.4214138, %v322_v41  ;;  %v313_v63 = vadd.f32 -1.4531521, %v306_v56  ;;  %v756_v16 = vpop.eup %554  ;;  %v305_v22 = vmul.f32 1.0614054, %v751_v5 }
 0x224   :  { %v325_v58 = vadd.f32 1.4214138, %v318_v44  ;;  %v316_v62 = vmul.f32 %v739_v27, %v309_v54  ;;  %v303_v24 = vmul.f32 1.0614054, %v756_v16  ;;  %v767_v26 = vpop.eup %556  ;;  %v253_v54 = vmul.f32 0.5, %v703_v52 }
 0x225   :  { %v336_v61 = vmul.f32 %v733_v31, %v329_v53  ;;  %v320_v4 = vmul.f32 %v743_v37, %v313_v63  ;;  %v312_v30 = vadd.f32 -1.4531521, %v305_v22  ;;  %v559_v36 = vpop.eup %558  ;;  %v307_v42 = vmul.f32 1.0614054, %v767_v26 }
 0x226   :  { %v332_v0 = vmul.f32 %v735_v32, %v325_v58  ;;  %v323_v3 = vadd.f32 1.4214138, %v316_v62  ;;  %v310_v33 = vadd.f32 -1.4531521, %v303_v24  ;;  %v561_v43 = vpop.eup %560 }
 0x227   :  { %v343_v2 = vadd.f32 -0.28449672, %v336_v61  ;;  %v327_v21 = vadd.f32 1.4214138, %v320_v4  ;;  %v319_v39 = vmul.f32 %v751_v5, %v312_v30  ;;  %v314_v58 = vadd.f32 -1.4531521, %v307_v42  ;;  %v563_v62 = vpop.eup %562 }
 0x228   :  { %v339_v6 = vadd.f32 -0.28449672, %v332_v0  ;;  %v330_v20 = vmul.f32 %v739_v27, %v323_v3  ;;  %v317_v41 = vmul.f32 %v756_v16, %v310_v33 }
 0x229   :  { %v350_v17 = vmul.f32 %v733_v31, %v343_v2  ;;  %v334_v29 = vmul.f32 %v743_v37, %v327_v21  ;;  %v326_v53 = vadd.f32 1.4214138, %v319_v39  ;;  %v321_v1 = vmul.f32 %v767_v26, %v314_v58 }
 0x22a   :  { %v346_v23 = vmul.f32 %v735_v32, %v339_v6  ;;  %v337_v28 = vadd.f32 -0.28449672, %v330_v20  ;;  %v324_v56 = vadd.f32 1.4214138, %v317_v41  ;;  %v565_v6 = vpop.eup %564 }
 0x22b   :  { %v357_v25 = vadd.f32 0.2548296, %v350_v17  ;;  %v341_v38 = vadd.f32 -0.28449672, %v334_v29  ;;  %v333_v61 = vmul.f32 %v751_v5, %v326_v53  ;;  %v328_v15 = vadd.f32 1.4214138, %v321_v1  ;;  %v567_v34 = vpop.eup %566 }
 0x22c   :  { %v353_v19 = vadd.f32 0.2548296, %v346_v23  ;;  %v344_v35 = vmul.f32 %v739_v27, %v337_v28  ;;  %v331_v0 = vmul.f32 %v756_v16, %v324_v56  ;;  %v569_v42 = vpop.eup %568 }
 0x22d   :  { %v364_v46 = vmul.f32 %v733_v31, %v357_v25  ;;  %v348_v49 = vmul.f32 %v743_v37, %v341_v38  ;;  %v340_v4 = vadd.f32 -0.28449672, %v333_v61  ;;  %v335_v45 = vmul.f32 %v767_v26, %v328_v15 }
 0x22e   :  { %v360_v40 = vmul.f32 %v735_v32, %v353_v19  ;;  %v351_v47 = vadd.f32 0.2548296, %v344_v35 }
 0x22f   :  { %v399_v44 = vmul.f32 %v559_v36, %v364_v46  ;;  %v355_v60 = vadd.f32 0.2548296, %v348_v49  ;;  %v347_v22 = vmul.f32 %v751_v5, %v340_v4  ;;  %v342_v33 = vadd.f32 -0.28449672, %v335_v45  ;;  %v571_v56 = vpop.eup %570 }
 0x230   :  { %v395_v31 = vmul.f32 %v561_v43, %v360_v40  ;;  %v358_v32 = vmul.f32 %v739_v27, %v351_v47  ;;  %v338_v27 = vadd.f32 -0.28449672, %v331_v0  ;;  %v254_v0 = vmul.f32 0.5, %v717_v8 }
 0x231   :  { %v406_v59 = vsub.f32 1.0, %v399_v44  ;;  %v362_v52 = vmul.f32 %v743_v37, %v355_v60  ;;  %v354_v30 = vadd.f32 0.2548296, %v347_v22  ;;  %v349_v41 = vmul.f32 %v767_v26, %v342_v33 }
 0x232   :  { %v402_v63 = vsub.f32 1.0, %v395_v31  ;;  %v393_v3 = vmul.f32 %v563_v62, %v358_v32  ;;  %v345_v37 = vmul.f32 %v756_v16, %v338_v27 }
 0x233   :  { %v420_v2 = vsub.f32 0.0, %v406_v59  ;;  %v397_v21 = vmul.f32 %v565_v6, %v362_v52  ;;  %v361_v38 = vmul.f32 %v751_v5, %v354_v30  ;;  %v356_v49 = vadd.f32 0.2548296, %v349_v41 }
 0x234   :  { %v416_v14 = vsub.f32 0.0, %v402_v63  ;;  %v400_v20 = vsub.f32 1.0, %v393_v3  ;;  %v352_v48 = vadd.f32 0.2548296, %v345_v37  ;;  %v258_v6 = vmul.f32 0.5, %v719_v9 }
 0x235   :  { %v427_v17 = vsel %vm413_vm2, %v420_v2, %v406_v59  ;;  %v404_v29 = vsub.f32 1.0, %v397_v21  ;;  %v396_v44 = vmul.f32 %v567_v34, %v361_v38  ;;  %v363_v31 = vmul.f32 %v767_v26, %v356_v49 }
 0x236   :  { %v423_v23 = vsel %vm409_vm3, %v416_v14, %v402_v63  ;;  %v434_v24 = vadd.f32 1.0, %v427_v17  ;;  %v414_v28 = vsub.f32 0.0, %v400_v20  ;;  %v359_v40 = vmul.f32 %v756_v16, %v352_v48 }
 0x237   :  { %v430_v25 = vadd.f32 1.0, %v423_v23  ;;  %v418_v35 = vsub.f32 0.0, %v404_v29  ;;  %v403_v16 = vsub.f32 1.0, %v396_v44  ;;  %v398_v32 = vmul.f32 %v571_v56, %v363_v31 }
 0x238   :  { %v441_v19 = vmul.f32 %v434_v24, %v754_v13  ;;  %v421_v51 = vsel %vm407_vm6, %v414_v28, %v400_v20  ;;  %v257_v13 = vmul.f32 0.5, %v698_v50  ;;  %v394_v47 = vmul.f32 %v569_v42, %v359_v40 }
 0x239   :  { %v437_v46 = vmul.f32 %v430_v25, %v762_v18  ;;  %v428_v36 = vadd.f32 1.0, %v421_v51  ;;  %v425_v57 = vsel %vm411_vm5, %v418_v35, %v404_v29  ;;  %v417_v58 = vsub.f32 0.0, %v403_v16 }
 0x23a   :  { %v505_v39 = vpack.c.bf16 %v441_v19, %v441_v19  ;;  %v432_v18 = vadd.f32 1.0, %v425_v57  ;;  %v401_v55 = vsub.f32 1.0, %v394_v47  ;;  %v256_v26 = vmul.f32 0.5, %v715_v7 }
 0x23b   :  { %v501_v43 = vpack.c.bf16 %v437_v46, %v437_v46  ;;  %v435_v5 = vmul.f32 %v428_v36, %v253_v54  ;;  %v424_v60 = vsel %vm410_vm7, %v417_v58, %v403_v16  ;;  %v405_v63 = vsub.f32 1.0, %v398_v32 }
 0x23c   :  { %478 = vst.msk [vmem:[%s841_s5 + $0x18] sm:$0x3] %vm477_vm4, %v505_v39  ;;  %v439_v53 = vmul.f32 %v432_v18, %v257_v13  ;;  %v415_v59 = vsub.f32 0.0, %v401_v55  ;;  %v431_v61 = vadd.f32 1.0, %v424_v60 }
 0x23d   :  { %473 = vst.msk [vmem:[%s841_s5 + $0x8] sm:$0xf] %vm49_vm1, %v501_v43  ;;  %v499_v50 = vpack.c.bf16 %v435_v5, %v435_v5  ;;  %v419_v10 = vsub.f32 0.0, %v405_v63 }
 0x23e   :  { %v503_v54 = vpack.c.bf16 %v439_v53, %v439_v53  ;;  %v422_v62 = vsel %vm408_vm8, %v415_v59, %v401_v55  ;;  %v438_v2 = vmul.f32 %v431_v61, %v256_v26 }
 0x23f   :  { %471 = vst.msk [vmem:[%s841_s5] sm:$0xf] %vm49_vm1, %v499_v50  ;;  %v429_v1 = vadd.f32 1.0, %v422_v62  ;;  %v426_v11 = vsel %vm412_vm9, %v419_v10, %v405_v63 }
 0x240   :  { %475 = vst.msk [vmem:[%s841_s5 + $0x10] sm:$0xf] %vm49_vm1, %v503_v54  ;;  %v502_v52 = vpack.c.bf16 %v438_v2, %v438_v2  ;;  %v433_v14 = vadd.f32 1.0, %v426_v11 }
 0x241   :  { %v436_v3 = vmul.f32 %v429_v1, %v254_v0 }
 0x242   :  { %474 = vst.msk [vmem:[%s841_s5 + $0xc] sm:$0xf] %vm49_vm1, %v502_v52  ;;  %v440_v7 = vmul.f32 %v433_v14, %v258_v6 }
 0x243   :  { %v500_v4 = vpack.c.bf16 %v436_v3, %v436_v3 }
 0x244   :  { %v504_v8 = vpack.c.bf16 %v440_v7, %v440_v7 }
 0x245   :  { %472 = vst.msk [vmem:[%s841_s5 + $0x4] sm:$0xf] %vm49_vm1, %v500_v4 }
 0x246   :  { %476 = vst.msk [vmem:[%s841_s5 + $0x14] sm:$0xf] %vm49_vm1, %v504_v8 }

// kernel: ast_forward.16
= control target key start
LH: loop header
LB: loop body
LE: loop exit
PB: predicated region body
PF: predicated region fallthrough
CT: control target
= control target key end

     0   :  { %vm59_vm0 = vcmask 261120   ;;  %vm170_vm1 = vcmask 257024   ;;  %s313_s1 = inlined_call_operand.vmem [shape: bf16[32,32], index: 1, kind: input, shape index: {}]   ;;  %s314_s0 = inlined_call_operand.vmem [shape: bf16[52,32], index: 0, kind: input, shape index: {}]   ;;  %s315_s3 = inlined_call_operand.vmem [shape: f32[52,32], index: 3, kind: input, shape index: {}, may-alias: {3,4}]   ;;  %s316_s2 = inlined_call_operand.vmem [shape: f32[1,32], index: 2, kind: input, shape index: {}]   ;;  %s317_s4 = inlined_call_operand.vmem [shape: f32[52,32], index: 4, kind: output, shape index: {}, may-alias: {3,4}]  }
   0x1   :  { %v209_v0 = vld [vmem:[%s313_s1 + $0x8] sm:$0xff]   ;;  %v210_v1 = vld [vmem:[%s313_s1] sm:$0xff]   ;;  %v212_v3 = vld [vmem:[%s314_s0 + $0x10] sm:$0xff]  }
   0x2   :  { %193 = vmatprep.subr.bf16.mxu0 %v209_v0  ;;  %205 = vmatprep.subr.bf16.mxu1 %v209_v0  ;;  %v211_v2 = vld [vmem:[%s314_s0] sm:$0xff]   ;;  %v213_v4 = vld [vmem:[%s314_s0 + $0x8] sm:$0xff]   ;;  %v214_v5 = vld [vmem:[%s314_s0 + $0x18] ss:$0 sps:$4 sm:$0x33]  }
   0x3   :  { %194 = vmatpush3.bf16.msra.mxu0 %v209_v0  ;;  %207 = vmatpush3.bf16.msra.mxu1 %v209_v0  ;;  %v138_v6 = vld [vmem:[%s315_s3 + $0x10] sm:$0xff]  ;;  %v186_v9 = vld [vmem:[%s316_s2] ss:$0 sm:$0xff]  ;;  %v139_v17 = vld [vmem:[%s315_s3 + $0x18] sm:$0xff] }
   0x4   :  { %195 = vmatprep.subr.bf16.mxu0 %v210_v1  ;;  %206 = vmatprep.subr.bf16.mxu1 %v210_v1  ;;  %v142_v7 = vld [vmem:[%s315_s3 + $0x30] sm:$0xf]  ;;  %v136_v11 = vld [vmem:[%s315_s3] sm:$0xff]  ;;  %v137_v24 = vld [vmem:[%s315_s3 + $0x8] sm:$0xff] }
   0x5   :  { %197 = vmatprep.mubr.msk.bf16.mxu0 %vm59_vm0, %v211_v2  ;;  %201 = vmatprep.mubr.msk.bf16.mxu1 %vm59_vm0, %v212_v3  ;;  %v140_v12 = vld [vmem:[%s315_s3 + $0x20] sm:$0xff]  ;;  %v141_v25 = vld [vmem:[%s315_s3 + $0x28] sm:$0xff] }
   0x7   :  { %196 = vmatpush3.bf16.msra.mxu0 %v210_v1  ;;  %208 = vmatpush3.bf16.msra.mxu1 %v210_v1 }
   0xa   :  { %198 = vmatmul.mubr.msk.bf16.vlgmr.msra.gmra.mxu0 %vm59_vm0, %v213_v4  ;;  %202 = vmatmul.mubr.msk.bf16.vlgmr.msra.gmra.mxu1 %vm59_vm0, %v214_v5 }
  0xca   :  { %v199_v8 = vpop.f32.mrf.mxu0  ;;  %v203_v10 = vpop.f32.mrf.mxu1 }
  0xcb   :  { %v145_v13 = vadd.f32 %v199_v8, %v138_v6  ;;  %v149_v14 = vadd.f32 %v203_v10, %v142_v7 }
  0xcc   :  { %v106_v15 = vpop.f32.mrf.mxu0  ;;  %v122_v16 = vpop.f32.mrf.mxu1 }
  0xcd   :  { %v159_v18 = vadd.f32 %v186_v9, %v145_v13  ;;  %v163_v19 = vadd.f32 %v186_v9, %v149_v14  ;;  %v143_v20 = vadd.f32 %v136_v11, %v106_v15  ;;  %v147_v21 = vadd.f32 %v140_v12, %v122_v16 }
  0xce   :  { %v200_v22 = vpop.f32.mrf.mxu0  ;;  %v204_v23 = vpop.f32.mrf.mxu1 }
  0xcf   :  { %166 = vst.msk [vmem:[%s317_s4 + $0x10] sm:$0xff] %vm59_vm0, %v159_v18  ;;  %v157_v26 = vadd.f32 %v186_v9, %v143_v20  ;;  %v161_v27 = vadd.f32 %v186_v9, %v147_v21  ;;  %v146_v28 = vadd.f32 %v200_v22, %v139_v17 }
  0xd0   :  { %171 = vst.msk [vmem:[%s317_s4 + $0x30] sm:$0xf] %vm170_vm1, %v163_v19  ;;  %v109_v29 = vpop.f32.mrf.mxu0  ;;  %v125_v30 = vpop.f32.mrf.mxu1 }
  0xd1   :  { %164 = vst.msk [vmem:[%s317_s4] sm:$0xff] %vm59_vm0, %v157_v26  ;;  %168 = vst.msk [vmem:[%s317_s4 + $0x20] sm:$0xff] %vm59_vm0, %v161_v27  ;;  %v160_v31 = vadd.f32 %v186_v9, %v146_v28  ;;  %v144_v32 = vadd.f32 %v137_v24, %v109_v29  ;;  %v148_v33 = vadd.f32 %v141_v25, %v125_v30 }
  0xd3   :  { %167 = vst.msk [vmem:[%s317_s4 + $0x18] sm:$0xff] %vm59_vm0, %v160_v31  ;;  %v158_v34 = vadd.f32 %v186_v9, %v144_v32  ;;  %v162_v35 = vadd.f32 %v186_v9, %v148_v33 }
  0xd5   :  { %165 = vst.msk [vmem:[%s317_s4 + $0x8] sm:$0xff] %vm59_vm0, %v158_v34  ;;  %169 = vst.msk [vmem:[%s317_s4 + $0x28] sm:$0xff] %vm59_vm0, %v162_v35 }

// kernel: ast_forward.25
= control target key start
LH: loop header
LB: loop body
LE: loop exit
PB: predicated region body
PF: predicated region fallthrough
CT: control target
= control target key end

     0   :  { %v142_v1 = vmov 0.0   ;;  %vm143_vm0 = vmmov 0   ;;  %s180_s0 = inlined_call_operand.vmem [shape: bf16[2,32], index: 0, kind: input, shape index: {}]   ;;  %s181_s1 = inlined_call_operand.vmem [shape: bf16[32,16], index: 1, kind: input, shape index: {}]   ;;  %s182_s2 = inlined_call_operand.vmem [shape: f32[1,16], index: 2, kind: input, shape index: {}]   ;;  %s183_s3 = inlined_call_operand.hbm [shape: f32[2,16], index: 3, kind: output, shape index: {}]  }
   0x1   :  { %v118_v0 = vld [vmem:[%s181_s1 + $0x8] sm:$0xff]   ;;  %107 = vmatprep.subr.bf16.mxu0 %v142_v1  ;;  %v119_v2 = vld [vmem:[%s181_s1] sm:$0xff]   ;;  %111 = vmatprep.mubr.msk.bf16.mxu0 %vm143_vm0, %v142_v1 }
   0x2   :  { %108 = vmatpush3.bf16.msra.mxu0 %v118_v0 }
   0x3   :  { %109 = vmatprep.subr.bf16.mxu0 %v142_v1 }
   0x4   :  { %8 = vsyncpa [#allocation3], 0  ;;  %v16_v3 = vld [vmem:[%s180_s0] sm:$0x1]  ;;  %vm40_vm1 = vcmask 261120   ;;  %s144_s20 = smov [#allocation2]  }
   0x5   :  { %v100_v4 = vld [vmem:[%s182_s2] ss:$0 sm:$0xff]  ;;  %s92_s21 = sshll.u32 %s144_s20, 4  ;;  %vm84_vm2 = vcmask 123904   ;;  %s93_s21 = int_to_ptr.vmem [resolvable:$true] %s92_s21 }
   0x6   :  { %110 = vmatpush3.bf16.msra.mxu0 %v119_v2  ;;  %s120_s1 = scalar_lea.vmem %s93_s21, 32  ;;  %p125_p1 = scmp.lt.s32.totalorder %s93_s21, %s93_s21 }
   0x7   :  { %p121_p0 = scmp.ne.s32.totalorder %s93_s21, %s120_s1  ;;  %p126_p2 = scmp.lt.s32.totalorder %s120_s1, %s120_s1 }
   0x9   :  { %112 = vmatmul.mubr.msk.bf16.vlgmr.msra.gmra.mxu0 %vm40_vm1, %v16_v3  ;;  %p127_p3 = por %p126_p2, %p125_p1 }
   0xb   :  { %p128_p4 = pnand %p127_p3, %p121_p0 }
  0xc9   :  { %v78_v5 = vpop.f32.mrf.mxu0 }
  0xca   :  { %v79_v6 = vadd.f32 %v100_v4, %v78_v5 }
  0xcb   :  { %v113_v7 = vpop.f32.mrf.mxu0 }
  0xcc   :  { %85 = vst.msk [vmem:[#allocation2] sm:$0x3] %vm84_vm2, %v79_v6 }
  0xcd   :  { %v81_v8 = vpop.f32.mrf.mxu0 }
  0xce   :  { %131 = shalt.err (!%p128_p4)
}
  0xcf   :  { %95 = dma.vmem_to_hbm [thread:$0]  %s93_s21, 32, %s183_s3, [#allocation3]   ;;  %v114_v9 = vpop.f32.mrf.mxu0 }
  0xd0   :  { %140 = dma.done.wait [#allocation3], 32  }
  0xd1   :  { %141 = vsyncadd [#allocation3], 4294967264 }
  0xd2   :  { %99 = vsyncpa [#allocation3], 1 }

// kernel: ast_forward.24
= control target key start
LH: loop header
LB: loop body
LE: loop exit
PB: predicated region body
PF: predicated region fallthrough
CT: control target
= control target key end

     0   :  { %vm24_vm0 = vcmask 254976   ;;  %v182_v7 = vmov 0.0   ;;  %vm183_vm1 = vmmov 0   ;;  %vm77_vm2 = vcmask 261120   ;;  %s235_s0 = inlined_call_operand.vmem [shape: f32[2,32], index: 0, kind: input, shape index: {}]   ;;  %s236_s3 = inlined_call_operand.vmem [shape: bf16[32,32], index: 3, kind: input, shape index: {}]   ;;  %s237_s1 = inlined_call_operand.vmem [shape: f32[1,32], index: 1, kind: input, shape index: {}]   ;;  %s238_s2 = inlined_call_operand.vmem [shape: f32[1,32], index: 2, kind: input, shape index: {}]   ;;  %s239_s4 = inlined_call_operand.vmem [shape: f32[1,32], index: 4, kind: input, shape index: {}]   ;;  %s240_s5 = inlined_call_operand.vmem [shape: bf16[2,32], index: 5, kind: output, shape index: {}]  }
   0x1   :  { %v21_v0 = vld [vmem:[%s235_s0] sm:$0x3]  ;;  %164 = vmatprep.subr.bf16.mxu0 %v182_v7  ;;  %v174_v8 = vld [vmem:[%s236_s3 + $0x8] sm:$0xff]   ;;  %168 = vmatprep.mubr.msk.bf16.mxu0 %vm183_vm1, %v182_v7  ;;  %vm149_vm4 = vcmask 253952  }
   0x2   :  { %v25_v1 = vsel %vm24_vm0, %v21_v0, 0.0  ;;  %165 = vmatpush3.bf16.msra.mxu0 %v174_v8  ;;  %v175_v9 = vld [vmem:[%s236_s3] sm:$0xff]  }
   0x3   :  { %26 = vadd.xlane.f32.xlu0 %v25_v1  ;;  %166 = vmatprep.subr.bf16.mxu0 %v182_v7  ;;  %v155_v14 = vld [vmem:[%s237_s1] ss:$0 sm:$0xff] }
   0x4   :  { %v156_v16 = vld [vmem:[%s238_s2] ss:$0 sm:$0xff] }
   0x5   :  { %v157_v20 = vld [vmem:[%s239_s4] ss:$0 sm:$0xff] }
   0x6   :  { %167 = vmatpush3.bf16.msra.mxu0 %v175_v9 }
  0x8c   :  { %v27_v2 = vpop.xlane.xlu0 %26 }
  0x8d   :  { %v29_v3 = vmul.f32 0.03125, %v27_v2 }
  0x8f   :  { %v30_v4 = vsub.f32 %v21_v0, %v29_v3 }
  0x91   :  { %v31_v5 = vmul.f32 %v30_v4, %v30_v4 }
  0x93   :  { %v32_v6 = vsel %vm24_vm0, %v31_v5, 0.0 }
  0x94   :  { %33 = vadd.xlane.f32.xlu0 %v32_v6 }
 0x11d   :  { %v34_v10 = vpop.xlane.xlu0 %33 }
 0x11e   :  { %v35_v11 = vmul.f32 0.03125, %v34_v10 }
 0x120   :  { %v36_v12 = vadd.f32 1e-05, %v35_v11 }
 0x122   :  { %176 = vrsqrt.f32 %v36_v12 }
 0x12f   :  { %v177_v13 = vpop.eup %176 }
 0x130   :  { %v38_v15 = vmul.f32 %v177_v13, %v30_v4 }
 0x132   :  { %v45_v17 = vmul.f32 %v155_v14, %v38_v15 }
 0x134   :  { %v52_v18 = vadd.f32 %v156_v16, %v45_v17 }
 0x136   :  { %v53_v19 = vpack.c.bf16 %v52_v18, %v52_v18 }
 0x138   :  { %169 = vmatmul.mubr.msk.bf16.vlgmr.msra.gmra.mxu0 %vm77_vm2, %v53_v19 }
 0x1f8   :  { %v115_v21 = vpop.f32.mrf.mxu0 }
 0x1f9   :  { %v116_v22 = vadd.f32 %v157_v20, %v115_v21 }
 0x1fa   :  { %v170_v23 = vpop.f32.mrf.mxu0 }
 0x1fb   :  { %v122_v24 = vmul.f32 0.70710677, %v116_v22  ;;  %v121_v48 = vmul.f32 0.5, %v116_v22 }
 0x1fc   :  { %v118_v25 = vpop.f32.mrf.mxu0 }
 0x1fd   :  { %v123_v26 = vand.u32 2147483647, %v122_v24  ;;  %vm143_vm3 = vcmp.lt.f32.partialorder %v122_v24, 0.0 }
 0x1fe   :  { %v171_v27 = vpop.f32.mrf.mxu0 }
 0x1ff   :  { %v124_v28 = vmul.f32 0.3275911, %v123_v26  ;;  %v137_v30 = vmul.f32 %v123_v26, %v123_v26 }
 0x201   :  { %v125_v29 = vadd.f32 1.0, %v124_v28  ;;  %v138_v31 = vsub.f32 0.0, %v137_v30 }
 0x203   :  { %178 = vrcp.f32 %v125_v29  ;;  %v139_v34 = vmul.f32 1.442695, %v138_v31 }
 0x205   :  { %180 = vpow2.f32 %v139_v34 }
 0x210   :  { %v179_v32 = vpop.eup %178 }
 0x211   :  { %v128_v33 = vmul.f32 1.0614054, %v179_v32 }
 0x212   :  { %v181_v43 = vpop.eup %180 }
 0x213   :  { %v129_v35 = vadd.f32 -1.4531521, %v128_v33 }
 0x215   :  { %v130_v36 = vmul.f32 %v179_v32, %v129_v35 }
 0x217   :  { %v131_v37 = vadd.f32 1.4214138, %v130_v36 }
 0x219   :  { %v132_v38 = vmul.f32 %v179_v32, %v131_v37 }
 0x21b   :  { %v133_v39 = vadd.f32 -0.28449672, %v132_v38 }
 0x21d   :  { %v134_v40 = vmul.f32 %v179_v32, %v133_v39 }
 0x21f   :  { %v135_v41 = vadd.f32 0.2548296, %v134_v40 }
 0x221   :  { %v136_v42 = vmul.f32 %v179_v32, %v135_v41 }
 0x223   :  { %v141_v44 = vmul.f32 %v181_v43, %v136_v42 }
 0x225   :  { %v142_v45 = vsub.f32 1.0, %v141_v44 }
 0x227   :  { %v144_v46 = vsub.f32 0.0, %v142_v45 }
 0x229   :  { %v145_v47 = vsel %vm143_vm3, %v144_v46, %v142_v45 }
 0x22a   :  { %v146_v49 = vadd.f32 1.0, %v145_v47 }
 0x22c   :  { %v147_v50 = vmul.f32 %v146_v49, %v121_v48 }
 0x22e   :  { %v148_v51 = vpack.c.bf16 %v147_v50, %v147_v50 }
 0x230   :  { %150 = vst.msk [vmem:[%s240_s5] sm:$0x1] %vm149_vm4, %v148_v51 }

</bundles_post_ra>
